<compile_context>
chip_gen: v5e
topology: v5e:2x2
jax: 0.10.0
libtpu: 0.0.40
codegen_flags: <defaults>
</compile_context>

<pallas_src>
import functools

import jax
import jax.numpy as jnp
from jax.experimental import pallas as pl
from jax.experimental.pallas import tpu as pltpu

KSIZE = 7
PAD = KSIZE // 2


# --------------------------------------------------------------------------
# In-kernel helpers
# --------------------------------------------------------------------------
def _sigmoid(z):
    # exp on the EUP; approx reciprocal (EUP vrcp) keeps the divide off the
    # VALU; one Newton-Raphson step restores ~f32 accuracy.
    d = 1.0 + jnp.exp(-z)
    r = pl.reciprocal(d, approx=True)
    return r * (2.0 - d * r)


def _channel_attention(xb, w1_ref, w2_ref):
    # xb: (Bb, C, HW) f32 ; w1_ref: (hidden, C, 1) ; w2_ref: (C, hidden)
    hw = xb.shape[-1]
    hidden = w1_ref.shape[0]
    pooled = jnp.sum(xb, axis=-1, keepdims=True) * (1.0 / float(hw))     # (Bb, C, 1)
    z = None
    for j in range(hidden):                       # hidden = C // reduction (tiny)
        hj = jnp.sum(w1_ref[j] * pooled, axis=1, keepdims=True)          # (Bb, 1, 1)
        hj = jnp.maximum(hj, 0.0)                                        # ReLU
        term = w2_ref[:, j:j + 1] * hj                                   # (Bb, C, 1)
        z = term if z is None else z + term
    return xb * _sigmoid(z)                                              # (Bb, C, HW)


# --------------------------------------------------------------------------
# Kernel A: spatial conv on the MXU via precomputed (HW, HW) scatter matrices
# --------------------------------------------------------------------------
def cbam_kernel_mxu(x_ref, w1_ref, w2_ref, cm_ref, o_ref, spat_sc):
    # x_ref:   (Bb, C, HW)     cm_ref: (2, HW, HW)   spat_sc: (Bb, 1, HW) VMEM
    xb = x_ref[...].astype(jnp.float32)
    x_ca = _channel_attention(xb, w1_ref, w2_ref)                        # (Bb, C, HW)

    avg2d = jnp.mean(x_ca, axis=1)                                       # (Bb, HW)
    max2d = jnp.max(x_ca, axis=1)                                        # (Bb, HW)
    conv = (jnp.dot(avg2d, cm_ref[0], preferred_element_type=jnp.float32,
                    precision=jax.lax.Precision.HIGHEST)
            + jnp.dot(max2d, cm_ref[1], preferred_element_type=jnp.float32,
                      precision=jax.lax.Precision.HIGHEST))              # (Bb, HW)

    spat_sc[:, 0, :] = _sigmoid(conv)                                    # (Bb, 1, HW)
    o_ref[...] = (x_ca * spat_sc[...]).astype(o_ref.dtype)               # lane-dense store


# --------------------------------------------------------------------------
# Kernel B (fallback, large HW): stacked-map roll conv, 49 XLU rolls
# --------------------------------------------------------------------------
def cbam_kernel_roll(x_ref, w1_ref, w2_ref, wmask_ref, o_ref, sm_sc, *, width):
    # wmask_ref: (49, 2, HW)   sm_sc: (Bb, 2, HW) VMEM scratch
    xb = x_ref[...].astype(jnp.float32)
    hw = xb.shape[-1]
    x_ca = _channel_attention(xb, w1_ref, w2_ref)

    sm_sc[:, 0:1, :] = jnp.mean(x_ca, axis=1, keepdims=True)             # avg map
    sm_sc[:, 1:2, :] = jnp.max(x_ca, axis=1, keepdims=True)              # max map
    sm = sm_sc[...]                                                      # (Bb, 2, HW)

    acc_a = None                         # two independent accumulation chains (ILP)
    acc_b = None
    for dy in range(KSIZE):
        for dx in range(KSIZE):
            tap = dy * KSIZE + dx
            s = (dy - PAD) * width + (dx - PAD)                          # flat src offset
            shift = (-s) % hw
            rolled = sm if shift == 0 else pltpu.roll(sm, shift, 2)      # one roll / tap
            term = wmask_ref[tap] * rolled                               # (2,HW)*(Bb,2,HW)
            if tap % 2 == 0:
                acc_a = term if acc_a is None else acc_a + term
            else:
                acc_b = term if acc_b is None else acc_b + term
    conv = jnp.sum(acc_a + acc_b, axis=1, keepdims=True)                 # (Bb, 1, HW)
    o_ref[...] = (x_ca * _sigmoid(conv)).astype(o_ref.dtype)


# --------------------------------------------------------------------------
# Wrapper-side constant builders
# --------------------------------------------------------------------------
def _build_conv_matrices(wconv, H, W):
    """(2, HW, HW): M[c][s, t] = wconv[0, c, dy, dx] for valid target t <- src s."""
    HW = H * W
    th = jnp.arange(HW, dtype=jnp.int32) // W
    tw = jnp.arange(HW, dtype=jnp.int32) % W
    src = jnp.arange(HW, dtype=jnp.int32)[:, None]                       # (HW, 1)
    wk = wconv.reshape(2, KSIZE, KSIZE).astype(jnp.float32)
    mats = []
    for c in range(2):
        m = jnp.zeros((HW, HW), jnp.float32)
        for dy in range(KSIZE):
            for dx in range(KSIZE):
                sh = th + (dy - PAD)
                sw = tw + (dx - PAD)
                valid = (sh >= 0) & (sh < H) & (sw >= 0) & (sw < W)
                sidx = sh * W + sw
                hit = (src == sidx[None, :]) & valid[None, :]
                m = m + wk[c, dy, dx] * hit.astype(jnp.float32)
        mats.append(m)
    return jnp.stack(mats)                                               # (2, HW, HW)


def _build_tap_masks(wconv, H, W):
    """(49, 2, HW): weight * zero-pad validity per tap, both (avg, max) channels."""
    HW = H * W
    th = jnp.arange(HW, dtype=jnp.int32) // W
    tw = jnp.arange(HW, dtype=jnp.int32) % W
    valid = []
    for dy in range(KSIZE):
        for dx in range(KSIZE):
            v = ((th + (dy - PAD) >= 0) & (th + (dy - PAD) < H) &
                 (tw + (dx - PAD) >= 0) & (tw + (dx - PAD) < W))
            valid.append(v)
    valid = jnp.stack(valid).astype(jnp.float32)                         # (49, HW)
    w2 = wconv.reshape(2, KSIZE * KSIZE).astype(jnp.float32)             # (2, 49)
    return w2.T[:, :, None] * valid[:, None, :]                          # (49, 2, HW)


# --------------------------------------------------------------------------
# Block-size heuristic (generation-aware)
# --------------------------------------------------------------------------
def _two_tensorcores_per_chip():
    try:
        kind = jax.devices()[0].device_kind.lower()
    except Exception:
        return False
    return ("v7" in kind) or ("7x" in kind)


def _pick_batch_block(batch, per_elem_bytes, two_cores):
    # Multi-MiB lane-dense blocks amortize the ~0.35 us/grid-step overhead.
    # On 2-TC chips keep an even number of >= 2 steps so the "parallel" batch
    # axis shards across both TensorCores; size against 64 MiB VMEM.
    target = (3 << 20) if two_cores else (6 << 20)
    divisors = [d for d in range(1, batch + 1) if batch % d == 0]
    fits = [d for d in divisors if d * per_elem_bytes <= target] or [1]
    if two_cores:
        pref = [d for d in fits if (batch // d) >= 2 and (batch // d) % 2 == 0]
        if pref:
            return max(pref)
    return max(fits)


# --------------------------------------------------------------------------
# Forward
# --------------------------------------------------------------------------
@functools.partial(jax.jit, static_argnames=("force_roll",))
def cbam_forward(x, w1, w2, wconv, force_roll=False):
    B, C, H, W = x.shape
    HW = H * W
    hidden = w1.shape[0]

    x_flat = x.reshape(B, C, HW)                 # contiguous -> free reshape
    w1_3d = w1.reshape(hidden, C, 1)

    two_cores = _two_tensorcores_per_chip()
    per_elem = C * HW * x.dtype.itemsize
    bb = _pick_batch_block(B, per_elem, two_cores)
    grid = (B // bb,)

    # MXU path only for small maps (matrices cost 2 * 4*HW^2 bytes of VMEM).
    use_mxu = (not force_roll) and (HW <= 1024)

    # VMEM footprint estimate: double-buffered in/out blocks + f32 temps + consts.
    block_bytes = bb * per_elem
    const_bytes = 2 * HW * HW * 4 if use_mxu else KSIZE * KSIZE * 8 * HW * 4
    need = 4 * block_bytes + 2 * bb * C * HW * 4 + const_bytes + (1 << 20)
    cp_kwargs = dict(dimension_semantics=("parallel",))
    if need > (16 << 20):
        cp_kwargs["vmem_limit_bytes"] = int(min(2 * need, 48 << 20))
    compiler_params = pltpu.CompilerParams(**cp_kwargs)

    if use_mxu:
        conv_mat = _build_conv_matrices(wconv, H, W)
        out_flat = pl.pallas_call(
            cbam_kernel_mxu,
            out_shape=jax.ShapeDtypeStruct((B, C, HW), x.dtype),
            grid_spec=pltpu.PrefetchScalarGridSpec(
                num_scalar_prefetch=0,
                grid=grid,
                in_specs=[
                    pl.BlockSpec((bb, C, HW), lambda i: (i, 0, 0)),
                    pl.BlockSpec((hidden, C, 1), lambda i: (0, 0, 0)),
                    pl.BlockSpec((C, hidden), lambda i: (0, 0)),
                    pl.BlockSpec((2, HW, HW), lambda i: (0, 0, 0)),
                ],
                out_specs=pl.BlockSpec((bb, C, HW), lambda i: (i, 0, 0)),
                scratch_shapes=[pltpu.VMEM((bb, 1, HW), jnp.float32)],
            ),
            compiler_params=compiler_params,
        )(x_flat, w1_3d, w2, conv_mat)
    else:
        wmask = _build_tap_masks(wconv, H, W)
        kernel = functools.partial(cbam_kernel_roll, width=W)
        out_flat = pl.pallas_call(
            kernel,
            out_shape=jax.ShapeDtypeStruct((B, C, HW), x.dtype),
            grid_spec=pltpu.PrefetchScalarGridSpec(
                num_scalar_prefetch=0,
                grid=grid,
                in_specs=[
                    pl.BlockSpec((bb, C, HW), lambda i: (i, 0, 0)),
                    pl.BlockSpec((hidden, C, 1), lambda i: (0, 0, 0)),
                    pl.BlockSpec((C, hidden), lambda i: (0, 0)),
                    pl.BlockSpec((KSIZE * KSIZE, 2, HW), lambda i: (0, 0, 0)),
                ],
                out_specs=pl.BlockSpec((bb, C, HW), lambda i: (i, 0, 0)),
                scratch_shapes=[pltpu.VMEM((bb, 2, HW), jnp.float32)],
            ),
            compiler_params=compiler_params,
        )(x_flat, w1_3d, w2, wmask)
    return out_flat.reshape(B, C, H, W)


# --------------------------------------------------------------------------
# Pure-JAX reference matching the PyTorch forward semantics
# --------------------------------------------------------------------------
def cbam_reference(x, w1, w2, wconv):
    hp = jax.lax.Precision.HIGHEST
    pooled = jnp.mean(x, axis=(2, 3))                                    # (B, C)
    h = jax.nn.relu(jnp.dot(pooled, w1.T, precision=hp))                 # (B, hidden)
    y = jax.nn.sigmoid(jnp.dot(h, w2.T, precision=hp))                   # (B, C)
    x_ca = x * y[:, :, None, None]
    avg = jnp.mean(x_ca, axis=1, keepdims=True)
    mx = jnp.max(x_ca, axis=1, keepdims=True)
    sm = jnp.concatenate([avg, mx], axis=1)                              # (B, 2, H, W)
    conv = jax.lax.conv_general_dilated(
        sm, wconv, window_strides=(1, 1), padding=[(PAD, PAD), (PAD, PAD)],
        dimension_numbers=("NCHW", "OIHW", "NCHW"), precision=hp)
    spat = jax.nn.sigmoid(conv)                                          # (B, 1, H, W)
    return x_ca * spat


if __name__ == "__main__":
    B, C, H, W = 2, 32, 16, 16
    reduction = 16
    hidden = C // reduction                                              # 2

    key = jax.random.PRNGKey(0)
    k1, k2, k3, k4 = jax.random.split(key, 4)
    x = jax.random.normal(k1, (B, C, H, W), dtype=jnp.float32)
    w1 = jax.random.normal(k2, (hidden, C), dtype=jnp.float32) * 0.2     # Linear(C->hidden).weight
    w2 = jax.random.normal(k3, (C, hidden), dtype=jnp.float32) * 0.2     # Linear(hidden->C).weight
    wconv = jax.random.normal(k4, (1, 2, KSIZE, KSIZE), dtype=jnp.float32) * 0.1  # Conv2d(2,1,7).weight

    # Main check (MXU conv path).
    out = jax.block_until_ready(cbam_forward(x, w1, w2, wconv))
    ref = cbam_reference(x, w1, w2, wconv)
    assert out.shape == (B, C, H, W)
    assert jnp.allclose(out, ref, atol=1e-4, rtol=1e-4), \
        f"max abs err = {float(jnp.max(jnp.abs(out - ref)))}"

    # Secondary check: non-square map through the roll fallback path (locks in
    # tap ordering / pltpu.roll semantics with H != W).
    H2, W2 = 16, 8
    x2 = jax.random.normal(k1, (B, C, H2, W2), dtype=jnp.float32)
    out2 = jax.block_until_ready(cbam_forward(x2, w1, w2, wconv, force_roll=True))
    ref2 = cbam_reference(x2, w1, w2, wconv)
    assert jnp.allclose(out2, ref2, atol=1e-4, rtol=1e-4), \
        f"max abs err (roll path) = {float(jnp.max(jnp.abs(out2 - ref2)))}"

    print("KERNEL_OK")
</pallas_src>

<mosaic_0001>
module attributes {stable_mosaic.version = 11 : i64} {
  func.func @cbam_kernel_mxu(%arg0: i32, %arg1: memref<2x32x256xf32, #tpu.memory_space<vmem>>, %arg2: memref<2x32x1xf32, #tpu.memory_space<vmem>>, %arg3: memref<32x2xf32, #tpu.memory_space<vmem>>, %arg4: memref<2x256x256xf32, #tpu.memory_space<vmem>>, %arg5: memref<2x32x256xf32, #tpu.memory_space<vmem>>, %arg6: memref<2x1x256xf32, #tpu.memory_space<vmem>>) attributes {dimension_semantics = [#tpu.dimension_semantics<parallel>], iteration_bounds = array<i64: 1>, scalar_prefetch = 0 : i64, scratch_operands = 1 : i64, tpu.core_type = #tpu.core_type<tc>, window_params = [{transform_indices = @transform_0, window_bounds = array<i64: 2, 32, 256>}, {pipeline_mode = #tpu.pipeline_mode<synchronous>, transform_indices = @transform_1, window_bounds = array<i64: 2, 32, 1>}, {pipeline_mode = #tpu.pipeline_mode<synchronous>, transform_indices = @transform_2, window_bounds = array<i64: 32, 2>}, {pipeline_mode = #tpu.pipeline_mode<synchronous>, transform_indices = @transform_3, window_bounds = array<i64: 2, 256, 256>}, {transform_indices = @transform_4, window_bounds = array<i64: 2, 32, 256>}]} {
    %c0 = arith.constant 0 : index
    %c0_0 = arith.constant 0 : index
    %c0_1 = arith.constant 0 : index
    %0 = vector.load %arg1[%c0, %c0_0, %c0_1] : memref<2x32x256xf32, #tpu.memory_space<vmem>>, vector<2x32x256xf32>
    %cst = arith.constant dense<0.000000e+00> : vector<2x32xf32>
    %1 = vector.multi_reduction <add>, %0, %cst [2] : vector<2x32x256xf32> to vector<2x32xf32>
    %2 = vector.shape_cast %1 : vector<2x32xf32> to vector<2x32x1xf32>
    %cst_2 = arith.constant 3.906250e-03 : f32
    %3 = vector.broadcast %cst_2 : f32 to vector<2x32x1xf32>
    %4 = arith.mulf %2, %3 : vector<2x32x1xf32>
    %c0_3 = arith.constant 0 : index
    %c0_4 = arith.constant 0 : index
    %c0_5 = arith.constant 0 : index
    %5 = vector.load %arg2[%c0_3, %c0_4, %c0_5] : memref<2x32x1xf32, #tpu.memory_space<vmem>>, vector<1x32x1xf32>
    %6 = vector.shape_cast %5 : vector<1x32x1xf32> to vector<32x1xf32>
    %7 = vector.shape_cast %6 : vector<32x1xf32> to vector<1x32x1xf32>
    %8 = vector.broadcast %7 : vector<1x32x1xf32> to vector<2x32x1xf32>
    %9 = arith.mulf %8, %4 : vector<2x32x1xf32>
    %cst_6 = arith.constant dense<0.000000e+00> : vector<2x1xf32>
    %10 = vector.multi_reduction <add>, %9, %cst_6 [1] : vector<2x32x1xf32> to vector<2x1xf32>
    %11 = vector.shape_cast %10 : vector<2x1xf32> to vector<2x1x1xf32>
    %cst_7 = arith.constant 0.000000e+00 : f32
    %12 = vector.broadcast %cst_7 : f32 to vector<2x1x1xf32>
    %13 = arith.maximumf %11, %12 : vector<2x1x1xf32>
    %c0_8 = arith.constant 0 : index
    %c0_9 = arith.constant 0 : index
    %14 = vector.load %arg3[%c0_8, %c0_9] : memref<32x2xf32, #tpu.memory_space<vmem>>, vector<32x1xf32>
    %15 = vector.shape_cast %14 : vector<32x1xf32> to vector<1x32x1xf32>
    %16 = vector.broadcast %15 : vector<1x32x1xf32> to vector<2x32x1xf32>
    %17 = vector.broadcast %13 : vector<2x1x1xf32> to vector<2x32x1xf32>
    %18 = arith.mulf %16, %17 : vector<2x32x1xf32>
    %c1 = arith.constant 1 : index
    %c0_10 = arith.constant 0 : index
    %c0_11 = arith.constant 0 : index
    %19 = vector.load %arg2[%c1, %c0_10, %c0_11] : memref<2x32x1xf32, #tpu.memory_space<vmem>>, vector<1x32x1xf32>
    %20 = vector.shape_cast %19 : vector<1x32x1xf32> to vector<32x1xf32>
    %21 = vector.shape_cast %20 : vector<32x1xf32> to vector<1x32x1xf32>
    %22 = vector.broadcast %21 : vector<1x32x1xf32> to vector<2x32x1xf32>
    %23 = arith.mulf %22, %4 : vector<2x32x1xf32>
    %cst_12 = arith.constant dense<0.000000e+00> : vector<2x1xf32>
    %24 = vector.multi_reduction <add>, %23, %cst_12 [1] : vector<2x32x1xf32> to vector<2x1xf32>
    %25 = vector.shape_cast %24 : vector<2x1xf32> to vector<2x1x1xf32>
    %cst_13 = arith.constant 0.000000e+00 : f32
    %26 = vector.broadcast %cst_13 : f32 to vector<2x1x1xf32>
    %27 = arith.maximumf %25, %26 : vector<2x1x1xf32>
    %c0_14 = arith.constant 0 : index
    %c1_15 = arith.constant 1 : index
    %28 = vector.load %arg3[%c0_14, %c1_15] : memref<32x2xf32, #tpu.memory_space<vmem>>, vector<32x1xf32>
    %29 = vector.shape_cast %28 : vector<32x1xf32> to vector<1x32x1xf32>
    %30 = vector.broadcast %29 : vector<1x32x1xf32> to vector<2x32x1xf32>
    %31 = vector.broadcast %27 : vector<2x1x1xf32> to vector<2x32x1xf32>
    %32 = arith.mulf %30, %31 : vector<2x32x1xf32>
    %33 = arith.addf %18, %32 : vector<2x32x1xf32>
    %cst_16 = arith.constant 0.000000e+00 : f32
    %34 = vector.broadcast %cst_16 : f32 to vector<2x32x1xf32>
    %35 = arith.subf %34, %33 : vector<2x32x1xf32>
    %36 = math.exp %35 : vector<2x32x1xf32>
    %cst_17 = arith.constant 1.000000e+00 : f32
    %37 = vector.broadcast %cst_17 : f32 to vector<2x32x1xf32>
    %38 = arith.addf %37, %36 : vector<2x32x1xf32>
    %39 = tpu.reciprocal %38 {approx = true} : vector<2x32x1xf32> -> vector<2x32x1xf32>
    %40 = arith.mulf %38, %39 : vector<2x32x1xf32>
    %cst_18 = arith.constant 2.000000e+00 : f32
    %41 = vector.broadcast %cst_18 : f32 to vector<2x32x1xf32>
    %42 = arith.subf %41, %40 : vector<2x32x1xf32>
    %43 = arith.mulf %39, %42 : vector<2x32x1xf32>
    %44 = vector.broadcast %43 : vector<2x32x1xf32> to vector<2x32x256xf32>
    %45 = arith.mulf %0, %44 : vector<2x32x256xf32>
    %cst_19 = arith.constant dense<0.000000e+00> : vector<2x256xf32>
    %46 = vector.multi_reduction <add>, %45, %cst_19 [1] : vector<2x32x256xf32> to vector<2x256xf32>
    %cst_20 = arith.constant 3.200000e+01 : f32
    %47 = vector.broadcast %cst_20 : f32 to vector<2x256xf32>
    %48 = arith.divf %46, %47 : vector<2x256xf32>
    %cst_21 = arith.constant dense<0xFF800000> : vector<2x256xf32>
    %49 = vector.multi_reduction <maximumf>, %45, %cst_21 [1] : vector<2x32x256xf32> to vector<2x256xf32>
    %c0_22 = arith.constant 0 : index
    %c0_23 = arith.constant 0 : index
    %c0_24 = arith.constant 0 : index
    %50 = vector.load %arg4[%c0_22, %c0_23, %c0_24] : memref<2x256x256xf32, #tpu.memory_space<vmem>>, vector<1x256x256xf32>
    %51 = vector.shape_cast %50 : vector<1x256x256xf32> to vector<256x256xf32>
    %cst_25 = arith.constant dense<0.000000e+00> : vector<2x256xf32>
    %52 = tpu.matmul %48, %51, %cst_25 {dimension_numbers = #tpu.dot_dimension_numbers<[1], [0], [0], [1], [0, 0, 1, 1], [], []>, precision = #tpu.contract_precision<fp32>} : vector<2x256xf32>, vector<256x256xf32>, vector<2x256xf32> -> vector<2x256xf32>
    %c1_26 = arith.constant 1 : index
    %c0_27 = arith.constant 0 : index
    %c0_28 = arith.constant 0 : index
    %53 = vector.load %arg4[%c1_26, %c0_27, %c0_28] : memref<2x256x256xf32, #tpu.memory_space<vmem>>, vector<1x256x256xf32>
    %54 = vector.shape_cast %53 : vector<1x256x256xf32> to vector<256x256xf32>
    %cst_29 = arith.constant dense<0.000000e+00> : vector<2x256xf32>
    %55 = tpu.matmul %49, %54, %cst_29 {dimension_numbers = #tpu.dot_dimension_numbers<[1], [0], [0], [1], [0, 0, 1, 1], [], []>, precision = #tpu.contract_precision<fp32>} : vector<2x256xf32>, vector<256x256xf32>, vector<2x256xf32> -> vector<2x256xf32>
    %56 = arith.addf %52, %55 : vector<2x256xf32>
    %cst_30 = arith.constant 0.000000e+00 : f32
    %57 = vector.broadcast %cst_30 : f32 to vector<2x256xf32>
    %58 = arith.subf %57, %56 : vector<2x256xf32>
    %59 = math.exp %58 : vector<2x256xf32>
    %cst_31 = arith.constant 1.000000e+00 : f32
    %60 = vector.broadcast %cst_31 : f32 to vector<2x256xf32>
    %61 = arith.addf %60, %59 : vector<2x256xf32>
    %62 = tpu.reciprocal %61 {approx = true} : vector<2x256xf32> -> vector<2x256xf32>
    %63 = arith.mulf %61, %62 : vector<2x256xf32>
    %cst_32 = arith.constant 2.000000e+00 : f32
    %64 = vector.broadcast %cst_32 : f32 to vector<2x256xf32>
    %65 = arith.subf %64, %63 : vector<2x256xf32>
    %66 = arith.mulf %62, %65 : vector<2x256xf32>
    %c0_33 = arith.constant 0 : index
    %c0_34 = arith.constant 0 : index
    %c0_35 = arith.constant 0 : index
    %67 = vector.load %arg6[%c0_33, %c0_34, %c0_35] : memref<2x1x256xf32, #tpu.memory_space<vmem>>, vector<2x1x256xf32>
    %68 = vector.shape_cast %67 : vector<2x1x256xf32> to vector<2x256xf32>
    %69 = vector.shape_cast %66 : vector<2x256xf32> to vector<2x1x256xf32>
    tpu.vector_store %arg6[%c0_33, %c0_34, %c0_35], %69 {strides = array<i32>} : memref<2x1x256xf32, #tpu.memory_space<vmem>>, vector<2x1x256xf32>,
    %c0_36 = arith.constant 0 : index
    %c0_37 = arith.constant 0 : index
    %c0_38 = arith.constant 0 : index
    %70 = vector.load %arg6[%c0_36, %c0_37, %c0_38] : memref<2x1x256xf32, #tpu.memory_space<vmem>>, vector<2x1x256xf32>
    %71 = vector.broadcast %70 : vector<2x1x256xf32> to vector<2x32x256xf32>
    %72 = arith.mulf %45, %71 : vector<2x32x256xf32>
    %c0_39 = arith.constant 0 : index
    %c0_40 = arith.constant 0 : index
    %c0_41 = arith.constant 0 : index
    %73 = vector.load %arg5[%c0_39, %c0_40, %c0_41] : memref<2x32x256xf32, #tpu.memory_space<vmem>>, vector<2x32x256xf32>
    tpu.vector_store %arg5[%c0_39, %c0_40, %c0_41], %72 {strides = array<i32>} : memref<2x32x256xf32, #tpu.memory_space<vmem>>, vector<2x32x256xf32>,
    return
  }
  func.func @transform_0(%arg0: i32) -> (i32, i32, i32) {
    %c0_i32 = arith.constant 0 : i32
    %c0_i32_0 = arith.constant 0 : i32
    %c0_i32_1 = arith.constant 0 : i32
    return %arg0, %c0_i32, %c0_i32_0 : i32, i32, i32
  }
  func.func @transform_1(%arg0: i32) -> (i32, i32, i32) {
    %c0_i32 = arith.constant 0 : i32
    %c0_i32_0 = arith.constant 0 : i32
    %c0_i32_1 = arith.constant 0 : i32
    %c0_i32_2 = arith.constant 0 : i32
    return %c0_i32, %c0_i32_0, %c0_i32_1 : i32, i32, i32
  }
  func.func @transform_2(%arg0: i32) -> (i32, i32) {
    %c0_i32 = arith.constant 0 : i32
    %c0_i32_0 = arith.constant 0 : i32
    %c0_i32_1 = arith.constant 0 : i32
    return %c0_i32, %c0_i32_0 : i32, i32
  }
  func.func @transform_3(%arg0: i32) -> (i32, i32, i32) {
    %c0_i32 = arith.constant 0 : i32
    %c0_i32_0 = arith.constant 0 : i32
    %c0_i32_1 = arith.constant 0 : i32
    %c0_i32_2 = arith.constant 0 : i32
    return %c0_i32, %c0_i32_0, %c0_i32_1 : i32, i32, i32
  }
  func.func @transform_4(%arg0: i32) -> (i32, i32, i32) {
    %c0_i32 = arith.constant 0 : i32
    %c0_i32_0 = arith.constant 0 : i32
    %c0_i32_1 = arith.constant 0 : i32
    return %arg0, %c0_i32, %c0_i32_0 : i32, i32, i32
  }
}

</mosaic_0001>

<bundles_post_ra>
// kernel: cbam_forward.1
= control target key start
LH: loop header
LB: loop body
LE: loop exit
PB: predicated region body
PF: predicated region fallthrough
CT: control target
= control target key end

     0   :  { %vm77_vm0 = vcmask 7168   ;;  %s3505_s15 = smov 127   ;;  %vm551_vm1 = vcmask 1041409   ;;  %vm3311_vm3 = vcmask 1040384   ;;  %s6255_s0 = inlined_call_operand.vmem [shape: f32[2,32,256], index: 0, kind: input, shape index: {}]   ;;  %s6256_s1 = inlined_call_operand.vmem [shape: f32[2,32,1], index: 1, kind: input, shape index: {}]   ;;  %s6257_s2 = inlined_call_operand.vmem [shape: f32[32,2], index: 2, kind: input, shape index: {}]   ;;  %s6258_s3 = inlined_call_operand.vmem [shape: f32[2,256,256], index: 3, kind: input, shape index: {}]   ;;  %s6259_s4 = inlined_call_operand.vmem [shape: f32[2,32,256], index: 4, kind: output, shape index: {}]  }
   0x1   :  { %v25_v0 = vld [vmem:[%s6255_s0 + $0x40] sm:$0xff]  ;;  %v26_v1 = vld [vmem:[%s6255_s0 + $0x48] sm:$0xff]  ;;  %v27_v9 = vld [vmem:[%s6255_s0 + $0x50] sm:$0xff] }
   0x2   :  { %v17_v2 = vld [vmem:[%s6255_s0] sm:$0xff]  ;;  %v45_v3 = vadd.f32 %v26_v1, %v25_v0  ;;  %v18_v4 = vld [vmem:[%s6255_s0 + $0x8] sm:$0xff]  ;;  %v28_v10 = vld [vmem:[%s6255_s0 + $0x58] sm:$0xff] }
   0x3   :  { %v21_v5 = vld [vmem:[%s6255_s0 + $0x20] sm:$0xff]  ;;  %v22_v6 = vld [vmem:[%s6255_s0 + $0x28] sm:$0xff]  ;;  %v33_v7 = vadd.f32 %v18_v4, %v17_v2  ;;  %v19_v11 = vld [vmem:[%s6255_s0 + $0x10] sm:$0xff]  ;;  %v48_v15 = vadd.f32 %v28_v10, %v27_v9 }
   0x4   :  { %v39_v8 = vadd.f32 %v22_v6, %v21_v5  ;;  %46 = vadd.xlane.f32.xlu1 %v45_v3  ;;  %v20_v12 = vld [vmem:[%s6255_s0 + $0x18] sm:$0xff]  ;;  %v29_v13 = vld [vmem:[%s6255_s0 + $0x60] sm:$0xff]  ;;  %v30_v14 = vld [vmem:[%s6255_s0 + $0x68] sm:$0xff] }
   0x5   :  { %34 = vadd.xlane.f32.xlu0 %v33_v7  ;;  %v36_v16 = vadd.f32 %v20_v12, %v19_v11  ;;  %v51_v17 = vadd.f32 %v30_v14, %v29_v13  ;;  %v31_v18 = vld [vmem:[%s6255_s0 + $0x70] sm:$0xff]  ;;  %v32_v19 = vld [vmem:[%s6255_s0 + $0x78] sm:$0xff]  ;;  %v65_v24 = vld [vmem:[%s6256_s1] sm:$0xff] }
   0x6   :  { %40 = vadd.xlane.f32.xlu2 %v39_v8  ;;  %v23_v20 = vld [vmem:[%s6255_s0 + $0x30] sm:$0xff]  ;;  %v24_v21 = vld [vmem:[%s6255_s0 + $0x38] sm:$0xff]  ;;  %v54_v22 = vadd.f32 %v32_v19, %v31_v18  ;;  %v3371_v38 = vld [vmem:[%s6256_s1 + $0x20] sm:$0xff] }
   0x7   :  { %v42_v23 = vadd.f32 %v24_v21, %v23_v20  ;;  %v67_v28 = vld [vmem:[%s6256_s1 + $0x10] sm:$0xff]  ;;  %v66_v39 = vld [vmem:[%s6256_s1 + $0x8] sm:$0xff]  ;;  %v68_v4 = vld [vmem:[%s6256_s1 + $0x18] sm:$0xff] }
   0x8   :  { %v3372_v40 = vld [vmem:[%s6256_s1 + $0x28] sm:$0xff]  ;;  %v3373_v51 = vld [vmem:[%s6256_s1 + $0x30] sm:$0xff]  ;;  %v3374_v5 = vld [vmem:[%s6256_s1 + $0x38] sm:$0xff]  ;;  %s3504_s1 = smov 1  }
   0xc   :  { %49 = vadd.xlane.f32.xlu1 %v48_v15 }
   0xd   :  { %37 = vadd.xlane.f32.xlu0 %v36_v16 }
   0xe   :  { %52 = vadd.xlane.f32.xlu2 %v51_v17 }
  0x14   :  { %55 = vadd.xlane.f32.xlu1 %v54_v22 }
  0x15   :  { %43 = vadd.xlane.f32.xlu0 %v42_v23 }
  0x77   :  { %v47_v25 = vpop.xlane.xlu1 %46 }
  0x78   :  { %v61_v26 = vmul.f32 0.00390625, %v47_v25  ;;  %v35_v27 = vpop.xlane.xlu0 %34 }
  0x79   :  { %v41_v29 = vpop.xlane.xlu2 %40  ;;  %v57_v30 = vmul.f32 0.00390625, %v35_v27 }
  0x7a   :  { %v59_v31 = vmul.f32 0.00390625, %v41_v29  ;;  %v73_v32 = vmul.f32 %v65_v24, %v61_v26  ;;  %v127_v48 = vmul.f32 %v3371_v38, %v61_v26 }
  0x7b   :  { %v69_v33 = vmul.f32 %v65_v24, %v57_v30  ;;  %v123_v45 = vmul.f32 %v3371_v38, %v57_v30 }
  0x7c   :  { %v71_v34 = vmul.f32 %v67_v28, %v59_v31  ;;  %v91_v35 = vsel %vm77_vm0, %v73_v32, 0.0  ;;  %v144_v62 = vsel %vm77_vm0, %v127_v48, 0.0  ;;  %v125_v1 = vmul.f32 %v3373_v51, %v59_v31 }
  0x7d   :  { %v78_v36 = vsel %vm77_vm0, %v69_v33, 0.0  ;;  %v131_v58 = vsel %vm77_vm0, %v123_v45, 0.0 }
  0x7e   :  { %v81_v37 = vsel %vm77_vm0, %v71_v34, 0.0  ;;  %v134_v15 = vsel %vm77_vm0, %v125_v1, 0.0 }
  0x7f   :  { %v50_v41 = vpop.xlane.xlu1 %49 }
  0x80   :  { %v62_v42 = vmul.f32 0.00390625, %v50_v41  ;;  %v38_v43 = vpop.xlane.xlu0 %37 }
  0x81   :  { %v53_v44 = vpop.xlane.xlu2 %52  ;;  %v58_v46 = vmul.f32 0.00390625, %v38_v43  ;;  %v107_v43 = vld [vmem:[%s6257_s2 + $0x8] sm:$0xff] }
  0x82   :  { %v63_v47 = vmul.f32 0.00390625, %v53_v44  ;;  %v74_v49 = vmul.f32 %v66_v39, %v62_v42  ;;  %v128_v50 = vmul.f32 %v3372_v40, %v62_v42  ;;  %v3627_v44 = vld [vmem:[%s6257_s2] sm:$0xff] }
  0x83   :  { %v70_v52 = vmul.f32 %v66_v39, %v58_v46  ;;  %v124_v53 = vmul.f32 %v3372_v40, %v58_v46 }
  0x84   :  { %v75_v54 = vmul.f32 %v67_v28, %v63_v47  ;;  %v92_v55 = vsel %vm77_vm0, %v74_v49, 0.0  ;;  %v145_v56 = vsel %vm77_vm0, %v128_v50, 0.0  ;;  %v129_v57 = vmul.f32 %v3373_v51, %v63_v47  ;;  %v3633_v47 = vld [vmem:[%s6257_s2 + $0x10] sm:$0xff]  ;;  %v3639_v50 = vld [vmem:[%s6257_s2 + $0x18] sm:$0xff] }
  0x85   :  { %v93_v59 = vadd.f32 %v92_v55, %v91_v35  ;;  %v79_v60 = vsel %vm77_vm0, %v70_v52, 0.0  ;;  %v132_v61 = vsel %vm77_vm0, %v124_v53, 0.0  ;;  %v146_v2 = vadd.f32 %v145_v56, %v144_v62 }
  0x86   :  { %v80_v63 = vadd.f32 %v79_v60, %v78_v36  ;;  %v94_v0 = vsel %vm77_vm0, %v75_v54, 0.0  ;;  %v133_v7 = vadd.f32 %v132_v61, %v131_v58  ;;  %v147_v8 = vsel %vm77_vm0, %v129_v57, 0.0 }
  0x87   :  { %v95_v3 = vadd.f32 %v94_v0, %v93_v59  ;;  %v56_v6 = vpop.xlane.xlu1 %55  ;;  %v148_v16 = vadd.f32 %v147_v8, %v146_v2  ;;  %v3506_v0 = vmov 0  }
  0x88   :  { %v64_v9 = vmul.f32 0.00390625, %v56_v6  ;;  %v82_v10 = vadd.f32 %v81_v37, %v80_v63  ;;  %v44_v11 = vpop.xlane.xlu0 %43  ;;  %v135_v21 = vadd.f32 %v134_v15, %v133_v7  ;;  %3444 = vset.pattern.permute.xlu2 %v3506_v0  ;;  %3443 = vset.pattern.permute.xlu0 %v3506_v0 }
  0x89   :  { %v60_v12 = vmul.f32 0.00390625, %v44_v11  ;;  %3445 = vset.pattern.permute.xlu1 %v3506_v0 }
  0x8a   :  { %v76_v13 = vmul.f32 %v68_v4, %v64_v9  ;;  %v130_v14 = vmul.f32 %v3374_v5, %v64_v9 }
  0x8b   :  { %v72_v17 = vmul.f32 %v68_v4, %v60_v12  ;;  %v126_v18 = vmul.f32 %v3374_v5, %v60_v12 }
  0x8c   :  { %v96_v19 = vsel %vm77_vm0, %v76_v13, 0.0  ;;  %v149_v20 = vsel %vm77_vm0, %v130_v14, 0.0 }
  0x8d   :  { %v97_v22 = vadd.f32 %v96_v19, %v95_v3  ;;  %v150_v23 = vadd.f32 %v149_v20, %v148_v16  ;;  %v83_v24 = vsel %vm77_vm0, %v72_v17, 0.0  ;;  %v136_v25 = vsel %vm77_vm0, %v126_v18, 0.0 }
  0x8e   :  { %v84_v26 = vadd.f32 %v83_v24, %v82_v10  ;;  %v137_v27 = vadd.f32 %v136_v25, %v135_v21 }
  0x8f   :  { %v151_v28 = vrot.slane %v150_v23, 4  ;;  %v98_v62 = vrot.slane %v97_v22, 4 }
  0x90   :  { %v138_v29 = vrot.slane %v137_v27, 4  ;;  %v85_v56 = vrot.slane %v84_v26, 4 }
  0x91   :  { %v152_v30 = vadd.f32 %v151_v28, %v150_v23  ;;  %v99_v1 = vadd.f32 %v98_v62, %v97_v22 }
  0x92   :  { %v139_v31 = vadd.f32 %v138_v29, %v137_v27  ;;  %v86_v57 = vadd.f32 %v85_v56, %v84_v26 }
  0x93   :  { %v153_v32 = vrot.slane %v152_v30, 2  ;;  %v100_v5 = vrot.slane %v99_v1, 2 }
  0x94   :  { %v140_v33 = vrot.slane %v139_v31, 2  ;;  %v87_v58 = vrot.slane %v86_v57, 2 }
  0x95   :  { %v154_v34 = vadd.f32 %v153_v32, %v152_v30  ;;  %v101_v8 = vadd.f32 %v100_v5, %v99_v1 }
  0x96   :  { %v141_v35 = vadd.f32 %v140_v33, %v139_v31  ;;  %v88_v59 = vadd.f32 %v87_v58, %v86_v57 }
  0x97   :  { %v155_v36 = vrot.slane %v154_v34, 1  ;;  %v102_v9 = vrot.slane %v101_v8, 1 }
  0x98   :  { %v142_v37 = vrot.slane %v141_v35, 1  ;;  %v89_v60 = vrot.slane %v88_v59, 1 }
  0x99   :  { %v156_v38 = vadd.f32 %v155_v36, %v154_v34  ;;  %v103_v12 = vadd.f32 %v102_v9, %v101_v8 }
  0x9a   :  { %v143_v39 = vadd.f32 %v142_v37, %v141_v35  ;;  %v90_v61 = vadd.f32 %v89_v60, %v88_v59 }
  0x9b   :  { %v158_v40 = vmax.f32 %v156_v38, 0.0  ;;  %v105_v13 = vmax.f32 %v103_v12, 0.0 }
  0x9c   :  { %v157_v41 = vmax.f32 %v143_v39, 0.0  ;;  %v104_v63 = vmax.f32 %v90_v61, 0.0 }
  0x9d   :  { %163 = vrot.lane.b32.xlu0 %v158_v40, %s3504_s1  ;;  %v115_v15 = vmul.f32 %v107_v43, %v105_v13  ;;  %v116_v1 = vmul.f32 %v3633_v47, %v105_v13 }
  0x9e   :  { %161 = vrot.lane.b32.xlu2 %v157_v41, %s3504_s1  ;;  %v111_v2 = vmul.f32 %v107_v43, %v104_v63  ;;  %v110_v17 = vmul.f32 %v3627_v44, %v104_v63  ;;  %v113_v28 = vmul.f32 %v3639_v50, %v104_v63  ;;  %v112_v38 = vmul.f32 %v3633_v47, %v104_v63 }
  0xf8   :  { %v162_v42 = vpop.permute.xlu2 %161 }
  0xf9   :  { %v168_v45 = vmul.f32 %v162_v42, %v107_v43  ;;  %v167_v46 = vmul.f32 %v162_v42, %v3627_v44  ;;  %v169_v48 = vmul.f32 %v162_v42, %v3633_v47  ;;  %v170_v54 = vmul.f32 %v162_v42, %v3639_v50 }
  0xfb   :  { %185 = vrot.lane.b32.xlu2 %v168_v45, %s3505_s15  ;;  %183 = vrot.lane.b32.xlu1 %v167_v46, %s3505_s15 }
 0x103   :  { %187 = vrot.lane.b32.xlu1 %v169_v48, %s3505_s15  ;;  %v117_v48 = vmul.f32 %v3639_v50, %v105_v13 }
 0x10f   :  { %v164_v49 = vpop.permute.xlu0 %163 }
 0x110   :  { %v174_v51 = vmul.f32 %v164_v49, %v3639_v50  ;;  %v172_v52 = vmul.f32 %v164_v49, %v107_v43  ;;  %v171_v53 = vmul.f32 %v164_v49, %v3627_v44  ;;  %v173_v55 = vmul.f32 %v164_v49, %v3633_v47 }
 0x112   :  { %197 = vrot.lane.b32.xlu1 %v174_v51, %s3505_s15  ;;  %193 = vrot.lane.b32.xlu2 %v172_v52, %s3505_s15  ;;  %v114_v52 = vmul.f32 %v3627_v44, %v105_v13 }
 0x113   :  { %191 = vrot.lane.b32.xlu0 %v171_v53, %s3505_s15 }
 0x11a   :  { %189 = vrot.lane.b32.xlu2 %v170_v54, %s3505_s15 }
 0x11b   :  { %195 = vrot.lane.b32.xlu0 %v173_v55, %s3505_s15 }
 0x155   :  { %v186_v3 = vpop.permute.xlu2 %185 }
 0x156   :  { %v208_v4 = vadd.f32 %v186_v3, %v111_v2 }
 0x158   :  { %v216_v6 = vsub.f32 0.0, %v208_v4 }
 0x15a   :  { %v225_v7 = vmul.f32 1.442695, %v216_v6 }
 0x15c   :  { %3446 = vpow2.f32 %v225_v7 }
 0x162   :  { %v3447_v10 = vpop.eup %3446 }
 0x163   :  { %v240_v11 = vadd.f32 1.0, %v3447_v10 }
 0x165   :  { %3448 = vrcp.f32 %v240_v11 }
 0x16b   :  { %v3449_v14 = vpop.eup %3448 }
 0x16c   :  { %v256_v16 = vmul.f32 %v3449_v14, %v240_v11  ;;  %v194_v18 = vpop.permute.xlu2 %193 }
 0x16d   :  { %v184_v19 = vpop.permute.xlu1 %183  ;;  %v212_v20 = vadd.f32 %v194_v18, %v115_v15 }
 0x16e   :  { %v207_v21 = vadd.f32 %v184_v19, %v110_v17  ;;  %v264_v22 = vsub.f32 2.0, %v256_v16 }
 0x16f   :  { %v220_v23 = vsub.f32 0.0, %v212_v20 }
 0x170   :  { %v215_v24 = vsub.f32 0.0, %v207_v21  ;;  %v272_v25 = vmul.f32 %v3449_v14, %v264_v22 }
 0x171   :  { %v233_v26 = vmul.f32 1.442695, %v220_v23 }
 0x172   :  { %v223_v27 = vmul.f32 1.442695, %v215_v24  ;;  %286 = vperm.xlu2 %3444, %v272_v25  }
 0x173   :  { %3450 = vpow2.f32 %v233_v26 }
 0x174   :  { %3452 = vpow2.f32 %v223_v27  ;;  %v190_v29 = vpop.permute.xlu2 %189 }
 0x175   :  { %v210_v30 = vadd.f32 %v190_v29, %v113_v28  ;;  %v188_v37 = vpop.permute.xlu1 %187 }
 0x176   :  { %v209_v39 = vadd.f32 %v188_v37, %v112_v38 }
 0x177   :  { %v218_v31 = vsub.f32 0.0, %v210_v30 }
 0x178   :  { %v217_v42 = vsub.f32 0.0, %v209_v39 }
 0x179   :  { %v3451_v32 = vpop.eup %3450  ;;  %v229_v33 = vmul.f32 1.442695, %v218_v31  ;;  %v3405_v31 = vld [vmem:[%s6258_s3 + $0x2f0] sm:$0xff] }
 0x17a   :  { %v3453_v34 = vpop.eup %3452  ;;  %v244_v35 = vadd.f32 1.0, %v3451_v32  ;;  %v227_v56 = vmul.f32 1.442695, %v217_v42  ;;  %v3403_v32 = vld [vmem:[%s6258_s3 + $0x2e0] sm:$0xff] }
 0x17b   :  { %v239_v36 = vadd.f32 1.0, %v3453_v34  ;;  %3454 = vpow2.f32 %v229_v33  ;;  %v3657_v33 = vand.u32 4294901760, %v3405_v31  ;;  %v3659_v34 = vand.u32 4294901760, %v3403_v32 }
 0x17c   :  { %3456 = vrcp.f32 %v244_v35 }
 0x17d   :  { %3458 = vrcp.f32 %v239_v36  ;;  %753 = vmatpush.msra.mxu3 %v3657_v33  ;;  %557 = vmatpush.msra.mxu0 %v3657_v33 }
 0x17f   :  { %755 = vmatpush.msra.mxu3 %v3659_v34  ;;  %559 = vmatpush.msra.mxu0 %v3659_v34 }
 0x181   :  { %v3455_v40 = vpop.eup %3454 }
 0x182   :  { %v3457_v41 = vpop.eup %3456  ;;  %v242_v43 = vadd.f32 1.0, %v3455_v40 }
 0x183   :  { %v3459_v45 = vpop.eup %3458  ;;  %v260_v46 = vmul.f32 %v3457_v41, %v244_v35  ;;  %v3662_v35 = vsub.f32 %v3405_v31, %v3657_v33 }
 0x184   :  { %v255_v49 = vmul.f32 %v3459_v45, %v239_v36  ;;  %3460 = vrcp.f32 %v242_v43  ;;  %v198_v51 = vpop.permute.xlu1 %197  ;;  %v3665_v36 = vsub.f32 %v3403_v32, %v3659_v34 }
 0x185   :  { %v214_v53 = vadd.f32 %v198_v51, %v117_v48  ;;  %v192_v54 = vpop.permute.xlu0 %191  ;;  %v268_v55 = vsub.f32 2.0, %v260_v46  ;;  %3462 = vpow2.f32 %v227_v56  ;;  %v599_v37 = vand.u32 4294901760, %v3662_v35  ;;  %700 = vmatpush.msra.mxu2 %v3662_v35  ;;  %v3399_v46 = vld [vmem:[%s6258_s3 + $0x2c0] sm:$0xff]  ;;  %v3397_v51 = vld [vmem:[%s6258_s3 + $0x2b0] sm:$0xff] }
 0x186   :  { %v211_v57 = vadd.f32 %v192_v54, %v114_v52  ;;  %v263_v58 = vsub.f32 2.0, %v255_v49  ;;  %v605_v38 = vand.u32 4294901760, %v3665_v36  ;;  %v3692_v49 = vand.u32 4294901760, %v3399_v46 }
 0x187   :  { %v276_v59 = vmul.f32 %v3457_v41, %v268_v55  ;;  %v222_v62 = vsub.f32 0.0, %v214_v53  ;;  %v600_v39 = vsub.f32 %v3662_v35, %v599_v37  ;;  %703 = vmatpush.msra.mxu2 %v3665_v36  ;;  %v3704_v54 = vand.u32 4294901760, %v3397_v51  ;;  %v3395_v55 = vld [vmem:[%s6258_s3 + $0x2a0] sm:$0xff]  ;;  %v3433_v35 = vld [vmem:[%s6258_s3 + $0x3d0] sm:$0xff] }
 0x188   :  { %v219_v60 = vsub.f32 0.0, %v211_v57  ;;  %v271_v61 = vmul.f32 %v3459_v45, %v263_v58  ;;  %v606_v40 = vsub.f32 %v3665_v36, %v605_v38  ;;  %v3701_v53 = vsub.f32 %v3399_v46, %v3692_v49  ;;  %v3431_v36 = vld [vmem:[%s6258_s3 + $0x3c0] sm:$0xff] }
 0x189   :  { %306 = vperm.xlu2 %3444, %v276_v59   ;;  %v237_v44 = vmul.f32 1.442695, %v222_v62  ;;  %v601_v41 = vand.u32 4294901760, %v600_v39  ;;  %v3716_v58 = vsub.f32 %v3397_v51, %v3704_v54  ;;  %v3719_v59 = vand.u32 4294901760, %v3395_v55 }
 0x18a   :  { %v3461_v63 = vpop.eup %3460  ;;  %v231_v0 = vmul.f32 1.442695, %v219_v60  ;;  %281 = vperm.xlu0 %3443, %v271_v61   ;;  %v607_v42 = vand.u32 4294901760, %v606_v40  ;;  %v617_v57 = vand.u32 4294901760, %v3701_v53  ;;  %v3393_v60 = vld [vmem:[%s6258_s3 + $0x290] sm:$0xff] }
 0x18b   :  { %v258_v50 = vmul.f32 %v3461_v63, %v242_v43  ;;  %v3463_v6 = vpop.eup %3462  ;;  %v3401_v43 = vld [vmem:[%s6258_s3 + $0x2d0] sm:$0xff]  ;;  %602 = vmatpush.msra.mxu1 %v601_v41 }
 0x18c   :  { %3464 = vpow2.f32 %v231_v0  ;;  %v241_v10 = vadd.f32 1.0, %v3463_v6  ;;  %v3684_v45 = vand.u32 4294901760, %v3401_v43  ;;  %v618_v62 = vsub.f32 %v3701_v53, %v617_v57 }
 0x18d   :  { %v196_v2 = vpop.permute.xlu0 %195  ;;  %v266_v3 = vsub.f32 2.0, %v258_v50  ;;  %3466 = vpow2.f32 %v237_v44  ;;  %608 = vmatpush.msra.mxu1 %v607_v42  ;;  %v3731_v0 = vsub.f32 %v3395_v55, %v3719_v59  ;;  %v3735_v50 = vand.u32 4294901760, %v3393_v60  ;;  %v3389_v44 = vld [vmem:[%s6258_s3 + $0x270] sm:$0xff] }
 0x18e   :  { %v213_v4 = vadd.f32 %v196_v2, %v116_v1  ;;  %v3690_v48 = vsub.f32 %v3401_v43, %v3684_v45  ;;  %757 = vmatpush.msra.mxu3 %v3684_v45  ;;  %561 = vmatpush.msra.mxu0 %v3684_v45  ;;  %v3391_v1 = vld [vmem:[%s6258_s3 + $0x280] sm:$0xff] }
 0x18f   :  { %v274_v5 = vmul.f32 %v3461_v63, %v266_v3  ;;  %v623_v63 = vand.u32 4294901760, %v3716_v58  ;;  %v3387_v2 = vld [vmem:[%s6258_s3 + $0x260] sm:$0xff]  ;;  %v619_v3 = vand.u32 4294901760, %v618_v62  ;;  %v3752_v6 = vand.u32 4294901760, %v3391_v1 }
 0x190   :  { %v221_v7 = vsub.f32 0.0, %v213_v4  ;;  %v611_v52 = vand.u32 4294901760, %v3690_v48  ;;  %706 = vmatpush.msra.mxu2 %v3690_v48  ;;  %759 = vmatpush.msra.mxu3 %v3692_v49 }
 0x191   :  { %296 = vperm.xlu2 %3444, %v274_v5   ;;  %563 = vmatpush.msra.mxu0 %v3692_v49  ;;  %v624_v4 = vsub.f32 %v3716_v58, %v623_v63  ;;  %v629_v5 = vand.u32 4294901760, %v3731_v0 }
 0x192   :  { %v3465_v8 = vpop.eup %3464  ;;  %v235_v9 = vmul.f32 1.442695, %v221_v7  ;;  %v612_v56 = vsub.f32 %v3690_v48, %v611_v52  ;;  %709 = vmatpush.msra.mxu2 %v3701_v53  ;;  %761 = vmatpush.msra.mxu3 %v3704_v54  ;;  %v3385_v7 = vld [vmem:[%s6258_s3 + $0x250] sm:$0xff] }
 0x193   :  { %v243_v11 = vadd.f32 1.0, %v3465_v8  ;;  %v3467_v12 = vpop.eup %3466  ;;  %565 = vmatpush.msra.mxu0 %v3704_v54  ;;  %v3383_v8 = vld [vmem:[%s6258_s3 + $0x240] sm:$0xff] }
 0x194   :  { %v246_v14 = vadd.f32 1.0, %v3467_v12  ;;  %v613_v61 = vand.u32 4294901760, %v612_v56  ;;  %712 = vmatpush.msra.mxu2 %v3716_v58  ;;  %763 = vmatpush.msra.mxu3 %v3719_v59  ;;  %v3769_v12 = vand.u32 4294901760, %v3385_v7 }
 0x195   :  { %3468 = vrcp.f32 %v243_v11  ;;  %567 = vmatpush.msra.mxu0 %v3719_v59 }
 0x196   :  { %3470 = vpow2.f32 %v235_v9  ;;  %614 = vmatpush.msra.mxu1 %v613_v61  ;;  %715 = vmatpush.msra.mxu2 %v3731_v0  ;;  %v3761_v9 = vsub.f32 %v3393_v60, %v3735_v50 }
 0x197   :  { %3472 = vrcp.f32 %v241_v10  ;;  %765 = vmatpush.msra.mxu3 %v3735_v50  ;;  %569 = vmatpush.msra.mxu0 %v3735_v50 }
 0x198   :  { %3474 = vrcp.f32 %v246_v14  ;;  %620 = vmatpush.msra.mxu1 %v619_v3  ;;  %718 = vmatpush.msra.mxu2 %v3761_v9 }
 0x199   :  { %767 = vmatpush.msra.mxu3 %v3752_v6  ;;  %571 = vmatpush.msra.mxu0 %v3752_v6 }
 0x19b   :  { %v3469_v15 = vpop.eup %3468 }
 0x19c   :  { %v3471_v47 = vpop.eup %3470  ;;  %v259_v13 = vmul.f32 %v3469_v15, %v243_v11  ;;  %v3766_v11 = vand.u32 4294901760, %v3387_v2 }
 0x19d   :  { %v3473_v16 = vpop.eup %3472  ;;  %v245_v17 = vadd.f32 1.0, %v3471_v47  ;;  %v3775_v47 = vsub.f32 %v3391_v1, %v3752_v6 }
 0x19e   :  { %v267_v18 = vsub.f32 2.0, %v259_v13  ;;  %v257_v19 = vmul.f32 %v3473_v16, %v241_v10  ;;  %v3475_v21 = vpop.eup %3474  ;;  %v3763_v10 = vand.u32 4294901760, %v3389_v44  ;;  %v3777_v13 = vand.u32 4294901760, %v3383_v8 }
 0x19f   :  { %3476 = vrcp.f32 %v245_v17  ;;  %v262_v25 = vmul.f32 %v3475_v21, %v246_v14  ;;  %v625_v14 = vand.u32 4294901760, %v624_v4  ;;  %721 = vmatpush.msra.mxu2 %v3775_v47 }
 0x1a0   :  { %v275_v20 = vmul.f32 %v3469_v15, %v267_v18  ;;  %v265_v22 = vsub.f32 2.0, %v257_v19  ;;  %v630_v15 = vsub.f32 %v3731_v0, %v629_v5  ;;  %v3785_v18 = vsub.f32 %v3387_v2, %v3766_v11  ;;  %769 = vmatpush.msra.mxu3 %v3763_v10  ;;  %573 = vmatpush.msra.mxu0 %v3763_v10  ;;  %v3377_v2 = vld [vmem:[%s6258_s3 + $0x210] sm:$0xff]  ;;  %v3423_v0 = vld [vmem:[%s6258_s3 + $0x380] sm:$0xff] }
 0x1a1   :  { %v270_v29 = vsub.f32 2.0, %v262_v25  ;;  %v3789_v19 = vsub.f32 %v3385_v7, %v3769_v12  ;;  %626 = vmatpush.msra.mxu1 %v625_v14  ;;  %v3855_v3 = vand.u32 4294901760, %v3377_v2 }
 0x1a2   :  { %301 = vperm.xlu1 %3445, %v275_v20   ;;  %v273_v26 = vmul.f32 %v3473_v16, %v265_v22  ;;  %v635_v16 = vand.u32 4294901760, %v3761_v9  ;;  %v3381_v20 = vld [vmem:[%s6258_s3 + $0x230] sm:$0xff]  ;;  %v631_v22 = vand.u32 4294901760, %v630_v15  ;;  %771 = vmatpush.msra.mxu3 %v3766_v11 }
 0x1a3   :  { %v278_v30 = vmul.f32 %v3475_v21, %v270_v29  ;;  %v3379_v21 = vld [vmem:[%s6258_s3 + $0x220] sm:$0xff]  ;;  %v3811_v29 = vsub.f32 %v3383_v8, %v3777_v13  ;;  %575 = vmatpush.msra.mxu0 %v3766_v11  ;;  %v3867_v14 = vsub.f32 %v3377_v2, %v3855_v3 }
 0x1a4   :  { %632 = vmatpush.msra.mxu1 %v631_v22  ;;  %v3816_v31 = vand.u32 4294901760, %v3379_v21  ;;  %773 = vmatpush.msra.mxu3 %v3769_v12  ;;  %v3375_v8 = vld [vmem:[%s6258_s3 + $0x200] sm:$0xff] }
 0x1a5   :  { %v3477_v23 = vpop.eup %3476  ;;  %v665_v42 = vand.u32 4294901760, %v3811_v29  ;;  %577 = vmatpush.msra.mxu0 %v3769_v12  ;;  %v3869_v15 = vand.u32 4294901760, %v3375_v8 }
 0x1a6   :  { %v261_v24 = vmul.f32 %v3477_v23, %v245_v17  ;;  %v3782_v17 = vsub.f32 %v3389_v44, %v3763_v10  ;;  %v3832_v46 = vsub.f32 %v3379_v21, %v3816_v31  ;;  %775 = vmatpush.msra.mxu3 %v3777_v13  ;;  %v683_v21 = vand.u32 4294901760, %v3867_v14 }
 0x1a7   :  { %v666_v61 = vsub.f32 %v3811_v29, %v665_v42  ;;  %579 = vmatpush.msra.mxu0 %v3777_v13  ;;  %v3876_v22 = vsub.f32 %v3375_v8, %v3869_v15 }
 0x1a8   :  { %v269_v27 = vsub.f32 2.0, %v261_v24  ;;  %v636_v24 = vsub.f32 %v3761_v9, %v635_v16  ;;  %v647_v25 = vand.u32 4294901760, %v3782_v17  ;;  %724 = vmatpush.msra.mxu2 %v3782_v17  ;;  %v677_v62 = vand.u32 4294901760, %v3832_v46 }
 0x1a9   :  { %v667_v4 = vand.u32 4294901760, %v666_v61 }
 0x1aa   :  { %291 = vperm.xlu1 %3445, %v273_v26   ;;  %v277_v28 = vmul.f32 %v3477_v23, %v269_v27  ;;  %v641_v23 = vand.u32 4294901760, %v3775_v47  ;;  %v653_v26 = vand.u32 4294901760, %v3785_v18  ;;  %v659_v27 = vand.u32 4294901760, %v3789_v19  ;;  %727 = vmatpush.msra.mxu2 %v3785_v18 }
 0x1ab   :  { %v637_v32 = vand.u32 4294901760, %v636_v24  ;;  %v648_v39 = vsub.f32 %v3782_v17, %v647_v25  ;;  %v678_v7 = vsub.f32 %v3832_v46, %v677_v62  ;;  %v3417_v17 = vld [vmem:[%s6258_s3 + $0x350] sm:$0xff] }
 0x1ac   :  { %311 = vperm.xlu0 %3443, %v277_v28   ;;  %v642_v28 = vsub.f32 %v3775_v47, %v641_v23  ;;  %v654_v40 = vsub.f32 %v3785_v18, %v653_v26  ;;  %v660_v55 = vsub.f32 %v3789_v19, %v659_v27  ;;  %730 = vmatpush.msra.mxu2 %v3789_v19  ;;  %v3419_v47 = vld [vmem:[%s6258_s3 + $0x360] sm:$0xff] }
 0x1ad   :  { %638 = vmatpush.msra.mxu1 %v637_v32  ;;  %v649_v51 = vand.u32 4294901760, %v648_v39  ;;  %v679_v24 = vand.u32 4294901760, %v678_v7  ;;  %v689_v32 = vand.u32 4294901760, %v3876_v22  ;;  %v3437_v39 = vld [vmem:[%s6258_s3 + $0x3f0] sm:$0xff]  ;;  %v3930_v7 = vand.u32 4294901760, %v3431_v36 }
 0x1ae   :  { %v643_v41 = vand.u32 4294901760, %v642_v28  ;;  %v655_v60 = vand.u32 4294901760, %v654_v40  ;;  %v661_v1 = vand.u32 4294901760, %v660_v55  ;;  %733 = vmatpush.msra.mxu2 %v3811_v29  ;;  %v684_v28 = vsub.f32 %v3867_v14, %v683_v21  ;;  %v3435_v55 = vld [vmem:[%s6258_s3 + $0x3e0] sm:$0xff] }
 0x1af   :  { %v3891_v40 = vand.u32 4294901760, %v3437_v39  ;;  %v3902_v61 = vand.u32 4294901760, %v3435_v55 }
 0x1b0   :  { %644 = vmatpush.msra.mxu1 %v643_v41  ;;  %v685_v41 = vand.u32 4294901760, %v684_v28  ;;  %v3427_v28 = vld [vmem:[%s6258_s3 + $0x3a0] sm:$0xff] }
 0x1b1   :  { %v3917_v2 = vsub.f32 %v3435_v55, %v3902_v61 }
 0x1b2   :  { %316 = vperm.xlu1 %3445, %v278_v30   ;;  %v3814_v30 = vand.u32 4294901760, %v3381_v20  ;;  %650 = vmatpush.msra.mxu1 %v649_v51  ;;  %v690_v51 = vsub.f32 %v3876_v22, %v689_v32 }
 0x1b4   :  { %v3828_v43 = vsub.f32 %v3381_v20, %v3814_v30  ;;  %777 = vmatpush.msra.mxu3 %v3814_v30  ;;  %581 = vmatpush.msra.mxu0 %v3814_v30 }
 0x1b5   :  { %656 = vmatpush.msra.mxu1 %v655_v60  ;;  %v691_v60 = vand.u32 4294901760, %v690_v51 }
 0x1b6   :  { %v671_v56 = vand.u32 4294901760, %v3828_v43  ;;  %736 = vmatpush.msra.mxu2 %v3828_v43  ;;  %779 = vmatpush.msra.mxu3 %v3816_v31 }
 0x1b7   :  { %583 = vmatpush.msra.mxu0 %v3816_v31  ;;  %662 = vmatpush.msra.mxu1 %v661_v1  ;;  %v3905_v1 = vsub.f32 %v3437_v39, %v3891_v40  ;;  %v3961_v39 = vand.u32 4294901760, %v3427_v28 }
 0x1b8   :  { %v672_v44 = vsub.f32 %v3828_v43, %v671_v56  ;;  %739 = vmatpush.msra.mxu2 %v3832_v46  ;;  %781 = vmatpush.msra.mxu3 %v3855_v3 }
 0x1b9   :  { %585 = vmatpush.msra.mxu0 %v3855_v3  ;;  %668 = vmatpush.msra.mxu1 %v667_v4  ;;  %v6274_v4 = vand.u32 4294901760, %v3917_v2 }
 0x1ba   :  { %v673_v20 = vand.u32 4294901760, %v672_v44  ;;  %742 = vmatpush.msra.mxu2 %v3867_v14  ;;  %783 = vmatpush.msra.mxu3 %v3869_v15  ;;  %v3914_v44 = vand.u32 4294901760, %v3433_v35 }
 0x1bb   :  { %587 = vmatpush.msra.mxu0 %v3869_v15  ;;  %v947_v8 = vsub.f32 %v3917_v2, %v6274_v4 }
 0x1bc   :  { %674 = vmatpush.msra.mxu1 %v673_v20  ;;  %745 = vmatpush.msra.mxu2 %v3876_v22  ;;  %v3933_v48 = vsub.f32 %v3433_v35, %v3914_v44  ;;  %v3489_v22 = vld [vmem:[%s6255_s0 + $0x8] sm:$0xff] }
 0x1bd   :  { %794 = vmatpush.msrb.mxu0 %v599_v37  ;;  %v6275_v37 = vand.u32 4294901760, %v3905_v1 }
 0x1be   :  { %680 = vmatpush.msra.mxu1 %v679_v24  ;;  %898 = vmatpush.msrb.mxu2 %v3891_v40  ;;  %v6273_v20 = vand.u32 4294901760, %v3933_v48 }
 0x1bf   :  { %798 = vmatpush.msrb.mxu0 %v605_v38  ;;  %v941_v38 = vsub.f32 %v3905_v1, %v6275_v37 }
 0x1c0   :  { %686 = vmatpush.msra.mxu1 %v685_v41  ;;  %900 = vmatpush.msrb.mxu2 %v3902_v61  ;;  %v953_v53 = vsub.f32 %v3933_v48, %v6273_v20 }
 0x1c1   :  { %802 = vmatpush.msrb.mxu0 %v611_v52  ;;  %v3429_v52 = vld [vmem:[%s6258_s3 + $0x3b0] sm:$0xff] }
 0x1c2   :  { %692 = vmatpush.msra.mxu1 %v691_v60  ;;  %902 = vmatpush.msrb.mxu2 %v3914_v44  ;;  %v3946_v24 = vand.u32 4294901760, %v3429_v52  ;;  %v954_v58 = vand.u32 4294901760, %v953_v53  ;;  %v3978_v60 = vsub.f32 %v3427_v28, %v3961_v39 }
 0x1c3   :  { %806 = vmatpush.msrb.mxu0 %v617_v57  ;;  %v3959_v57 = vsub.f32 %v3431_v36, %v3930_v7 }
 0x1c4   :  { %861 = vmatpush.msrb.mxu1 %v3657_v33  ;;  %v942_v33 = vand.u32 4294901760, %v941_v38  ;;  %904 = vmatpush.msrb.mxu2 %v3930_v7  ;;  %v3964_v41 = vsub.f32 %v3429_v52, %v3946_v24  ;;  %v6270_v9 = vand.u32 4294901760, %v3978_v60 }
 0x1c5   :  { %810 = vmatpush.msrb.mxu0 %v623_v63  ;;  %v6272_v51 = vand.u32 4294901760, %v3959_v57 }
 0x1c6   :  { %863 = vmatpush.msrb.mxu1 %v3659_v34  ;;  %943 = vmatpush.msrb.mxu3 %v942_v33  ;;  %v948_v34 = vand.u32 4294901760, %v947_v8  ;;  %v6271_v55 = vand.u32 4294901760, %v3964_v41  ;;  %v971_v28 = vsub.f32 %v3978_v60, %v6270_v9 }
 0x1c7   :  { %906 = vmatpush.msrb.mxu2 %v3946_v24  ;;  %814 = vmatpush.msrb.mxu0 %v629_v5  ;;  %v959_v35 = vsub.f32 %v3959_v57, %v6272_v51 }
 0x1c8   :  { %865 = vmatpush.msrb.mxu1 %v3684_v45  ;;  %v3425_v45 = vld [vmem:[%s6258_s3 + $0x390] sm:$0xff]  ;;  %949 = vmatpush.msrb.mxu3 %v948_v34  ;;  %v965_v36 = vsub.f32 %v3964_v41, %v6271_v55  ;;  %v4025_v34 = vand.u32 4294901760, %v3419_v47  ;;  %v972_v53 = vand.u32 4294901760, %v971_v28  ;;  %v3503_v55 = vld [vmem:[%s6255_s0 + $0x78] sm:$0xff] }
 0x1c9   :  { %v3972_v63 = vand.u32 4294901760, %v3425_v45  ;;  %908 = vmatpush.msrb.mxu2 %v3961_v39  ;;  %818 = vmatpush.msrb.mxu0 %v635_v16  ;;  %v960_v33 = vand.u32 4294901760, %v959_v35 }
 0x1ca   :  { %867 = vmatpush.msrb.mxu1 %v3692_v49  ;;  %955 = vmatpush.msrb.mxu3 %v954_v58  ;;  %v3986_v49 = vand.u32 4294901760, %v3423_v0  ;;  %v966_v8 = vand.u32 4294901760, %v965_v36  ;;  %v4040_v58 = vand.u32 4294901760, %v3417_v17 }
 0x1cb   :  { %v3989_v5 = vsub.f32 %v3425_v45, %v3972_v63  ;;  %910 = vmatpush.msrb.mxu2 %v3972_v63  ;;  %822 = vmatpush.msrb.mxu0 %v641_v23 }
 0x1cc   :  { %869 = vmatpush.msrb.mxu1 %v3704_v54  ;;  %v3421_v54 = vld [vmem:[%s6258_s3 + $0x370] sm:$0xff]  ;;  %v4009_v52 = vsub.f32 %v3423_v0, %v3986_v49  ;;  %961 = vmatpush.msrb.mxu3 %v960_v33  ;;  %v4043_v0 = vsub.f32 %v3419_v47, %v4025_v34  ;;  %v4057_v28 = vsub.f32 %v3417_v17, %v4040_v58 }
 0x1cd   :  { %v6269_v16 = vand.u32 4294901760, %v3989_v5  ;;  %v4006_v38 = vand.u32 4294901760, %v3421_v54  ;;  %912 = vmatpush.msrb.mxu2 %v3986_v49  ;;  %826 = vmatpush.msrb.mxu0 %v647_v25 }
 0x1ce   :  { %871 = vmatpush.msrb.mxu1 %v3719_v59  ;;  %v6268_v23 = vand.u32 4294901760, %v4009_v52  ;;  %967 = vmatpush.msrb.mxu3 %v966_v8  ;;  %v6265_v19 = vand.u32 4294901760, %v4057_v28 }
 0x1cf   :  { %v977_v59 = vsub.f32 %v3989_v5, %v6269_v16  ;;  %914 = vmatpush.msrb.mxu2 %v4006_v38  ;;  %v4029_v45 = vsub.f32 %v3421_v54, %v4006_v38  ;;  %830 = vmatpush.msrb.mxu0 %v653_v26  ;;  %v6266_v54 = vand.u32 4294901760, %v4043_v0 }
 0x1d0   :  { %873 = vmatpush.msrb.mxu1 %v3735_v50  ;;  %v4034_v50 = vpop.permute.xlu2 %286  ;;  %v983_v25 = vsub.f32 %v4009_v52, %v6268_v23  ;;  %973 = vmatpush.msrb.mxu3 %v972_v53  ;;  %v1001_v53 = vsub.f32 %v4057_v28, %v6265_v19 }
 0x1d1   :  { %v978_v35 = vand.u32 4294901760, %v977_v59  ;;  %916 = vmatpush.msrb.mxu2 %v4025_v34  ;;  %v6267_v36 = vand.u32 4294901760, %v4029_v45  ;;  %834 = vmatpush.msrb.mxu0 %v659_v27  ;;  %v995_v8 = vsub.f32 %v4043_v0, %v6266_v54 }
 0x1d2   :  { %875 = vmatpush.msrb.mxu1 %v3752_v6  ;;  %v3415_v6 = vld [vmem:[%s6258_s3 + $0x340] sm:$0xff]  ;;  %v984_v18 = vand.u32 4294901760, %v983_v25 }
 0x1d3   :  { %v4054_v33 = vand.u32 4294901760, %v3415_v6  ;;  %v989_v26 = vsub.f32 %v4029_v45, %v6267_v36  ;;  %918 = vmatpush.msrb.mxu2 %v4040_v58  ;;  %838 = vmatpush.msrb.mxu0 %v665_v42  ;;  %v996_v29 = vand.u32 4294901760, %v995_v8 }
 0x1d4   :  { %877 = vmatpush.msrb.mxu1 %v3763_v10  ;;  %v3413_v10 = vld [vmem:[%s6258_s3 + $0x330] sm:$0xff]  ;;  %979 = vmatpush.msrb.mxu3 %v978_v35 }
 0x1d5   :  { %v4073_v27 = vand.u32 4294901760, %v3413_v10  ;;  %v4076_v47 = vsub.f32 %v3415_v6, %v4054_v33  ;;  %v990_v59 = vand.u32 4294901760, %v989_v26  ;;  %920 = vmatpush.msrb.mxu2 %v4054_v33  ;;  %842 = vmatpush.msrb.mxu0 %v671_v56 }
 0x1d6   :  { %879 = vmatpush.msrb.mxu1 %v3766_v11  ;;  %v3411_v11 = vld [vmem:[%s6258_s3 + $0x320] sm:$0xff]  ;;  %985 = vmatpush.msrb.mxu3 %v984_v18  ;;  %v1002_v18 = vand.u32 4294901760, %v1001_v53 }
 0x1d7   :  { %v6264_v17 = vand.u32 4294901760, %v4076_v47  ;;  %v4089_v25 = vand.u32 4294901760, %v3411_v11  ;;  %922 = vmatpush.msrb.mxu2 %v4073_v27  ;;  %v4095_v42 = vsub.f32 %v3413_v10, %v4073_v27  ;;  %846 = vmatpush.msrb.mxu0 %v677_v62 }
 0x1d8   :  { %881 = vmatpush.msrb.mxu1 %v3769_v12  ;;  %v3409_v12 = vld [vmem:[%s6258_s3 + $0x310] sm:$0xff]  ;;  %991 = vmatpush.msrb.mxu3 %v990_v59 }
 0x1d9   :  { %v1007_v43 = vsub.f32 %v4076_v47, %v6264_v17  ;;  %v4106_v56 = vand.u32 4294901760, %v3409_v12  ;;  %v4109_v6 = vsub.f32 %v3411_v11, %v4089_v25  ;;  %924 = vmatpush.msrb.mxu2 %v4089_v25  ;;  %v6263_v26 = vand.u32 4294901760, %v4095_v42  ;;  %850 = vmatpush.msrb.mxu0 %v683_v21  ;;  %v3488_v21 = vld [vmem:[%s6255_s0] sm:$0xff]  ;;  %v3495_v17 = vld [vmem:[%s6255_s0 + $0x38] sm:$0xff] }
 0x1da   :  { %883 = vmatpush.msrb.mxu1 %v3777_v13  ;;  %v3407_v13 = vld [vmem:[%s6258_s3 + $0x300] sm:$0xff]  ;;  %997 = vmatpush.msrb.mxu3 %v996_v29 }
 0x1db   :  { %v6262_v8 = vand.u32 4294901760, %v4109_v6  ;;  %v4120_v11 = vand.u32 4294901760, %v3407_v13  ;;  %v4123_v46 = vsub.f32 %v3409_v12, %v4106_v56  ;;  %v1008_v59 = vand.u32 4294901760, %v1007_v43  ;;  %926 = vmatpush.msrb.mxu2 %v4106_v56  ;;  %854 = vmatpush.msrb.mxu0 %v689_v32 }
 0x1dc   :  { %885 = vmatpush.msrb.mxu1 %v3814_v30  ;;  %v1013_v53 = vsub.f32 %v4095_v42, %v6263_v26  ;;  %1003 = vmatpush.msrb.mxu3 %v1002_v18 }
 0x1dd   :  { %v1019_v30 = vsub.f32 %v4109_v6, %v6262_v8  ;;  %v6260_v12 = vand.u32 4294901760, %v4123_v46  ;;  %v4137_v14 = vsub.f32 %v3407_v13, %v4120_v11  ;;  %928 = vmatpush.msrb.mxu2 %v4120_v11 }
 0x1de   :  { %887 = vmatpush.msrb.mxu1 %v3816_v31  ;;  %v1014_v31 = vand.u32 4294901760, %v1013_v53  ;;  %1009 = vmatpush.msrb.mxu3 %v1008_v59 }
 0x1df   :  { %v1025_v43 = vsub.f32 %v4123_v46, %v6260_v12  ;;  %v6261_v13 = vand.u32 4294901760, %v4137_v14  ;;  %v1020_v18 = vand.u32 4294901760, %v1019_v30 }
 0x1e0   :  { %889 = vmatpush.msrb.mxu1 %v3855_v3  ;;  %v3490_v3 = vld [vmem:[%s6255_s0 + $0x10] sm:$0xff]  ;;  %1015 = vmatpush.msrb.mxu3 %v1014_v31 }
 0x1e1   :  { %v4161_v53 = vmul.f32 %v3490_v3, %v4034_v50  ;;  %v1026_v30 = vand.u32 4294901760, %v1025_v43 }
 0x1e2   :  { %891 = vmatpush.msrb.mxu1 %v3869_v15  ;;  %1021 = vmatpush.msrb.mxu3 %v1020_v18  ;;  %v3496_v18 = vld [vmem:[%s6255_s0 + $0x40] sm:$0xff] }
 0x1e3   :  { %v4100_v35 = vpop.permute.xlu2 %306  ;;  %6385 = vst [vmem:[#allocation5_spill] sm:$0xff] %v4161_v53 }
 0x1e4   :  { %1027 = vmatpush.msrb.mxu3 %v1026_v30  ;;  %v3498_v30 = vld [vmem:[%s6255_s0 + $0x50] sm:$0xff] }
 0x1fc   :  { %v282_v62 = vpop.permute.xlu0 %281 }
 0x1fd   :  { %v4144_v29 = vmul.f32 %v3488_v21, %v282_v62  ;;  %v4155_v32 = vmul.f32 %v3489_v22, %v282_v62  ;;  %v1031_v21 = vsub.f32 %v4137_v14, %v6261_v13  ;;  %v3491_v62 = vld [vmem:[%s6255_s0 + $0x18] sm:$0xff]  ;;  %v297_v22 = vpop.permute.xlu2 %296  ;;  %v3492_v13 = vld [vmem:[%s6255_s0 + $0x20] sm:$0xff] }
 0x1fe   :  { %v4171_v59 = vmul.f32 %v3491_v62, %v4034_v50  ;;  %v3493_v50 = vld [vmem:[%s6255_s0 + $0x28] sm:$0xff]  ;;  %v3494_v62 = vld [vmem:[%s6255_s0 + $0x30] sm:$0xff] }
 0x1ff   :  { %6383 = vst [vmem:[#allocation3_spill] sm:$0xff] %v4144_v29  ;;  %v382_v3 = vmax.f32 %v4144_v29, %v4161_v53  ;;  %v1032_v43 = vand.u32 4294901760, %v1031_v21  ;;  %v4190_v26 = vmul.f32 %v3494_v62, %v297_v22 }
 0x200   :  { %6384 = vst [vmem:[#allocation4_spill] sm:$0xff] %v4155_v32  ;;  %v391_v15 = vmax.f32 %v4155_v32, %v4171_v59 }
 0x201   :  { %6386 = vst [vmem:[#allocation6_spill] sm:$0xff] %v4171_v59  ;;  %1033 = vmatpush.msrb.mxu3 %v1032_v43 }
 0x202   :  { %6389 = vst [vmem:[#allocation9_spill] sm:$0xff] %v4190_v26 }
 0x214   :  { %v302_v10 = vpop.permute.xlu1 %301 }
 0x215   :  { %v4202_v21 = vmul.f32 %v3496_v18, %v302_v10 }
 0x217   :  { %6391 = vst [vmem:[#allocation11_spill] sm:$0xff] %v4202_v21 }
 0x21c   :  { %v292_v12 = vpop.permute.xlu1 %291 }
 0x21d   :  { %v4180_v8 = vmul.f32 %v3492_v13, %v292_v12  ;;  %v4185_v31 = vmul.f32 %v3493_v50, %v292_v12  ;;  %v4195_v13 = vmul.f32 %v3495_v17, %v297_v22  ;;  %v3497_v50 = vld [vmem:[%s6255_s0 + $0x48] sm:$0xff] }
 0x21e   :  { %v312_v12 = vpop.permute.xlu0 %311  ;;  %v4207_v62 = vmul.f32 %v3497_v50, %v302_v10  ;;  %v3501_v10 = vld [vmem:[%s6255_s0 + $0x68] sm:$0xff] }
 0x21f   :  { %6387 = vst [vmem:[#allocation7_spill] sm:$0xff] %v4180_v8  ;;  %v383_v19 = vmax.f32 %v382_v3, %v4180_v8  ;;  %v392_v54 = vmax.f32 %v391_v15, %v4185_v31  ;;  %v4215_v3 = vmul.f32 %v3498_v30, %v4100_v35  ;;  %v3499_v15 = vld [vmem:[%s6255_s0 + $0x58] sm:$0xff]  ;;  %v4231_v43 = vmul.f32 %v3501_v10, %v312_v12 }
 0x220   :  { %6388 = vst [vmem:[#allocation8_spill] sm:$0xff] %v4185_v31  ;;  %v4221_v18 = vmul.f32 %v3499_v15, %v4100_v35 }
 0x221   :  { %6390 = vst [vmem:[#allocation10_spill] sm:$0xff] %v4195_v13  ;;  %v384_v17 = vmax.f32 %v383_v19, %v4190_v26  ;;  %v393_v22 = vmax.f32 %v392_v54, %v4195_v13  ;;  %v3500_v19 = vld [vmem:[%s6255_s0 + $0x60] sm:$0xff]  ;;  %v400_v36 = vmax.f32 %v4202_v21, %v4215_v3 }
 0x222   :  { %6392 = vst [vmem:[#allocation12_spill] sm:$0xff] %v4207_v62  ;;  %v4226_v54 = vmul.f32 %v3500_v19, %v312_v12  ;;  %v409_v35 = vmax.f32 %v4207_v62, %v4221_v18  ;;  %v3502_v12 = vld [vmem:[%s6255_s0 + $0x70] sm:$0xff] }
 0x223   :  { %6393 = vst [vmem:[#allocation13_spill] sm:$0xff] %v4215_v3  ;;  %v385_v50 = vrot.slane %v384_v17, 4  ;;  %v394_v30 = vrot.slane %v393_v22, 4  ;;  %v3420_v3 = vld [vmem:[%s6258_s3 + $0x368] sm:$0xff] }
 0x224   :  { %6394 = vst [vmem:[#allocation14_spill] sm:$0xff] %v4221_v18  ;;  %v317_v15 = vpop.permute.xlu1 %316  ;;  %v401_v19 = vmax.f32 %v400_v36, %v4226_v54  ;;  %v410_v9 = vmax.f32 %v409_v35, %v4231_v43  ;;  %v4707_v29 = vand.u32 4294901760, %v3420_v3 }
 0x225   :  { %6395 = vst [vmem:[#allocation15_spill] sm:$0xff] %v4226_v54  ;;  %v386_v23 = vmax.f32 %v384_v17, %v385_v50  ;;  %v395_v16 = vmax.f32 %v393_v22, %v394_v30  ;;  %v4242_v10 = vmul.f32 %v3502_v12, %v317_v15  ;;  %v4247_v51 = vmul.f32 %v3503_v55, %v317_v15  ;;  %v3422_v54 = vld [vmem:[%s6258_s3 + $0x378] sm:$0xff] }
 0x226   :  { %6396 = vst [vmem:[#allocation16_spill] sm:$0xff] %v4231_v43  ;;  %v4691_v53 = vand.u32 4294901760, %v3422_v54 }
 0x227   :  { %6397 = vst [vmem:[#allocation17_spill] sm:$0xff] %v4242_v10  ;;  %v387_v20 = vrot.slane %v386_v23, 2  ;;  %v396_v4 = vrot.slane %v395_v16, 2  ;;  %v402_v17 = vmax.f32 %v401_v19, %v4242_v10  ;;  %v411_v36 = vmax.f32 %v410_v9, %v4247_v51 }
 0x228   :  { %6398 = vst [vmem:[#allocation18_spill] sm:$0xff] %v4247_v51 }
 0x229   :  { %v403_v22 = vrot.slane %v402_v17, 4  ;;  %v412_v50 = vrot.slane %v411_v36, 4  ;;  %v388_v30 = vmax.f32 %v386_v23, %v387_v20  ;;  %v397_v35 = vmax.f32 %v395_v16, %v396_v4 }
 0x22b   :  { %v404_v37 = vmax.f32 %v402_v17, %v403_v22  ;;  %v413_v13 = vmax.f32 %v411_v36, %v412_v50  ;;  %v389_v31 = vrot.slane %v388_v30, 1  ;;  %v398_v18 = vrot.slane %v397_v35, 1 }
 0x22c   :  { %v6407_v17 = vand.u32 4294901760, %v3989_v5  ;;  %v6409_v50 = vand.u32 4294901760, %v4029_v45 }
 0x22d   :  { %v405_v12 = vrot.slane %v404_v37, 2  ;;  %v414_v43 = vrot.slane %v413_v13, 2  ;;  %v390_v32 = vmax.f32 %v388_v30, %v389_v31  ;;  %v399_v26 = vmax.f32 %v397_v35, %v398_v18 }
 0x22f   :  { %v406_v62 = vmax.f32 %v404_v37, %v405_v12  ;;  %v415_v59 = vmax.f32 %v413_v13, %v414_v43  ;;  %v6402_v13 = vand.u32 4294901760, %v3917_v2  ;;  %v6403_v43 = vand.u32 4294901760, %v3933_v48 }
 0x231   :  { %v407_v55 = vrot.slane %v406_v62, 1  ;;  %v416_v15 = vrot.slane %v415_v59, 1 }
 0x233   :  { %v408_v19 = vmax.f32 %v406_v62, %v407_v55  ;;  %v417_v10 = vmax.f32 %v415_v59, %v416_v15  ;;  %v6401_v59 = vand.u32 4294901760, %v3905_v1  ;;  %v3396_v55 = vld [vmem:[%s6258_s3 + $0x2a8] sm:$0xff] }
 0x235   :  { %v552_v9 = vsel %vm551_vm1, %v408_v19, %v390_v32  ;;  %v553_v20 = vsel %vm551_vm1, %v417_v10, %v399_v26 }
 0x236   :  { %v4253_v4 = vand.u32 4294901760, %v552_v9  ;;  %v4255_v16 = vand.u32 4294901760, %v553_v20 }
 0x238   :  { %694 = vmatmul.f32.vlgmr.msra.gmra.mxu1 %v4253_v4  ;;  %v4259_v37 = vsub.f32 %v552_v9, %v4253_v4  ;;  %v4262_v23 = vsub.f32 %v553_v20, %v4255_v16  ;;  %v3392_v9 = vld [vmem:[%s6258_s3 + $0x288] sm:$0xff]  ;;  %v6412_v20 = vand.u32 4294901760, %v4076_v47 }
 0x239   :  { %1094 = vmatpush.msra.mxu1 %v3891_v40 }
 0x23a   :  { %6399 = vst [vmem:[#allocation19_spill] sm:$0xff] %v4262_v23  ;;  %748 = vmatmul.f32.vlgmr.msra.gmra.mxu2 %v4259_v37  ;;  %v4267_v32 = vand.u32 4294901760, %v4259_v37  ;;  %v4270_v26 = vand.u32 4294901760, %v4262_v23 }
 0x23b   :  { %1096 = vmatpush.msra.mxu1 %v3902_v61  ;;  %1135 = vmatpush.msra.mxu2 %v6401_v59 }
 0x23c   :  { %6400 = vst [vmem:[#allocation20_spill] sm:$0xff] %v4270_v26  ;;  %787 = vmatmul.f32.vlgmr.msra.gmra.mxu3 %v4267_v32  ;;  %v591_v31 = vsub.f32 %v4259_v37, %v4267_v32  ;;  %v932_v62 = vsub.f32 %v4262_v23, %v4270_v26 }
 0x23d   :  { %1098 = vmatpush.msra.mxu1 %v3914_v44  ;;  %1139 = vmatpush.msra.mxu2 %v6402_v13  ;;  %v6413_v13 = vand.u32 4294901760, %v4095_v42 }
 0x23e   :  { %1202 = vmatpush.msra.mxu3 %v3891_v40  ;;  %v4284_v18 = vand.u32 4294901760, %v591_v31  ;;  %v4293_v10 = vand.u32 4294901760, %v932_v62  ;;  %v6404_v40 = vand.u32 4294901760, %v3959_v57 }
 0x23f   :  { %1100 = vmatpush.msra.mxu1 %v3930_v7  ;;  %1143 = vmatpush.msra.mxu2 %v6403_v43  ;;  %v4410_v43 = vand.u32 4294901760, %v3392_v9 }
 0x240   :  { %1204 = vmatpush.msra.mxu3 %v3902_v61  ;;  %593 = vmatmul.f32.vlgmr.msra.gmra.mxu0 %v4284_v18  ;;  %v6405_v61 = vand.u32 4294901760, %v3964_v41 }
 0x241   :  { %893 = vmatmul.f32.vlgmr.msrb.gmra.mxu1 %v4253_v4  ;;  %1041 = vmatpush.msra.mxu0 %v3905_v1  ;;  %v3406_v1 = vld [vmem:[%s6258_s3 + $0x2f8] sm:$0xff] }
 0x242   :  { %1102 = vmatpush.msra.mxu1 %v3946_v24  ;;  %1147 = vmatpush.msra.mxu2 %v6404_v40  ;;  %v3390_v40 = vld [vmem:[%s6258_s3 + $0x278] sm:$0xff] }
 0x243   :  { %1206 = vmatpush.msra.mxu3 %v3914_v44  ;;  %934 = vmatmul.f32.vlgmr.msrb.gmra.mxu2 %v4293_v10  ;;  %v6406_v44 = vand.u32 4294901760, %v3978_v60 }
 0x244   :  { %1044 = vmatpush.msra.mxu0 %v3917_v2  ;;  %1104 = vmatpush.msra.mxu1 %v3961_v39  ;;  %v3404_v2 = vld [vmem:[%s6258_s3 + $0x2e8] sm:$0xff] }
 0x245   :  { %1151 = vmatpush.msra.mxu2 %v6405_v61  ;;  %1208 = vmatpush.msra.mxu3 %v3930_v7  ;;  %v4318_v7 = vand.u32 4294901760, %v3406_v1  ;;  %v4328_v36 = vand.u32 4294901760, %v3404_v2 }
 0x246   :  { %1035 = vmatmul.f32.vlgmr.msrb.gmra.mxu3 %v4255_v16  ;;  %1047 = vmatpush.msra.mxu0 %v3933_v48  ;;  %v3402_v48 = vld [vmem:[%s6258_s3 + $0x2d8] sm:$0xff] }
 0x247   :  { %1106 = vmatpush.msra.mxu1 %v3972_v63  ;;  %1155 = vmatpush.msra.mxu2 %v6406_v44  ;;  %v4339_v22 = vsub.f32 %v3406_v1, %v4318_v7 }
 0x248   :  { %1210 = vmatpush.msra.mxu3 %v3946_v24  ;;  %1050 = vmatpush.msra.mxu0 %v3959_v57  ;;  %v3400_v24 = vld [vmem:[%s6258_s3 + $0x2c8] sm:$0xff]  ;;  %v6408_v57 = vand.u32 4294901760, %v4009_v52 }
 0x249   :  { %1108 = vmatpush.msra.mxu1 %v3986_v49  ;;  %1159 = vmatpush.msra.mxu2 %v6407_v17  ;;  %v4354_v30 = vand.u32 4294901760, %v3400_v24  ;;  %v6309_v35 = vand.u32 4294901760, %v4339_v22  ;;  %v4435_v17 = vand.u32 4294901760, %v3390_v40 }
 0x24a   :  { %1212 = vmatpush.msra.mxu3 %v3961_v39  ;;  %856 = vmatmul.f32.vlgmr.msrb.gmra.mxu0 %v4253_v4  ;;  %v4341_v39 = vand.u32 4294901760, %v3402_v48 }
 0x24b   :  { %1053 = vmatpush.msra.mxu0 %v3964_v41  ;;  %1110 = vmatpush.msra.mxu1 %v4006_v38  ;;  %v3398_v41 = vld [vmem:[%s6258_s3 + $0x2b8] sm:$0xff]  ;;  %v4380_v19 = vsub.f32 %v3400_v24, %v4354_v30 }
 0x24c   :  { %1163 = vmatpush.msra.mxu2 %v6408_v57  ;;  %1214 = vmatpush.msra.mxu3 %v3972_v63  ;;  %v4352_v63 = vsub.f32 %v3404_v2, %v4328_v36  ;;  %v4363_v12 = vsub.f32 %v3402_v48, %v4341_v39  ;;  %v4444_v57 = vsub.f32 %v3392_v9, %v4410_v43 }
 0x24d   :  { %1056 = vmatpush.msra.mxu0 %v3978_v60  ;;  %1112 = vmatpush.msra.mxu1 %v4025_v34  ;;  %v6410_v60 = vand.u32 4294901760, %v4043_v0  ;;  %v6305_v62 = vand.u32 4294901760, %v4380_v19 }
 0x24e   :  { %1167 = vmatpush.msra.mxu2 %v6409_v50  ;;  %1216 = vmatpush.msra.mxu3 %v3986_v49  ;;  %v4365_v49 = vand.u32 4294901760, %v3398_v41  ;;  %v6308_v15 = vand.u32 4294901760, %v4352_v63  ;;  %v6306_v59 = vand.u32 4294901760, %v4363_v12 }
 0x24f   :  { %1059 = vmatpush.msra.mxu0 %v3989_v5  ;;  %1114 = vmatpush.msra.mxu1 %v4040_v58  ;;  %v3394_v5 = vld [vmem:[%s6258_s3 + $0x298] sm:$0xff]  ;;  %v1300_v24 = vsub.f32 %v4380_v19, %v6305_v62  ;;  %v3432_v62 = vld [vmem:[%s6258_s3 + $0x3c8] sm:$0xff] }
 0x250   :  { %1171 = vmatpush.msra.mxu2 %v6410_v60  ;;  %1218 = vmatpush.msra.mxu3 %v4006_v38  ;;  %v6411_v38 = vand.u32 4294901760, %v4057_v28  ;;  %v4399_v31 = vand.u32 4294901760, %v3394_v5  ;;  %v1294_v1 = vsub.f32 %v4363_v12, %v6306_v59 }
 0x251   :  { %1062 = vmatpush.msra.mxu0 %v4009_v52  ;;  %1116 = vmatpush.msra.mxu1 %v4054_v33  ;;  %v4384_v52 = vand.u32 4294901760, %v3396_v55 }
 0x252   :  { %1175 = vmatpush.msra.mxu2 %v6411_v38  ;;  %1220 = vmatpush.msra.mxu3 %v4025_v34  ;;  %v1282_v34 = vsub.f32 %v4339_v22, %v6309_v35  ;;  %v4428_v2 = vsub.f32 %v3394_v5, %v4399_v31  ;;  %v1295_v60 = vand.u32 4294901760, %v1294_v1  ;;  %v3384_v38 = vld [vmem:[%s6258_s3 + $0x248] sm:$0xff] }
 0x253   :  { %1065 = vmatpush.msra.mxu0 %v4029_v45  ;;  %1118 = vmatpush.msra.mxu1 %v4073_v27  ;;  %v4397_v45 = vsub.f32 %v3398_v41, %v4365_v49 }
 0x254   :  { %1179 = vmatpush.msra.mxu2 %v6412_v20  ;;  %1222 = vmatpush.msra.mxu3 %v4040_v58  ;;  %v1288_v58 = vsub.f32 %v4352_v63, %v6308_v15  ;;  %v1283_v61 = vand.u32 4294901760, %v1282_v34  ;;  %v6297_v5 = vand.u32 4294901760, %v4428_v2  ;;  %v1301_v20 = vand.u32 4294901760, %v1300_v24  ;;  %v3428_v15 = vld [vmem:[%s6258_s3 + $0x3a8] sm:$0xff] }
 0x255   :  { %1068 = vmatpush.msra.mxu0 %v4043_v0  ;;  %1120 = vmatpush.msra.mxu1 %v4089_v25  ;;  %v4418_v0 = vsub.f32 %v3396_v55, %v4384_v52  ;;  %v6302_v44 = vand.u32 4294901760, %v4397_v45  ;;  %v6295_v34 = vand.u32 4294901760, %v4444_v57 }
 0x256   :  { %1183 = vmatpush.msra.mxu2 %v6413_v13  ;;  %1224 = vmatpush.msra.mxu3 %v4054_v33  ;;  %v6414_v33 = vand.u32 4294901760, %v4109_v6  ;;  %v1289_v48 = vand.u32 4294901760, %v1288_v58  ;;  %v3382_v13 = vld [vmem:[%s6258_s3 + $0x238] sm:$0xff] }
 0x257   :  { %1071 = vmatpush.msra.mxu0 %v4057_v28  ;;  %1122 = vmatpush.msra.mxu1 %v4106_v56  ;;  %v3388_v28 = vld [vmem:[%s6258_s3 + $0x268] sm:$0xff]  ;;  %v6301_v41 = vand.u32 4294901760, %v4418_v0  ;;  %v1306_v55 = vsub.f32 %v4397_v45, %v6302_v44 }
 0x258   :  { %1187 = vmatpush.msra.mxu2 %v6414_v33  ;;  %1226 = vmatpush.msra.mxu3 %v4073_v27  ;;  %v6415_v27 = vand.u32 4294901760, %v4123_v46  ;;  %v4452_v50 = vand.u32 4294901760, %v3388_v28 }
 0x259   :  { %1074 = vmatpush.msra.mxu0 %v4076_v47  ;;  %1124 = vmatpush.msra.mxu1 %v4120_v11  ;;  %v3386_v47 = vld [vmem:[%s6258_s3 + $0x258] sm:$0xff]  ;;  %v1307_v33 = vand.u32 4294901760, %v1306_v55  ;;  %v3376_v55 = vld [vmem:[%s6258_s3 + $0x208] sm:$0xff] }
 0x25a   :  { %1191 = vmatpush.msra.mxu2 %v6415_v27  ;;  %1228 = vmatpush.msra.mxu3 %v4089_v25  ;;  %v6416_v25 = vand.u32 4294901760, %v4137_v14  ;;  %v4468_v9 = vand.u32 4294901760, %v3386_v47  ;;  %v4481_v58 = vsub.f32 %v3388_v28, %v4452_v50  ;;  %v4498_v28 = vand.u32 4294901760, %v3382_v13 }
 0x25b   :  { %1128 = vmatmul.f32.vlgmr.msra.gmra.mxu1 %v4270_v26  ;;  %1077 = vmatpush.msra.mxu0 %v4095_v42  ;;  %v4466_v42 = vsub.f32 %v3390_v40, %v4435_v17  ;;  %v4483_v40 = vand.u32 4294901760, %v3384_v38  ;;  %v1324_v27 = vsub.f32 %v4444_v57, %v6295_v34 }
 0x25c   :  { %1284 = vmatpush.msrb.mxu1 %v1283_v61  ;;  %1195 = vmatpush.msra.mxu2 %v6416_v25  ;;  %v1318_v61 = vsub.f32 %v4428_v2, %v6297_v5  ;;  %v4496_v1 = vsub.f32 %v3386_v47, %v4468_v9  ;;  %v6296_v47 = vand.u32 4294901760, %v4481_v58 }
 0x25d   :  { %1230 = vmatpush.msra.mxu3 %v4106_v56  ;;  %1197 = vmatmul.f32.vlgmr.msra.gmra.mxu2 %v4255_v16  ;;  %v1312_v56 = vsub.f32 %v4418_v0, %v6301_v41  ;;  %v4511_v25 = vsub.f32 %v3384_v38, %v4483_v40 }
 0x25e   :  { %1290 = vmatpush.msrb.mxu1 %v1289_v48  ;;  %1382 = vmatpush.msrb.mxu2 %v4339_v22  ;;  %v3378_v48 = vld [vmem:[%s6258_s3 + $0x218] sm:$0xff]  ;;  %v6298_v38 = vand.u32 4294901760, %v4496_v1 }
 0x25f   :  { %1080 = vmatpush.msra.mxu0 %v4109_v6  ;;  %1232 = vmatpush.msra.mxu3 %v4120_v11  ;;  %v3380_v6 = vld [vmem:[%s6258_s3 + $0x228] sm:$0xff]  ;;  %v6294_v11 = vand.u32 4294901760, %v4466_v42  ;;  %v1313_v24 = vand.u32 4294901760, %v1312_v56  ;;  %v4526_v56 = vsub.f32 %v3382_v13, %v4498_v28  ;;  %v4540_v13 = vand.u32 4294901760, %v3376_v55 }
 0x260   :  { %1234 = vmatmul.f32.vlgmr.msra.gmra.mxu3 %v4255_v16  ;;  %1296 = vmatpush.msrb.mxu1 %v1295_v60  ;;  %v1319_v60 = vand.u32 4294901760, %v1318_v61  ;;  %v1336_v61 = vsub.f32 %v4481_v58, %v6296_v47 }
 0x261   :  { %1385 = vmatpush.msrb.mxu2 %v4352_v63  ;;  %1435 = vmatpush.msrb.mxu3 %v4318_v7  ;;  %v6300_v47 = vand.u32 4294901760, %v4526_v56 }
 0x262   :  { %1083 = vmatpush.msra.mxu0 %v4123_v46  ;;  %1302 = vmatpush.msrb.mxu1 %v1301_v20  ;;  %v4513_v46 = vand.u32 4294901760, %v3380_v6  ;;  %v1330_v20 = vsub.f32 %v4466_v42, %v6294_v11  ;;  %v6299_v11 = vand.u32 4294901760, %v4511_v25 }
 0x263   :  { %1388 = vmatpush.msrb.mxu2 %v4363_v12  ;;  %1437 = vmatpush.msrb.mxu3 %v4328_v36 }
 0x264   :  { %1086 = vmatpush.msra.mxu0 %v4137_v14  ;;  %1308 = vmatpush.msrb.mxu1 %v1307_v33  ;;  %v4528_v14 = vand.u32 4294901760, %v3378_v48  ;;  %v1325_v33 = vand.u32 4294901760, %v1324_v27  ;;  %v4538_v34 = vsub.f32 %v3380_v6, %v4513_v46  ;;  %v1331_v27 = vand.u32 4294901760, %v1330_v20 }
 0x265   :  { %1089 = vmatmul.f32.vlgmr.msra.gmra.mxu0 %v4262_v23  ;;  %1391 = vmatpush.msrb.mxu2 %v4380_v19  ;;  %v1337_v6 = vand.u32 4294901760, %v1336_v61  ;;  %v1354_v61 = vsub.f32 %v4526_v56, %v6300_v47  ;;  %v3424_v23 = vld [vmem:[%s6258_s3 + $0x388] sm:$0xff] }
 0x266   :  { %1239 = vmatpush.msrb.mxu0 %v4318_v7  ;;  %1439 = vmatpush.msrb.mxu3 %v4341_v39  ;;  %v4550_v5 = vsub.f32 %v3378_v48, %v4528_v14  ;;  %v6303_v20 = vand.u32 4294901760, %v4538_v34  ;;  %v3438_v48 = vld [vmem:[%s6258_s3 + $0x3f8] sm:$0xff]  ;;  %v4675_v8 = vand.u32 4294901760, %v3424_v23 }
 0x267   :  { %1314 = vmatpush.msrb.mxu1 %v1313_v24  ;;  %1394 = vmatpush.msrb.mxu2 %v4397_v45  ;;  %v1342_v24 = vsub.f32 %v4496_v1, %v6298_v38  ;;  %v4560_v38 = vsub.f32 %v3376_v55, %v4540_v13  ;;  %v3436_v55 = vld [vmem:[%s6258_s3 + $0x3e8] sm:$0xff]  ;;  %v4582_v41 = vand.u32 4294901760, %v3438_v48  ;;  %v1355_v44 = vand.u32 4294901760, %v1354_v61 }
 0x268   :  { %1241 = vmatpush.msrb.mxu0 %v4328_v36  ;;  %1441 = vmatpush.msrb.mxu3 %v4354_v30 }
 0x269   :  { %1320 = vmatpush.msrb.mxu1 %v1319_v60  ;;  %1397 = vmatpush.msrb.mxu2 %v4418_v0  ;;  %v1348_v60 = vsub.f32 %v4511_v25, %v6299_v11  ;;  %v6304_v11 = vand.u32 4294901760, %v4550_v5  ;;  %v6307_v47 = vand.u32 4294901760, %v4560_v38 }
 0x26a   :  { %1243 = vmatpush.msrb.mxu0 %v4341_v39  ;;  %1443 = vmatpush.msrb.mxu3 %v4365_v49 }
 0x26b   :  { %1326 = vmatpush.msrb.mxu1 %v1325_v33  ;;  %1400 = vmatpush.msrb.mxu2 %v4428_v2  ;;  %v1343_v33 = vand.u32 4294901760, %v1342_v24  ;;  %v1360_v24 = vsub.f32 %v4538_v34, %v6303_v20  ;;  %v3434_v20 = vld [vmem:[%s6258_s3 + $0x3d8] sm:$0xff]  ;;  %v1372_v61 = vsub.f32 %v4560_v38, %v6307_v47  ;;  %v4620_v47 = vand.u32 4294901760, %v3432_v62 }
 0x26c   :  { %1245 = vmatpush.msrb.mxu0 %v4354_v30  ;;  %1445 = vmatpush.msrb.mxu3 %v4384_v52  ;;  %v4609_v59 = vand.u32 4294901760, %v3434_v20 }
 0x26d   :  { %1332 = vmatpush.msrb.mxu1 %v1331_v27  ;;  %1403 = vmatpush.msrb.mxu2 %v4444_v57  ;;  %v1349_v27 = vand.u32 4294901760, %v1348_v60  ;;  %v4590_v60 = vand.u32 4294901760, %v3436_v55  ;;  %v4644_v35 = vsub.f32 %v3432_v62, %v4620_v47 }
 0x26e   :  { %1247 = vmatpush.msrb.mxu0 %v4365_v49  ;;  %1447 = vmatpush.msrb.mxu3 %v4399_v31 }
 0x26f   :  { %1338 = vmatpush.msrb.mxu1 %v1337_v6  ;;  %1406 = vmatpush.msrb.mxu2 %v4466_v42  ;;  %v1366_v6 = vsub.f32 %v4550_v5, %v6304_v11  ;;  %v4602_v11 = vsub.f32 %v3438_v48, %v4582_v41  ;;  %v4616_v48 = vsub.f32 %v3436_v55, %v4590_v60 }
 0x270   :  { %1249 = vmatpush.msrb.mxu0 %v4384_v52  ;;  %1449 = vmatpush.msrb.mxu3 %v4410_v43  ;;  %v4632_v55 = vsub.f32 %v3434_v20, %v4609_v59  ;;  %6417 = vst [vmem:[#allocation21_spill] sm:$0xff] %v4644_v35 }
 0x271   :  { %1344 = vmatpush.msrb.mxu1 %v1343_v33  ;;  %1409 = vmatpush.msrb.mxu2 %v4481_v58  ;;  %v1361_v33 = vand.u32 4294901760, %v1360_v24  ;;  %v1367_v24 = vand.u32 4294901760, %v1366_v6  ;;  %v6418_v20 = vand.u32 4294901760, %v4602_v11 }
 0x272   :  { %1251 = vmatpush.msrb.mxu0 %v4399_v31  ;;  %1451 = vmatpush.msrb.mxu3 %v4435_v17 }
 0x273   :  { %1350 = vmatpush.msrb.mxu1 %v1349_v27  ;;  %1412 = vmatpush.msrb.mxu2 %v4496_v1  ;;  %v3430_v27 = vld [vmem:[%s6258_s3 + $0x3b8] sm:$0xff] }
 0x274   :  { %1253 = vmatpush.msrb.mxu0 %v4410_v43  ;;  %1453 = vmatpush.msrb.mxu3 %v4452_v50  ;;  %v4627_v6 = vand.u32 4294901760, %v3430_v27 }
 0x275   :  { %1356 = vmatpush.msrb.mxu1 %v1355_v44  ;;  %1415 = vmatpush.msrb.mxu2 %v4511_v25  ;;  %v1373_v44 = vand.u32 4294901760, %v1372_v61  ;;  %v3426_v61 = vld [vmem:[%s6258_s3 + $0x398] sm:$0xff] }
 0x276   :  { %1255 = vmatpush.msrb.mxu0 %v4435_v17  ;;  %1455 = vmatpush.msrb.mxu3 %v4468_v9  ;;  %v4651_v51 = vsub.f32 %v3430_v27, %v4627_v6 }
 0x277   :  { %1362 = vmatpush.msrb.mxu1 %v1361_v33  ;;  %1418 = vmatpush.msrb.mxu2 %v4526_v56  ;;  %v4636_v33 = vand.u32 4294901760, %v3428_v15 }
 0x278   :  { %1257 = vmatpush.msrb.mxu0 %v4452_v50  ;;  %1457 = vmatpush.msrb.mxu3 %v4483_v40  ;;  %6419 = vst [vmem:[#allocation22_spill] sm:$0xff] %v4651_v51 }
 0x279   :  { %1368 = vmatpush.msrb.mxu1 %v1367_v24  ;;  %1421 = vmatpush.msrb.mxu2 %v4538_v34  ;;  %v1623_v24 = vsub.f32 %v4602_v11, %v6418_v20  ;;  %v6420_v20 = vand.u32 4294901760, %v4616_v48  ;;  %v4667_v26 = vsub.f32 %v3428_v15, %v4636_v33  ;;  %v4705_v15 = vsub.f32 %v3424_v23, %v4675_v8 }
 0x27a   :  { %1259 = vmatpush.msrb.mxu0 %v4468_v9  ;;  %1459 = vmatpush.msrb.mxu3 %v4498_v28 }
 0x27b   :  { %1374 = vmatpush.msrb.mxu1 %v1373_v44  ;;  %1424 = vmatpush.msrb.mxu2 %v4550_v5  ;;  %v4659_v44 = vand.u32 4294901760, %v3426_v61  ;;  %v1629_v27 = vsub.f32 %v4616_v48, %v6420_v20  ;;  %6421 = vst [vmem:[#allocation23_spill] sm:$0xff] %v4667_v26  ;;  %v1624_v20 = vand.u32 4294901760, %v1623_v24 }
 0x27c   :  { %1261 = vmatpush.msrb.mxu0 %v4483_v40  ;;  %1461 = vmatpush.msrb.mxu3 %v4513_v46 }
 0x27d   :  { %1376 = vmatmul.f32.vlgmr.msrb.gmra.mxu1 %v4253_v4  ;;  %1427 = vmatpush.msrb.mxu2 %v4560_v38  ;;  %v4689_v21 = vsub.f32 %v3426_v61, %v4659_v44  ;;  %v6423_v61 = vand.u32 4294901760, %v4644_v35 }
 0x27e   :  { %1543 = vmatpush.msra.mxu1 %v4318_v7  ;;  %1263 = vmatpush.msrb.mxu0 %v4498_v28  ;;  %v6422_v7 = vand.u32 4294901760, %v4632_v55 }
 0x27f   :  { %1463 = vmatpush.msrb.mxu3 %v4528_v14  ;;  %1430 = vmatmul.f32.vlgmr.msrb.gmra.mxu2 %v4259_v37  ;;  %v1630_v37 = vand.u32 4294901760, %v1629_v27  ;;  %v6424_v27 = vand.u32 4294901760, %v4651_v51 }
 0x280   :  { %1545 = vmatpush.msra.mxu1 %v4328_v36  ;;  %1580 = vmatpush.msra.mxu2 %v4582_v41  ;;  %v1635_v62 = vsub.f32 %v4632_v55, %v6422_v7  ;;  %v3418_v36 = vld [vmem:[%s6258_s3 + $0x358] sm:$0xff]  ;;  %v1641_v7 = vsub.f32 %v4644_v35, %v6423_v61  ;;  %v4720_v61 = vsub.f32 %v3422_v54, %v4691_v53 }
 0x281   :  { %1265 = vmatpush.msrb.mxu0 %v4513_v46  ;;  %1465 = vmatpush.msrb.mxu3 %v4540_v13  ;;  %v1647_v24 = vsub.f32 %v4651_v51, %v6424_v27  ;;  %v4722_v35 = vand.u32 4294901760, %v3418_v36  ;;  %v3414_v51 = vld [vmem:[%s6258_s3 + $0x338] sm:$0xff] }
 0x282   :  { %1469 = vmatmul.f32.vlgmr.msrb.gmra.mxu3 %v4267_v32  ;;  %1547 = vmatpush.msra.mxu1 %v4341_v39  ;;  %v3416_v32 = vld [vmem:[%s6258_s3 + $0x348] sm:$0xff]  ;;  %v1636_v39 = vand.u32 4294901760, %v1635_v62  ;;  %v4735_v62 = vsub.f32 %v3420_v3, %v4707_v29 }
 0x283   :  { %1582 = vmatpush.msra.mxu2 %v4590_v60  ;;  %1625 = vmatpush.msra.mxu3 %v1624_v20  ;;  %v6425_v20 = vand.u32 4294901760, %v4667_v26  ;;  %v4737_v23 = vand.u32 4294901760, %v3416_v32  ;;  %v4751_v54 = vsub.f32 %v3418_v36, %v4722_v35 }
 0x284   :  { %1267 = vmatpush.msrb.mxu0 %v4528_v14  ;;  %1549 = vmatpush.msra.mxu1 %v4354_v30  ;;  %v1642_v30 = vand.u32 4294901760, %v1641_v7 }
 0x285   :  { %1584 = vmatpush.msra.mxu2 %v4609_v59  ;;  %1631 = vmatpush.msra.mxu3 %v1630_v37  ;;  %v1653_v27 = vsub.f32 %v4667_v26, %v6425_v20  ;;  %v1648_v37 = vand.u32 4294901760, %v1647_v24  ;;  %v3412_v20 = vld [vmem:[%s6258_s3 + $0x328] sm:$0xff]  ;;  %v6426_v26 = vand.u32 4294901760, %v4339_v22  ;;  %v6428_v22 = vand.u32 4294901760, %v4352_v63 }
 0x286   :  { %1269 = vmatpush.msrb.mxu0 %v4540_v13  ;;  %1551 = vmatpush.msra.mxu1 %v4365_v49  ;;  %v6427_v49 = vand.u32 4294901760, %v4689_v21  ;;  %v4764_v36 = vsub.f32 %v3416_v32, %v4737_v23  ;;  %v4766_v7 = vand.u32 4294901760, %v3412_v20  ;;  %v6430_v63 = vand.u32 4294901760, %v4363_v12 }
 0x287   :  { %1275 = vmatmul.f32.vlgmr.msrb.gmra.mxu0 %v4284_v18  ;;  %1586 = vmatpush.msra.mxu2 %v4620_v47  ;;  %v4753_v18 = vand.u32 4294901760, %v3414_v51  ;;  %v1654_v24 = vand.u32 4294901760, %v1653_v27 }
 0x288   :  { %1476 = vmatpush.msra.mxu0 %v6426_v26  ;;  %1637 = vmatpush.msra.mxu3 %v1636_v39  ;;  %v1659_v3 = vsub.f32 %v4689_v21, %v6427_v49  ;;  %v6429_v26 = vand.u32 4294901760, %v4705_v15  ;;  %v1676_v49 = vand.u32 4294901760, %v4735_v62 }
 0x289   :  { %1553 = vmatpush.msra.mxu1 %v4384_v52  ;;  %1588 = vmatpush.msra.mxu2 %v4627_v6  ;;  %v3410_v52 = vld [vmem:[%s6258_s3 + $0x318] sm:$0xff] }
 0x28a   :  { %1480 = vmatpush.msra.mxu0 %v6428_v22  ;;  %1643 = vmatpush.msra.mxu3 %v1642_v30  ;;  %v1665_v39 = vsub.f32 %v4705_v15, %v6429_v26  ;;  %v1660_v27 = vand.u32 4294901760, %v1659_v3  ;;  %v6431_v30 = vand.u32 4294901760, %v4720_v61  ;;  %v1682_v22 = vand.u32 4294901760, %v4751_v54 }
 0x28b   :  { %1555 = vmatpush.msra.mxu1 %v4399_v31  ;;  %1590 = vmatpush.msra.mxu2 %v4636_v33  ;;  %v4780_v26 = vsub.f32 %v3414_v51, %v4753_v18  ;;  %v3408_v31 = vld [vmem:[%s6258_s3 + $0x308] sm:$0xff]  ;;  %v4787_v12 = vand.u32 4294901760, %v3410_v52  ;;  %v1677_v51 = vsub.f32 %v4735_v62, %v1676_v49 }
 0x28c   :  { %1484 = vmatpush.msra.mxu0 %v6430_v63  ;;  %1649 = vmatpush.msra.mxu3 %v1648_v37  ;;  %v1671_v32 = vsub.f32 %v4720_v61, %v6431_v30  ;;  %v6432_v37 = vand.u32 4294901760, %v4380_v19  ;;  %v1666_v3 = vand.u32 4294901760, %v1665_v39  ;;  %v1688_v63 = vand.u32 4294901760, %v4764_v36 }
 0x28d   :  { %1557 = vmatpush.msra.mxu1 %v4410_v43  ;;  %1592 = vmatpush.msra.mxu2 %v4659_v44  ;;  %v4796_v30 = vsub.f32 %v3412_v20, %v4766_v7  ;;  %v4800_v43 = vand.u32 4294901760, %v3408_v31  ;;  %v6433_v19 = vand.u32 4294901760, %v4397_v45  ;;  %v1683_v39 = vsub.f32 %v4751_v54, %v1682_v22 }
 0x28e   :  { %1488 = vmatpush.msra.mxu0 %v6432_v37  ;;  %1655 = vmatpush.msra.mxu3 %v1654_v24  ;;  %v1672_v24 = vand.u32 4294901760, %v1671_v32  ;;  %v1694_v37 = vand.u32 4294901760, %v4780_v26  ;;  %v6434_v20 = vand.u32 4294901760, %v4418_v0  ;;  %v1678_v45 = vand.u32 4294901760, %v1677_v51 }
 0x28f   :  { %1559 = vmatpush.msra.mxu1 %v4435_v17  ;;  %1594 = vmatpush.msra.mxu2 %v4675_v8  ;;  %v4811_v17 = vsub.f32 %v3410_v52, %v4787_v12  ;;  %v1700_v32 = vand.u32 4294901760, %v4796_v30  ;;  %v6435_v52 = vand.u32 4294901760, %v4428_v2  ;;  %v1684_v0 = vand.u32 4294901760, %v1683_v39 }
 0x290   :  { %1492 = vmatpush.msra.mxu0 %v6433_v19  ;;  %1661 = vmatpush.msra.mxu3 %v1660_v27  ;;  %v1689_v27 = vsub.f32 %v4764_v36, %v1688_v63  ;;  %v6436_v51 = vand.u32 4294901760, %v4444_v57  ;;  %v6438_v39 = vand.u32 4294901760, %v4481_v58 }
 0x291   :  { %1561 = vmatpush.msra.mxu1 %v4452_v50  ;;  %1596 = vmatpush.msra.mxu2 %v4691_v53  ;;  %v4822_v50 = vsub.f32 %v3408_v31, %v4800_v43  ;;  %v1701_v2 = vsub.f32 %v4796_v30, %v1700_v32 }
 0x292   :  { %1496 = vmatpush.msra.mxu0 %v6434_v20  ;;  %1667 = vmatpush.msra.mxu3 %v1666_v3  ;;  %v1695_v3 = vsub.f32 %v4780_v26, %v1694_v37  ;;  %v1690_v31 = vand.u32 4294901760, %v1689_v27  ;;  %v6440_v20 = vand.u32 4294901760, %v4511_v25  ;;  %v6443_v25 = vand.u32 4294901760, %v4538_v34  ;;  %v6448_v27 = vld [vmem:[#allocation21_spill] sm:$0xff] }
 0x293   :  { %1563 = vmatpush.msra.mxu1 %v4468_v9  ;;  %1598 = vmatpush.msra.mxu2 %v4707_v29  ;;  %v1706_v9 = vand.u32 4294901760, %v4811_v17  ;;  %v1712_v19 = vand.u32 4294901760, %v4822_v50  ;;  %v6447_v34 = vand.u32 4294901760, %v4560_v38  ;;  %v448_v38 = vld [vmem:[%s6258_s3 + $0xf0] sm:$0xff] }
 0x294   :  { %1500 = vmatpush.msra.mxu0 %v6435_v52  ;;  %1673 = vmatpush.msra.mxu3 %v1672_v24  ;;  %v1696_v24 = vand.u32 4294901760, %v1695_v3  ;;  %v6449_v52 = vand.u32 4294901760, %v6448_v27 }
 0x295   :  { %1565 = vmatpush.msra.mxu1 %v4483_v40  ;;  %1600 = vmatpush.msra.mxu2 %v4722_v35  ;;  %v6437_v40 = vand.u32 4294901760, %v4466_v42  ;;  %v1707_v57 = vsub.f32 %v4811_v17, %v1706_v9  ;;  %v1713_v42 = vsub.f32 %v4822_v50, %v1712_v19 }
 0x296   :  { %1504 = vmatpush.msra.mxu0 %v6436_v51  ;;  %1679 = vmatpush.msra.mxu3 %v1678_v45  ;;  %v6444_v45 = vand.u32 4294901760, %v4616_v48 }
 0x297   :  { %1567 = vmatpush.msra.mxu1 %v4498_v28  ;;  %1602 = vmatpush.msra.mxu2 %v4737_v23  ;;  %v1702_v28 = vand.u32 4294901760, %v1701_v2  ;;  %v1708_v58 = vand.u32 4294901760, %v1707_v57  ;;  %v6459_v57 = vld [vmem:[#allocation11_spill] sm:$0xff] }
 0x298   :  { %1508 = vmatpush.msra.mxu0 %v6437_v40  ;;  %1685 = vmatpush.msra.mxu3 %v1684_v0  ;;  %v6458_v40 = vand.u32 4294901760, %v4720_v61 }
 0x299   :  { %1569 = vmatpush.msra.mxu1 %v4513_v46  ;;  %1604 = vmatpush.msra.mxu2 %v4753_v18  ;;  %v6439_v46 = vand.u32 4294901760, %v4496_v1  ;;  %v6441_v1 = vand.u32 4294901760, %v4526_v56  ;;  %v6446_v56 = vand.u32 4294901760, %v4632_v55 }
 0x29a   :  { %1512 = vmatpush.msra.mxu0 %v6438_v39  ;;  %1691 = vmatpush.msra.mxu3 %v1690_v31  ;;  %v6457_v31 = vld [vmem:[#allocation5_spill] sm:$0xff] }
 0x29b   :  { %1571 = vmatpush.msra.mxu1 %v4528_v14  ;;  %1606 = vmatpush.msra.mxu2 %v4766_v7  ;;  %v1714_v14 = vand.u32 4294901760, %v1713_v42  ;;  %v6460_v39 = vld [vmem:[#allocation13_spill] sm:$0xff] }
 0x29c   :  { %1516 = vmatpush.msra.mxu0 %v6439_v46  ;;  %1697 = vmatpush.msra.mxu3 %v1696_v24  ;;  %v440_v24 = vld [vmem:[%s6258_s3 + $0xb0] sm:$0xff]  ;;  %v6461_v46 = vld [vmem:[#allocation7_spill] sm:$0xff] }
 0x29d   :  { %1573 = vmatpush.msra.mxu1 %v4540_v13  ;;  %1608 = vmatpush.msra.mxu2 %v4787_v12  ;;  %v6442_v13 = vand.u32 4294901760, %v4602_v11 }
 0x29e   :  { %1520 = vmatpush.msra.mxu0 %v6440_v20  ;;  %1703 = vmatpush.msra.mxu3 %v1702_v28  ;;  %v6462_v20 = vld [vmem:[#allocation15_spill] sm:$0xff] }
 0x29f   :  { %1575 = vmatmul.f32.vlgmr.msra.gmra.mxu1 %v4253_v4  ;;  %1610 = vmatpush.msra.mxu2 %v4800_v43 }
 0x2a0   :  { %1776 = vmatpush.msrb.mxu1 %v4582_v41  ;;  %1524 = vmatpush.msra.mxu0 %v6441_v1 }
 0x2a1   :  { %1709 = vmatpush.msra.mxu3 %v1708_v58  ;;  %1616 = vmatmul.f32.vlgmr.msra.gmra.mxu2 %v4293_v10  ;;  %v6445_v10 = vand.u32 4294901760, %v4550_v5 }
 0x2a2   :  { %1778 = vmatpush.msrb.mxu1 %v4590_v60  ;;  %1817 = vmatpush.msrb.mxu2 %v6442_v13  ;;  %v4959_v13 = vand.u32 4294901760, %v440_v24 }
 0x2a3   :  { %1528 = vmatpush.msra.mxu0 %v6443_v25  ;;  %1715 = vmatpush.msra.mxu3 %v1714_v14  ;;  %v438_v25 = vld [vmem:[%s6258_s3 + $0xa0] sm:$0xff] }
 0x2a4   :  { %1717 = vmatmul.f32.vlgmr.msra.gmra.mxu3 %v4255_v16  ;;  %1780 = vmatpush.msrb.mxu1 %v4609_v59 }
 0x2a5   :  { %1821 = vmatpush.msrb.mxu2 %v6444_v45  ;;  %1884 = vmatpush.msrb.mxu3 %v4582_v41  ;;  %v6450_v41 = vld [vmem:[#allocation22_spill] sm:$0xff] }
 0x2a6   :  { %1532 = vmatpush.msra.mxu0 %v6445_v10  ;;  %1782 = vmatpush.msrb.mxu1 %v4620_v47  ;;  %v6451_v5 = vand.u32 4294901760, %v6450_v41 }
 0x2a7   :  { %1825 = vmatpush.msrb.mxu2 %v6446_v56  ;;  %1886 = vmatpush.msrb.mxu3 %v4590_v60 }
 0x2a8   :  { %1536 = vmatpush.msra.mxu0 %v6447_v34  ;;  %1784 = vmatpush.msrb.mxu1 %v4627_v6  ;;  %v6464_v34 = vld [vmem:[#allocation9_spill] sm:$0xff] }
 0x2a9   :  { %1538 = vmatmul.f32.vlgmr.msra.gmra.mxu0 %v4253_v4  ;;  %1829 = vmatpush.msrb.mxu2 %v6449_v52  ;;  %v6452_v4 = vld [vmem:[#allocation23_spill] sm:$0xff] }
 0x2aa   :  { %1723 = vmatpush.msrb.mxu0 %v4602_v11  ;;  %1888 = vmatpush.msrb.mxu3 %v4609_v59  ;;  %v6453_v60 = vand.u32 4294901760, %v6452_v4  ;;  %v446_v59 = vld [vmem:[%s6258_s3 + $0xe0] sm:$0xff]  ;;  %v4906_v11 = vand.u32 4294901760, %v448_v38 }
 0x2ab   :  { %1786 = vmatpush.msrb.mxu1 %v4636_v33  ;;  %1833 = vmatpush.msrb.mxu2 %v6451_v5  ;;  %v4916_v0 = vand.u32 4294901760, %v446_v59 }
 0x2ac   :  { %1726 = vmatpush.msrb.mxu0 %v4616_v48  ;;  %1890 = vmatpush.msrb.mxu3 %v4620_v47  ;;  %v6454_v48 = vand.u32 4294901760, %v4689_v21  ;;  %v444_v47 = vld [vmem:[%s6258_s3 + $0xd0] sm:$0xff]  ;;  %v4927_v3 = vsub.f32 %v448_v38, %v4906_v11 }
 0x2ad   :  { %1788 = vmatpush.msrb.mxu1 %v4659_v44  ;;  %1837 = vmatpush.msrb.mxu2 %v6453_v60  ;;  %v4929_v51 = vand.u32 4294901760, %v444_v47  ;;  %v4944_v28 = vsub.f32 %v446_v59, %v4916_v0 }
 0x2ae   :  { %1729 = vmatpush.msrb.mxu0 %v4632_v55  ;;  %1892 = vmatpush.msrb.mxu3 %v4627_v6  ;;  %v6455_v6 = vand.u32 4294901760, %v4705_v15  ;;  %v442_v55 = vld [vmem:[%s6258_s3 + $0xc0] sm:$0xff] }
 0x2af   :  { %1790 = vmatpush.msrb.mxu1 %v4675_v8  ;;  %1841 = vmatpush.msrb.mxu2 %v6454_v48  ;;  %v4946_v42 = vand.u32 4294901760, %v442_v55  ;;  %v4957_v1 = vsub.f32 %v444_v47, %v4929_v51  ;;  %v6339_v10 = vand.u32 4294901760, %v4944_v28 }
 0x2b0   :  { %1732 = vmatpush.msrb.mxu0 %v6448_v27  ;;  %1894 = vmatpush.msrb.mxu3 %v4636_v33  ;;  %v6456_v33 = vld [vmem:[#allocation3_spill] sm:$0xff] }
 0x2b1   :  { %1792 = vmatpush.msrb.mxu1 %v4691_v53  ;;  %1845 = vmatpush.msrb.mxu2 %v6455_v6  ;;  %v335_v2 = vadd.f32 %v6457_v31, %v6456_v33  ;;  %v4975_v56 = vsub.f32 %v442_v55, %v4946_v42  ;;  %v6338_v52 = vand.u32 4294901760, %v4957_v1  ;;  %v462_v31 = vld [vmem:[%s6258_s3 + $0x160] sm:$0xff] }
 0x2b2   :  { %1735 = vmatpush.msrb.mxu0 %v6450_v41  ;;  %1896 = vmatpush.msrb.mxu3 %v4659_v44  ;;  %v353_v44 = vadd.f32 %v6460_v39, %v6459_v57  ;;  %v4993_v41 = vsub.f32 %v440_v24, %v4959_v13  ;;  %v6465_v24 = vld [vmem:[#allocation20_spill] sm:$0xff] }
 0x2b3   :  { %1794 = vmatpush.msrb.mxu1 %v4707_v29  ;;  %1849 = vmatpush.msrb.mxu2 %v6458_v40  ;;  %v336_v58 = vadd.f32 %v335_v2, %v6461_v46  ;;  %v1984_v59 = vsub.f32 %v4957_v1, %v6338_v52  ;;  %v428_v40 = vld [vmem:[%s6258_s3 + $0x50] sm:$0xff] }
 0x2b4   :  { %1738 = vmatpush.msrb.mxu0 %v6452_v4  ;;  %1898 = vmatpush.msrb.mxu3 %v4675_v8  ;;  %v354_v14 = vadd.f32 %v353_v44, %v6462_v20  ;;  %v6340_v8 = vand.u32 4294901760, %v4927_v3  ;;  %v432_v4 = vld [vmem:[%s6258_s3 + $0x70] sm:$0xff]  ;;  %v6336_v48 = vand.u32 4294901760, %v4993_v41  ;;  %v6475_v20 = vld [vmem:[#allocation18_spill] sm:$0xff] }
 0x2b5   :  { %1796 = vmatpush.msrb.mxu1 %v4722_v35  ;;  %1853 = vmatpush.msrb.mxu2 %v1676_v49  ;;  %v6463_v49 = vld [vmem:[#allocation17_spill] sm:$0xff]  ;;  %v337_v27 = vadd.f32 %v336_v58, %v6464_v34  ;;  %v1985_v58 = vand.u32 4294901760, %v1984_v59 }
 0x2b6   :  { %1741 = vmatpush.msrb.mxu0 %v4689_v21  ;;  %1900 = vmatpush.msrb.mxu3 %v4691_v53  ;;  %v436_v53 = vld [vmem:[%s6258_s3 + $0x90] sm:$0xff]  ;;  %v3507_v21 = vmov 32.0   ;;  %v355_v45 = vadd.f32 %v354_v14, %v6463_v49  ;;  %v1996_v14 = vsub.f32 %v4993_v41, %v6336_v48 }
 0x2b7   :  { %1798 = vmatpush.msrb.mxu1 %v4737_v23  ;;  %1857 = vmatpush.msrb.mxu2 %v1682_v22  ;;  %3478 = vrcp.f32 %v3507_v21  ;;  %v4981_v22 = vand.u32 4294901760, %v438_v25  ;;  %v338_v60 = vrot.slane %v337_v27, 4  ;;  %v5067_v21 = vand.u32 4294901760, %v428_v40 }
 0x2b8   :  { %1744 = vmatpush.msrb.mxu0 %v4705_v15  ;;  %1902 = vmatpush.msrb.mxu3 %v4707_v29  ;;  %v434_v15 = vld [vmem:[%s6258_s3 + $0x80] sm:$0xff]  ;;  %v1972_v29 = vsub.f32 %v4927_v3, %v6340_v8  ;;  %v356_v5 = vrot.slane %v355_v45, 4  ;;  %v6471_v8 = vld [vmem:[#allocation8_spill] sm:$0xff] }
 0x2b9   :  { %1800 = vmatpush.msrb.mxu1 %v4753_v18  ;;  %1861 = vmatpush.msrb.mxu2 %v1688_v63  ;;  %v4995_v63 = vand.u32 4294901760, %v436_v53  ;;  %v5006_v38 = vand.u32 4294901760, %v434_v15  ;;  %v339_v44 = vadd.f32 %v338_v60, %v337_v27  ;;  %v1997_v60 = vand.u32 4294901760, %v1996_v14 }
 0x2ba   :  { %1747 = vmatpush.msrb.mxu0 %v4720_v61  ;;  %1904 = vmatpush.msrb.mxu3 %v4722_v35  ;;  %v1978_v35 = vsub.f32 %v4944_v28, %v6339_v10  ;;  %v6337_v61 = vand.u32 4294901760, %v4975_v56  ;;  %v5095_v59 = vsub.f32 %v428_v40, %v5067_v21 }
 0x2bb   :  { %1802 = vmatpush.msrb.mxu1 %v4766_v7  ;;  %1865 = vmatpush.msrb.mxu2 %v1694_v37  ;;  %v1973_v37 = vand.u32 4294901760, %v1972_v29  ;;  %v5026_v47 = vsub.f32 %v436_v53, %v4995_v63  ;;  %v5042_v2 = vsub.f32 %v434_v15, %v5006_v38  ;;  %v426_v53 = vld [vmem:[%s6258_s3 + $0x40] sm:$0xff]  ;;  %v424_v15 = vld [vmem:[%s6258_s3 + $0x30] sm:$0xff] }
 0x2bc   :  { %1750 = vmatpush.msrb.mxu0 %v4735_v62  ;;  %1906 = vmatpush.msrb.mxu3 %v4737_v23  ;;  %v5015_v23 = vsub.f32 %v438_v25, %v4981_v22  ;;  %v1979_v6 = vand.u32 4294901760, %v1978_v35  ;;  %v1990_v55 = vsub.f32 %v4975_v56, %v6337_v61 }
 0x2bd   :  { %1804 = vmatpush.msrb.mxu1 %v4787_v12  ;;  %1869 = vmatpush.msrb.mxu2 %v1700_v32  ;;  %v5017_v62 = vpop.eup %3478  ;;  %v430_v32 = vld [vmem:[%s6258_s3 + $0x60] sm:$0xff]  ;;  %v6333_v25 = vand.u32 4294901760, %v5026_v47  ;;  %v6332_v27 = vand.u32 4294901760, %v5042_v2 }
 0x2be   :  { %1753 = vmatpush.msrb.mxu0 %v4751_v54  ;;  %1908 = vmatpush.msrb.mxu3 %v4753_v18  ;;  %v5034_v54 = vand.u32 4294901760, %v432_v4  ;;  %v357_v18 = vadd.f32 %v356_v5, %v355_v45  ;;  %v1991_v45 = vand.u32 4294901760, %v1990_v55  ;;  %v5082_v5 = vand.u32 4294901760, %v426_v53  ;;  %v420_v55 = vld [vmem:[%s6258_s3 + $0x10] sm:$0xff] }
 0x2bf   :  { %1806 = vmatpush.msrb.mxu1 %v4800_v43  ;;  %1873 = vmatpush.msrb.mxu2 %v1706_v9  ;;  %v372_v9 = vmul.f32 32.0, %v5017_v62  ;;  %vm376_vm2 = vweird.f32 %v5017_v62 }
 0x2c0   :  { %1756 = vmatpush.msrb.mxu0 %v4764_v36  ;;  %1910 = vmatpush.msrb.mxu3 %v4766_v7  ;;  %v6334_v7 = vand.u32 4294901760, %v5015_v23  ;;  %v5052_v36 = vand.u32 4294901760, %v430_v32 }
 0x2c1   :  { %1810 = vmatmul.f32.vlgmr.msrb.gmra.mxu1 %v6465_v24  ;;  %1877 = vmatpush.msrb.mxu2 %v1712_v19  ;;  %v5065_v19 = vsub.f32 %v432_v4, %v5034_v54  ;;  %v373_v35 = vsub.f32 1.0, %v372_v9  ;;  %v340_v4 = vrot.slane %v339_v44, 2  ;;  %v6466_v24 = vld [vmem:[#allocation4_spill] sm:$0xff] }
 0x2c2   :  { %1974 = vmatpush.msra.mxu1 %v1973_v37  ;;  %1759 = vmatpush.msrb.mxu0 %v4780_v26  ;;  %v358_v26 = vrot.slane %v357_v18, 2  ;;  %v5080_v29 = vsub.f32 %v430_v32, %v5052_v36 }
 0x2c3   :  { %1912 = vmatpush.msrb.mxu3 %v4787_v12  ;;  %1879 = vmatmul.f32.vlgmr.msrb.gmra.mxu2 %v4255_v16  ;;  %v2002_v12 = vsub.f32 %v5015_v23, %v6334_v7  ;;  %v6335_v37 = vand.u32 4294901760, %v5065_v19 }
 0x2c4   :  { %1980 = vmatpush.msra.mxu1 %v1979_v6  ;;  %2072 = vmatpush.msra.mxu2 %v4927_v3  ;;  %v359_v32 = vadd.f32 %v358_v26, %v357_v18  ;;  %v2014_v6 = vsub.f32 %v5042_v2, %v6332_v27  ;;  %v6341_v9 = vand.u32 4294901760, %v5080_v29  ;;  %v5110_v18 = vsub.f32 %v426_v53, %v5082_v5 }
 0x2c5   :  { %1762 = vmatpush.msrb.mxu0 %v4796_v30  ;;  %1914 = vmatpush.msrb.mxu3 %v4800_v43  ;;  %v2008_v30 = vsub.f32 %v5026_v47, %v6333_v25  ;;  %v422_v43 = vld [vmem:[%s6258_s3 + $0x20] sm:$0xff]  ;;  %v2003_v40 = vand.u32 4294901760, %v2002_v12  ;;  %v374_v26 = vmul.f32 %v5017_v62, %v373_v35  ;;  %v2020_v53 = vsub.f32 %v5065_v19, %v6335_v37  ;;  %v6469_v35 = vld [vmem:[#allocation12_spill] sm:$0xff] }
 0x2c6   :  { %1916 = vmatmul.f32.vlgmr.msrb.gmra.mxu3 %v4255_v16  ;;  %1986 = vmatpush.msra.mxu1 %v1985_v58  ;;  %v5097_v16 = vand.u32 4294901760, %v424_v15  ;;  %v6467_v58 = vld [vmem:[#allocation6_spill] sm:$0xff]  ;;  %v6468_v25 = vld [vmem:[#allocation19_spill] sm:$0xff] }
 0x2c7   :  { %2075 = vmatpush.msra.mxu2 %v4944_v28  ;;  %2125 = vmatpush.msra.mxu3 %v4906_v11  ;;  %v344_v14 = vadd.f32 %v6467_v58, %v6466_v24  ;;  %v2009_v27 = vand.u32 4294901760, %v2008_v30  ;;  %v418_v12 = vld [vmem:[%s6258_s3] sm:$0xff]  ;;  %v360_v30 = vrot.slane %v359_v32, 1  ;;  %v375_v52 = vadd.f32 %v5017_v62, %v374_v26 }
 0x2c8   :  { %1765 = vmatpush.msrb.mxu0 %v4811_v17  ;;  %1992 = vmatpush.msra.mxu1 %v1991_v45  ;;  %v5112_v17 = vand.u32 4294901760, %v422_v43  ;;  %v341_v45 = vadd.f32 %v340_v4, %v339_v44  ;;  %v5128_v44 = vsub.f32 %v424_v15, %v5097_v16  ;;  %v6470_v4 = vld [vmem:[#allocation14_spill] sm:$0xff]  ;;  %v2026_v15 = vsub.f32 %v5080_v29, %v6341_v9 }
 0x2c9   :  { %2078 = vmatpush.msra.mxu2 %v4957_v1  ;;  %2127 = vmatpush.msra.mxu3 %v4916_v0  ;;  %v5145_v61 = vand.u32 4294901760, %v418_v12  ;;  %v345_v7 = vadd.f32 %v344_v14, %v6471_v8  ;;  %v2021_v9 = vand.u32 4294901760, %v2020_v53  ;;  %v361_v14 = vadd.f32 %v360_v30, %v359_v32  ;;  %v466_v8 = vld [vmem:[%s6258_s3 + $0x180] sm:$0xff] }
 0x2ca   :  { %1768 = vmatpush.msrb.mxu0 %v4822_v50  ;;  %1998 = vmatpush.msra.mxu1 %v1997_v60  ;;  %v5130_v50 = vand.u32 4294901760, %v420_v55  ;;  %v362_v60 = vadd.f32 %v6470_v4, %v6469_v35  ;;  %v5143_v48 = vsub.f32 %v422_v43, %v5112_v17  ;;  %v342_v10 = vrot.slane %v341_v45, 1  ;;  %v470_v35 = vld [vmem:[%s6258_s3 + $0x1a0] sm:$0xff] }
 0x2cb   :  { %1771 = vmatmul.f32.vlgmr.msrb.gmra.mxu0 %v6468_v25  ;;  %2081 = vmatpush.msra.mxu2 %v4975_v56  ;;  %v2015_v25 = vand.u32 4294901760, %v2014_v6  ;;  %v6472_v6 = vld [vmem:[#allocation16_spill] sm:$0xff]  ;;  %v6473_v43 = vand.u32 4294901760, %v5095_v59  ;;  %v6476_v53 = vand.u32 4294901760, %v5110_v18  ;;  %v5174_v32 = vsel %vm376_vm2, %v5017_v62, %v375_v52 }
 0x2cc   :  { %1929 = vmatpush.msra.mxu0 %v4906_v11  ;;  %2129 = vmatpush.msra.mxu3 %v4929_v51  ;;  %v5158_v26 = vsub.f32 %v420_v55, %v5130_v50  ;;  %v6342_v49 = vand.u32 4294901760, %v5143_v48  ;;  %v5169_v55 = vsub.f32 %v418_v12, %v5145_v61  ;;  %v343_v30 = vadd.f32 %v342_v10, %v341_v45 }
 0x2cd   :  { %2004 = vmatpush.msra.mxu1 %v2003_v40  ;;  %2084 = vmatpush.msra.mxu2 %v4993_v41  ;;  %v363_v40 = vadd.f32 %v362_v60, %v6472_v6  ;;  %v2032_v37 = vsub.f32 %v5095_v59, %v6473_v43  ;;  %v2038_v43 = vsub.f32 %v5110_v18, %v6476_v53  ;;  %v6479_v53 = vand.u32 4294901760, %v5128_v44 }
 0x2ce   :  { %1931 = vmatpush.msra.mxu0 %v4916_v0  ;;  %2131 = vmatpush.msra.mxu3 %v4946_v42  ;;  %6474 = vst [vmem:[#allocation21_spill] sm:$0xff] %v5158_v26  ;;  %v380_v45 = vmul.f32 %v5174_v32, %v361_v14  ;;  %v378_v14 = vmul.f32 %v5174_v32, %v343_v30  ;;  %v6481_v4 = vand.u32 4294901760, %v5169_v55 }
 0x2cf   :  { %2010 = vmatpush.msra.mxu1 %v2009_v27  ;;  %2087 = vmatpush.msra.mxu2 %v5015_v23  ;;  %v364_v60 = vadd.f32 %v363_v40, %v6475_v20  ;;  %v2027_v27 = vand.u32 4294901760, %v2026_v15  ;;  %6477 = vst [vmem:[#allocation22_spill] sm:$0xff] %v5169_v55  ;;  %v6478_v15 = vld [vmem:[#allocation10_spill] sm:$0xff]  ;;  %v2033_v12 = vand.u32 4294901760, %v2032_v37  ;;  %v2044_v52 = vsub.f32 %v5128_v44, %v6479_v53  ;;  %v476_v53 = vld [vmem:[%s6258_s3 + $0x1d0] sm:$0xff] }
 0x2d0   :  { %1933 = vmatpush.msra.mxu0 %v4929_v51  ;;  %2133 = vmatpush.msra.mxu3 %v4959_v13  ;;  %v346_v40 = vadd.f32 %v345_v7, %v6478_v15  ;;  %v478_v7 = vld [vmem:[%s6258_s3 + $0x1e0] sm:$0xff]  ;;  %v2039_v37 = vand.u32 4294901760, %v2038_v43  ;;  %v6480_v43 = vand.u32 4294901760, %v5158_v26  ;;  %v1924_v30 = vsel %vm551_vm1, %v380_v45, %v378_v14 }
 0x2d1   :  { %2016 = vmatpush.msra.mxu1 %v2015_v25  ;;  %2090 = vmatpush.msra.mxu2 %v5026_v47  ;;  %v480_v25 = vld [vmem:[%s6258_s3 + $0x1f0] sm:$0xff]  ;;  %v365_v62 = vrot.slane %v364_v60, 4  ;;  %v474_v45 = vld [vmem:[%s6258_s3 + $0x1c0] sm:$0xff]  ;;  %v5259_v15 = vand.u32 4294901760, %v470_v35 }
 0x2d2   :  { %1935 = vmatpush.msra.mxu0 %v4946_v42  ;;  %2135 = vmatpush.msra.mxu3 %v4981_v22  ;;  %v5198_v10 = vand.u32 4294901760, %v480_v25  ;;  %v347_v20 = vrot.slane %v346_v40, 4  ;;  %v2056_v6 = vsub.f32 %v5158_v26, %v6480_v43  ;;  %v2062_v43 = vsub.f32 %v5169_v55, %v6481_v4 }
 0x2d3   :  { %2022 = vmatpush.msra.mxu1 %v2021_v9  ;;  %2093 = vmatpush.msra.mxu2 %v5042_v2  ;;  %v2050_v9 = vsub.f32 %v5143_v48, %v6342_v49  ;;  %v5207_v49 = vand.u32 4294901760, %v478_v7  ;;  %v5240_v14 = vand.u32 4294901760, %v474_v45  ;;  %v5293_v46 = vsub.f32 %v470_v35, %v5259_v15 }
 0x2d4   :  { %1937 = vmatpush.msra.mxu0 %v4959_v13  ;;  %2137 = vmatpush.msra.mxu3 %v4995_v63  ;;  %v5220_v39 = vsub.f32 %v480_v25, %v5198_v10  ;;  %v2057_v4 = vand.u32 4294901760, %v2056_v6  ;;  %v468_v6 = vld [vmem:[%s6258_s3 + $0x190] sm:$0xff] }
 0x2d5   :  { %2028 = vmatpush.msra.mxu1 %v2027_v27  ;;  %2096 = vmatpush.msra.mxu2 %v5065_v19  ;;  %v2045_v27 = vand.u32 4294901760, %v2044_v52  ;;  %v2051_v52 = vand.u32 4294901760, %v2050_v9  ;;  %v5232_v9 = vand.u32 4294901760, %v1924_v30  ;;  %v5236_v25 = vsub.f32 %v478_v7, %v5207_v49 }
 0x2d6   :  { %1939 = vmatpush.msra.mxu0 %v4981_v22  ;;  %2139 = vmatpush.msra.mxu3 %v5006_v38 }
 0x2d7   :  { %2034 = vmatpush.msra.mxu1 %v2033_v12  ;;  %2099 = vmatpush.msra.mxu2 %v5080_v29  ;;  %v366_v12 = vadd.f32 %v365_v62, %v364_v60  ;;  %v5227_v60 = vand.u32 4294901760, %v476_v53  ;;  %v472_v62 = vld [vmem:[%s6258_s3 + $0x1b0] sm:$0xff]  ;;  %6482 = vst [vmem:[#allocation23_spill] sm:$0xff] %v5236_v25 }
 0x2d8   :  { %1941 = vmatpush.msra.mxu0 %v4995_v63  ;;  %2141 = vmatpush.msra.mxu3 %v5034_v54 }
 0x2d9   :  { %2040 = vmatpush.msra.mxu1 %v2039_v37  ;;  %2102 = vmatpush.msra.mxu2 %v5095_v59  ;;  %v348_v37 = vadd.f32 %v347_v20, %v346_v40  ;;  %v367_v20 = vrot.slane %v366_v12, 2  ;;  %v2063_v40 = vand.u32 4294901760, %v2062_v43  ;;  %v5252_v7 = vsub.f32 %v476_v53, %v5227_v60 }
 0x2da   :  { %1943 = vmatpush.msra.mxu0 %v5006_v38  ;;  %2143 = vmatpush.msra.mxu3 %v5052_v36  ;;  %v5267_v53 = vsub.f32 %v474_v45, %v5240_v14  ;;  %v5282_v45 = vand.u32 4294901760, %v468_v6 }
 0x2db   :  { %2046 = vmatpush.msra.mxu1 %v2045_v27  ;;  %2105 = vmatpush.msra.mxu2 %v5110_v18  ;;  %v5247_v27 = vand.u32 4294901760, %v472_v62  ;;  %6483 = vst [vmem:[#allocation20_spill] sm:$0xff] %v5252_v7  ;;  %v349_v57 = vrot.slane %v348_v37, 2 }
 0x2dc   :  { %1945 = vmatpush.msra.mxu0 %v5034_v54  ;;  %2145 = vmatpush.msra.mxu3 %v5067_v21  ;;  %v5315_v24 = vsub.f32 %v468_v6, %v5282_v45  ;;  %v6490_v6 = vand.u32 4294901760, %v5267_v53 }
 0x2dd   :  { %2052 = vmatpush.msra.mxu1 %v2051_v52  ;;  %2108 = vmatpush.msra.mxu2 %v5128_v44  ;;  %v5256_v52 = vsub.f32 %v1924_v30, %v5232_v9  ;;  %v6485_v30 = vand.u32 4294901760, %v5220_v39  ;;  %v5274_v34 = vsub.f32 %v472_v62, %v5247_v27 }
 0x2de   :  { %1947 = vmatpush.msra.mxu0 %v5052_v36  ;;  %2147 = vmatpush.msra.mxu3 %v5082_v5 }
 0x2df   :  { %2058 = vmatpush.msra.mxu1 %v2057_v4  ;;  %2111 = vmatpush.msra.mxu2 %v5143_v48  ;;  %6484 = vst [vmem:[#allocation19_spill] sm:$0xff] %v5256_v52  ;;  %v368_v4 = vadd.f32 %v367_v20, %v366_v12  ;;  %v2313_v43 = vsub.f32 %v5220_v39, %v6485_v30  ;;  %v5287_v62 = vand.u32 4294901760, %v5256_v52  ;;  %v464_v12 = vld [vmem:[%s6258_s3 + $0x170] sm:$0xff] }
 0x2e0   :  { %1949 = vmatpush.msra.mxu0 %v5067_v21  ;;  %2149 = vmatpush.msra.mxu3 %v5097_v16  ;;  %6486 = vst [vmem:[#allocation24_spill] sm:$0xff] %v5274_v34  ;;  %v350_v20 = vadd.f32 %v349_v57, %v348_v37  ;;  %v5301_v37 = vand.u32 4294901760, %v466_v8  ;;  %v5317_v33 = vand.u32 4294901760, %v464_v12 }
 0x2e1   :  { %2064 = vmatpush.msra.mxu1 %v2063_v40  ;;  %2114 = vmatpush.msra.mxu2 %v5158_v26  ;;  %6487 = vst [vmem:[#allocation25_spill] sm:$0xff] %v5287_v62  ;;  %v6488_v40 = vand.u32 4294901760, %v5236_v25  ;;  %v369_v58 = vrot.slane %v368_v4, 1 }
 0x2e2   :  { %1951 = vmatpush.msra.mxu0 %v5082_v5  ;;  %2151 = vmatpush.msra.mxu3 %v5112_v17  ;;  %v5333_v26 = vsub.f32 %v466_v8, %v5301_v37 }
 0x2e3   :  { %2066 = vmatmul.f32.vlgmr.msra.gmra.mxu1 %v5232_v9  ;;  %2117 = vmatpush.msra.mxu2 %v5169_v55  ;;  %v2319_v30 = vsub.f32 %v5236_v25, %v6488_v40  ;;  %v2314_v40 = vand.u32 4294901760, %v2313_v43  ;;  %v351_v43 = vrot.slane %v350_v20, 1  ;;  %v6491_v55 = vand.u32 4294901760, %v5274_v34 }
 0x2e4   :  { %2233 = vmatpush.msrb.mxu1 %v4906_v11  ;;  %1953 = vmatpush.msra.mxu0 %v5097_v16  ;;  %v6489_v11 = vand.u32 4294901760, %v5252_v7 }
 0x2e5   :  { %2153 = vmatpush.msra.mxu3 %v5130_v50  ;;  %2120 = vmatmul.f32.vlgmr.msra.gmra.mxu2 %v5256_v52  ;;  %v2320_v35 = vand.u32 4294901760, %v2319_v30  ;;  %v5335_v30 = vand.u32 4294901760, %v462_v31  ;;  %v2337_v25 = vsub.f32 %v5274_v34, %v6491_v55 }
 0x2e6   :  { %2235 = vmatpush.msrb.mxu1 %v4916_v0  ;;  %2270 = vmatpush.msrb.mxu2 %v5198_v10  ;;  %v2325_v57 = vsub.f32 %v5252_v7, %v6489_v11  ;;  %v1963_v0 = vsub.f32 %v5256_v52, %v5287_v62  ;;  %v460_v11 = vld [vmem:[%s6258_s3 + $0x150] sm:$0xff]  ;;  %v2331_v7 = vsub.f32 %v5267_v53, %v6490_v6  ;;  %v6353_v6 = vand.u32 4294901760, %v5315_v24 }
 0x2e7   :  { %1955 = vmatpush.msra.mxu0 %v5112_v17  ;;  %2155 = vmatpush.msra.mxu3 %v5145_v61  ;;  %v370_v52 = vadd.f32 %v369_v58, %v368_v4  ;;  %v5348_v58 = vsub.f32 %v464_v12, %v5317_v33  ;;  %v5350_v4 = vand.u32 4294901760, %v460_v11 }
 0x2e8   :  { %2159 = vmatmul.f32.vlgmr.msra.gmra.mxu3 %v5287_v62  ;;  %2237 = vmatpush.msrb.mxu1 %v4929_v51  ;;  %v458_v51 = vld [vmem:[%s6258_s3 + $0x140] sm:$0xff]  ;;  %v2326_v8 = vand.u32 4294901760, %v2325_v57  ;;  %v5353_v55 = vand.u32 4294901760, %v1963_v0  ;;  %v6493_v62 = vand.u32 4294901760, %v5293_v46  ;;  %v2332_v12 = vand.u32 4294901760, %v2331_v7 }
 0x2e9   :  { %2272 = vmatpush.msrb.mxu2 %v5207_v49  ;;  %2315 = vmatpush.msrb.mxu3 %v2314_v40  ;;  %v352_v40 = vadd.f32 %v351_v43, %v350_v20  ;;  %v5365_v57 = vsub.f32 %v462_v31, %v5335_v30  ;;  %v381_v43 = vmul.f32 %v5174_v32, %v370_v52  ;;  %v454_v0 = vld [vmem:[%s6258_s3 + $0x120] sm:$0xff] }
 0x2ea   :  { %1957 = vmatpush.msra.mxu0 %v5130_v50  ;;  %2239 = vmatpush.msrb.mxu1 %v4946_v42  ;;  %6492 = vst [vmem:[#allocation26_spill] sm:$0xff] %v5353_v55  ;;  %v2343_v34 = vsub.f32 %v5293_v46, %v6493_v62  ;;  %v456_v42 = vld [vmem:[%s6258_s3 + $0x130] sm:$0xff]  ;;  %v2338_v62 = vand.u32 4294901760, %v2337_v25  ;;  %v2349_v31 = vsub.f32 %v5315_v24, %v6353_v6 }
 0x2eb   :  { %2274 = vmatpush.msrb.mxu2 %v5227_v60  ;;  %2321 = vmatpush.msrb.mxu3 %v2320_v35  ;;  %v5367_v35 = vand.u32 4294901760, %v458_v51  ;;  %v5382_v52 = vsub.f32 %v460_v11, %v5350_v4  ;;  %v5384_v20 = vand.u32 4294901760, %v456_v42  ;;  %v379_v25 = vmul.f32 %v5174_v32, %v352_v40 }
 0x2ec   :  { %1959 = vmatpush.msra.mxu0 %v5145_v61  ;;  %2241 = vmatpush.msrb.mxu1 %v4959_v13  ;;  %v6494_v13 = vand.u32 4294901760, %v4927_v3  ;;  %v2344_v3 = vand.u32 4294901760, %v2343_v34  ;;  %v2366_v11 = vand.u32 4294901760, %v5365_v57  ;;  %v6497_v34 = vand.u32 4294901760, %v4957_v1 }
 0x2ed   :  { %1965 = vmatmul.f32.vlgmr.msra.gmra.mxu0 %v5353_v55  ;;  %2276 = vmatpush.msrb.mxu2 %v5240_v14  ;;  %v5396_v7 = vsub.f32 %v458_v51, %v5367_v35  ;;  %v5398_v55 = vand.u32 4294901760, %v454_v0  ;;  %v2350_v32 = vand.u32 4294901760, %v2349_v31  ;;  %v6498_v51 = vand.u32 4294901760, %v5348_v58 }
 0x2ee   :  { %2166 = vmatpush.msrb.mxu0 %v6494_v13  ;;  %2327 = vmatpush.msrb.mxu3 %v2326_v8  ;;  %v6495_v8 = vand.u32 4294901760, %v4944_v28  ;;  %v6496_v13 = vand.u32 4294901760, %v5333_v26  ;;  %v1925_v28 = vsel %vm551_vm1, %v381_v43, %v379_v25  ;;  %v6499_v43 = vand.u32 4294901760, %v4975_v56 }
 0x2ef   :  { %2243 = vmatpush.msrb.mxu1 %v4981_v22  ;;  %2278 = vmatpush.msrb.mxu2 %v5247_v27  ;;  %v452_v22 = vld [vmem:[%s6258_s3 + $0x110] sm:$0xff]  ;;  %v2361_v40 = vsub.f32 %v5348_v58, %v6498_v51  ;;  %v2378_v31 = vand.u32 4294901760, %v5396_v7  ;;  %v5429_v25 = vsub.f32 %v454_v0, %v5398_v55  ;;  %v6500_v56 = vand.u32 4294901760, %v4993_v41 }
 0x2f0   :  { %2170 = vmatpush.msrb.mxu0 %v6495_v8  ;;  %2333 = vmatpush.msrb.mxu3 %v2332_v12  ;;  %v2355_v6 = vsub.f32 %v5333_v26, %v6496_v13  ;;  %v2372_v12 = vand.u32 4294901760, %v5382_v52  ;;  %v5413_v8 = vsub.f32 %v456_v42, %v5384_v20  ;;  %v5420_v1 = vand.u32 4294901760, %v452_v22 }
 0x2f1   :  { %2245 = vmatpush.msrb.mxu1 %v4995_v63  ;;  %2280 = vmatpush.msrb.mxu2 %v5259_v15  ;;  %v450_v63 = vld [vmem:[%s6258_s3 + $0x100] sm:$0xff]  ;;  %v2367_v42 = vsub.f32 %v5365_v57, %v2366_v11  ;;  %v5435_v13 = vand.u32 4294901760, %v1925_v28  ;;  %v2390_v51 = vand.u32 4294901760, %v5429_v25 }
 0x2f2   :  { %2174 = vmatpush.msrb.mxu0 %v6497_v34  ;;  %2339 = vmatpush.msrb.mxu3 %v2338_v62  ;;  %v2356_v62 = vand.u32 4294901760, %v2355_v6  ;;  %v2362_v6 = vand.u32 4294901760, %v2361_v40  ;;  %v2384_v0 = vand.u32 4294901760, %v5413_v8  ;;  %v6501_v34 = vand.u32 4294901760, %v5015_v23 }
 0x2f3   :  { %2247 = vmatpush.msrb.mxu1 %v5006_v38  ;;  %2282 = vmatpush.msrb.mxu2 %v5282_v45  ;;  %v5433_v38 = vand.u32 4294901760, %v450_v63  ;;  %v2368_v41 = vand.u32 4294901760, %v2367_v42  ;;  %v6503_v23 = vand.u32 4294901760, %v5026_v47  ;;  %v2391_v47 = vsub.f32 %v5429_v25, %v2390_v51 }
 0x2f4   :  { %2178 = vmatpush.msrb.mxu0 %v6499_v43  ;;  %2345 = vmatpush.msrb.mxu3 %v2344_v3  ;;  %v2373_v3 = vsub.f32 %v5382_v52, %v2372_v12  ;;  %v2385_v43 = vsub.f32 %v5413_v8, %v2384_v0  ;;  %v6506_v42 = vand.u32 4294901760, %v5065_v19 }
 0x2f5   :  { %2249 = vmatpush.msrb.mxu1 %v5034_v54  ;;  %2284 = vmatpush.msrb.mxu2 %v5301_v37  ;;  %v5446_v54 = vsub.f32 %v452_v22, %v5420_v1  ;;  %v5460_v22 = vsub.f32 %v450_v63, %v5433_v38 }
 0x2f6   :  { %2182 = vmatpush.msrb.mxu0 %v6500_v56  ;;  %2351 = vmatpush.msrb.mxu3 %v2350_v32  ;;  %v2379_v32 = vsub.f32 %v5396_v7, %v2378_v31  ;;  %v2374_v40 = vand.u32 4294901760, %v2373_v3  ;;  %v6507_v56 = vand.u32 4294901760, %v5080_v29  ;;  %v6508_v3 = vand.u32 4294901760, %v5095_v59 }
 0x2f7   :  { %2251 = vmatpush.msrb.mxu1 %v5052_v36  ;;  %2286 = vmatpush.msrb.mxu2 %v5317_v33  ;;  %v5457_v36 = vsub.f32 %v1925_v28, %v5435_v13  ;;  %v6504_v28 = vand.u32 4294901760, %v5042_v2  ;;  %v2386_v2 = vand.u32 4294901760, %v2385_v43  ;;  %v6510_v59 = vand.u32 4294901760, %v5128_v44  ;;  %v6515_v44 = vld [vmem:[#allocation21_spill] sm:$0xff]  ;;  %v6517_v43 = vld [vmem:[#allocation20_spill] sm:$0xff] }
 0x2f8   :  { %2186 = vmatpush.msrb.mxu0 %v6501_v34  ;;  %2357 = vmatpush.msrb.mxu3 %v2356_v62  ;;  %v2380_v63 = vand.u32 4294901760, %v2379_v32  ;;  %v6513_v32 = vld [vmem:[#allocation23_spill] sm:$0xff] }
 0x2f9   :  { %2253 = vmatpush.msrb.mxu1 %v5067_v21  ;;  %2288 = vmatpush.msrb.mxu2 %v5335_v30  ;;  %6502 = vst [vmem:[#allocation27_spill] sm:$0xff] %v5457_v36  ;;  %v2396_v21 = vand.u32 4294901760, %v5446_v54  ;;  %v5478_v62 = vand.u32 4294901760, %v5457_v36 }
 0x2fa   :  { %2190 = vmatpush.msrb.mxu0 %v6503_v23  ;;  %2363 = vmatpush.msrb.mxu3 %v2362_v6  ;;  %v2392_v6 = vand.u32 4294901760, %v2391_v47  ;;  %v6514_v23 = vand.u32 4294901760, %v6513_v32  ;;  %v6521_v47 = vand.u32 4294901760, %v5267_v53 }
 0x2fb   :  { %2255 = vmatpush.msrb.mxu1 %v5082_v5  ;;  %2290 = vmatpush.msrb.mxu2 %v5350_v4  ;;  %6505 = vst [vmem:[#allocation28_spill] sm:$0xff] %v5478_v62  ;;  %v2402_v5 = vand.u32 4294901760, %v5460_v22  ;;  %v2304_v19 = vsub.f32 %v5457_v36, %v5478_v62 }
 0x2fc   :  { %2194 = vmatpush.msrb.mxu0 %v6504_v28  ;;  %2369 = vmatpush.msrb.mxu3 %v2368_v41  ;;  %v6518_v28 = vand.u32 4294901760, %v6517_v43 }
 0x2fd   :  { %2257 = vmatpush.msrb.mxu1 %v5097_v16  ;;  %2292 = vmatpush.msrb.mxu2 %v5367_v35  ;;  %v2397_v16 = vsub.f32 %v5446_v54, %v2396_v21  ;;  %v5505_v34 = vand.u32 4294901760, %v2304_v19 }
 0x2fe   :  { %2198 = vmatpush.msrb.mxu0 %v6506_v42  ;;  %2375 = vmatpush.msrb.mxu3 %v2374_v40  ;;  %v6516_v40 = vand.u32 4294901760, %v6515_v44 }
 0x2ff   :  { %2259 = vmatpush.msrb.mxu1 %v5112_v17  ;;  %2294 = vmatpush.msrb.mxu2 %v5384_v20  ;;  %v2403_v17 = vsub.f32 %v5460_v22, %v2402_v5  ;;  %v2398_v29 = vand.u32 4294901760, %v2397_v16  ;;  %v6525_v16 = vand.u32 4294901760, %v5315_v24 }
 0x300   :  { %2202 = vmatpush.msrb.mxu0 %v6507_v56  ;;  %2381 = vmatpush.msrb.mxu3 %v2380_v63 }
 0x301   :  { %2261 = vmatpush.msrb.mxu1 %v5130_v50  ;;  %2296 = vmatpush.msrb.mxu2 %v5398_v55  ;;  %v6509_v50 = vand.u32 4294901760, %v5110_v18  ;;  %v2404_v41 = vand.u32 4294901760, %v2403_v17  ;;  %v6512_v18 = vand.u32 4294901760, %v5143_v48  ;;  %v6519_v48 = vld [vmem:[#allocation22_spill] sm:$0xff] }
 0x302   :  { %2206 = vmatpush.msrb.mxu0 %v6508_v3  ;;  %2387 = vmatpush.msrb.mxu3 %v2386_v2  ;;  %v6520_v63 = vand.u32 4294901760, %v6519_v48  ;;  %v6524_v2 = vand.u32 4294901760, %v5293_v46  ;;  %v441_v17 = vld [vmem:[%s6258_s3 + $0xb8] sm:$0xff] }
 0x303   :  { %2263 = vmatpush.msrb.mxu1 %v5145_v61  ;;  %2298 = vmatpush.msrb.mxu2 %v5420_v1  ;;  %v6511_v61 = vand.u32 4294901760, %v5220_v39 }
 0x304   :  { %2210 = vmatpush.msrb.mxu0 %v6509_v50  ;;  %2393 = vmatpush.msrb.mxu3 %v2392_v6  ;;  %v443_v6 = vld [vmem:[%s6258_s3 + $0xc8] sm:$0xff] }
 0x305   :  { %2265 = vmatmul.f32.vlgmr.msrb.gmra.mxu1 %v5232_v9  ;;  %2300 = vmatpush.msrb.mxu2 %v5433_v38  ;;  %v5587_v3 = vand.u32 4294901760, %v443_v6  ;;  %v439_v50 = vld [vmem:[%s6258_s3 + $0xa8] sm:$0xff] }
 0x306   :  { %2466 = vmatpush.msra.mxu1 %v5198_v10  ;;  %2214 = vmatpush.msrb.mxu0 %v6510_v59 }
 0x307   :  { %2399 = vmatpush.msrb.mxu3 %v2398_v29  ;;  %2306 = vmatmul.f32.vlgmr.msrb.gmra.mxu2 %v5505_v34 }
 0x308   :  { %2468 = vmatpush.msra.mxu1 %v5207_v49  ;;  %2507 = vmatpush.msra.mxu2 %v6511_v61 }
 0x309   :  { %2218 = vmatpush.msrb.mxu0 %v6512_v18  ;;  %2405 = vmatpush.msrb.mxu3 %v2404_v41  ;;  %v5618_v41 = vand.u32 4294901760, %v439_v50  ;;  %v433_v18 = vld [vmem:[%s6258_s3 + $0x78] sm:$0xff] }
 0x30a   :  { %2407 = vmatmul.f32.vlgmr.msrb.gmra.mxu3 %v5435_v13  ;;  %2470 = vmatpush.msra.mxu1 %v5227_v60 }
 0x30b   :  { %2511 = vmatpush.msra.mxu2 %v6514_v23  ;;  %2574 = vmatpush.msra.mxu3 %v5198_v10  ;;  %v6522_v10 = vld [vmem:[#allocation24_spill] sm:$0xff] }
 0x30c   :  { %2222 = vmatpush.msrb.mxu0 %v6516_v40  ;;  %2472 = vmatpush.msra.mxu1 %v5240_v14  ;;  %v6523_v42 = vand.u32 4294901760, %v6522_v10 }
 0x30d   :  { %2515 = vmatpush.msra.mxu2 %v6518_v28  ;;  %2576 = vmatpush.msra.mxu3 %v5207_v49  ;;  %v449_v49 = vld [vmem:[%s6258_s3 + $0xf8] sm:$0xff] }
 0x30e   :  { %2226 = vmatpush.msrb.mxu0 %v6520_v63  ;;  %2474 = vmatpush.msra.mxu1 %v5247_v27  ;;  %v427_v63 = vld [vmem:[%s6258_s3 + $0x48] sm:$0xff] }
 0x30f   :  { %2228 = vmatmul.f32.vlgmr.msrb.gmra.mxu0 %v5232_v9  ;;  %2519 = vmatpush.msra.mxu2 %v6521_v47 }
 0x310   :  { %2413 = vmatpush.msra.mxu0 %v5220_v39  ;;  %2578 = vmatpush.msra.mxu3 %v5227_v60  ;;  %v447_v39 = vld [vmem:[%s6258_s3 + $0xe8] sm:$0xff]  ;;  %v5551_v60 = vand.u32 4294901760, %v449_v49 }
 0x311   :  { %2476 = vmatpush.msra.mxu1 %v5259_v15  ;;  %2523 = vmatpush.msra.mxu2 %v6523_v42  ;;  %v5561_v56 = vand.u32 4294901760, %v447_v39  ;;  %v425_v42 = vld [vmem:[%s6258_s3 + $0x38] sm:$0xff] }
 0x312   :  { %2416 = vmatpush.msra.mxu0 %v6513_v32  ;;  %2580 = vmatpush.msra.mxu3 %v5240_v14  ;;  %v445_v14 = vld [vmem:[%s6258_s3 + $0xd8] sm:$0xff]  ;;  %v5572_v19 = vsub.f32 %v449_v49, %v5551_v60 }
 0x313   :  { %2478 = vmatpush.msra.mxu1 %v5282_v45  ;;  %2527 = vmatpush.msra.mxu2 %v6524_v2  ;;  %v5716_v2 = vand.u32 4294901760, %v427_v63 }
 0x314   :  { %2419 = vmatpush.msra.mxu0 %v6517_v43  ;;  %2582 = vmatpush.msra.mxu3 %v5247_v27  ;;  %v6526_v27 = vand.u32 4294901760, %v5333_v26  ;;  %v6372_v29 = vand.u32 4294901760, %v5572_v19  ;;  %v429_v43 = vld [vmem:[%s6258_s3 + $0x58] sm:$0xff] }
 0x315   :  { %2480 = vmatpush.msra.mxu1 %v5301_v37  ;;  %2531 = vmatpush.msra.mxu2 %v6525_v16  ;;  %v5701_v47 = vand.u32 4294901760, %v429_v43 }
 0x316   :  { %2422 = vmatpush.msra.mxu0 %v5267_v53  ;;  %2584 = vmatpush.msra.mxu3 %v5259_v15  ;;  %v5574_v53 = vand.u32 4294901760, %v445_v14  ;;  %v6527_v15 = vand.u32 4294901760, %v5348_v58 }
 0x317   :  { %2482 = vmatpush.msra.mxu1 %v5317_v33  ;;  %2535 = vmatpush.msra.mxu2 %v6526_v27  ;;  %v5731_v27 = vand.u32 4294901760, %v425_v42 }
 0x318   :  { %2425 = vmatpush.msra.mxu0 %v6522_v10  ;;  %2586 = vmatpush.msra.mxu3 %v5282_v45  ;;  %v5585_v45 = vsub.f32 %v447_v39, %v5561_v56 }
 0x319   :  { %2484 = vmatpush.msra.mxu1 %v5335_v30  ;;  %2539 = vmatpush.msra.mxu2 %v6527_v15  ;;  %v421_v15 = vld [vmem:[%s6258_s3 + $0x18] sm:$0xff] }
 0x31a   :  { %2428 = vmatpush.msra.mxu0 %v5293_v46  ;;  %2588 = vmatpush.msra.mxu3 %v5301_v37  ;;  %v5596_v46 = vsub.f32 %v445_v14, %v5574_v53  ;;  %v5598_v37 = vand.u32 4294901760, %v441_v17  ;;  %v5729_v14 = vsub.f32 %v429_v43, %v5701_v47 }
 0x31b   :  { %2486 = vmatpush.msra.mxu1 %v5350_v4  ;;  %2543 = vmatpush.msra.mxu2 %v2366_v11  ;;  %v5613_v11 = vsub.f32 %v443_v6, %v5587_v3 }
 0x31c   :  { %2431 = vmatpush.msra.mxu0 %v5315_v24  ;;  %2590 = vmatpush.msra.mxu3 %v5317_v33  ;;  %v437_v33 = vld [vmem:[%s6258_s3 + $0x98] sm:$0xff]  ;;  %v6371_v24 = vand.u32 4294901760, %v5585_v45  ;;  %v5630_v59 = vsub.f32 %v441_v17, %v5598_v37 }
 0x31d   :  { %2488 = vmatpush.msra.mxu1 %v5367_v35  ;;  %2547 = vmatpush.msra.mxu2 %v2372_v12  ;;  %v435_v12 = vld [vmem:[%s6258_s3 + $0x88] sm:$0xff] }
 0x31e   :  { %2434 = vmatpush.msra.mxu0 %v5333_v26  ;;  %2592 = vmatpush.msra.mxu3 %v5335_v30  ;;  %v2654_v26 = vsub.f32 %v5572_v19, %v6372_v29  ;;  %v6370_v30 = vand.u32 4294901760, %v5596_v46  ;;  %v5643_v61 = vand.u32 4294901760, %v435_v12  ;;  %v6367_v32 = vand.u32 4294901760, %v5630_v59 }
 0x31f   :  { %2490 = vmatpush.msra.mxu1 %v5384_v20  ;;  %2551 = vmatpush.msra.mxu2 %v2378_v31  ;;  %v5632_v31 = vand.u32 4294901760, %v437_v33 }
 0x320   :  { %2437 = vmatpush.msra.mxu0 %v5348_v58  ;;  %2594 = vmatpush.msra.mxu3 %v5350_v4  ;;  %v2660_v58 = vsub.f32 %v5585_v45, %v6371_v24  ;;  %v6368_v4 = vand.u32 4294901760, %v5613_v11  ;;  %v5677_v40 = vsub.f32 %v435_v12, %v5643_v61  ;;  %v2678_v28 = vsub.f32 %v5630_v59, %v6367_v32 }
 0x321   :  { %2492 = vmatpush.msra.mxu1 %v5398_v55  ;;  %2555 = vmatpush.msra.mxu2 %v2384_v0  ;;  %v2666_v0 = vsub.f32 %v5596_v46, %v6370_v30  ;;  %v5661_v23 = vsub.f32 %v437_v33, %v5632_v31  ;;  %v5744_v33 = vsub.f32 %v427_v63, %v5716_v2  ;;  %v463_v30 = vld [vmem:[%s6258_s3 + $0x168] sm:$0xff] }
 0x322   :  { %2440 = vmatpush.msra.mxu0 %v5365_v57  ;;  %2596 = vmatpush.msra.mxu3 %v5367_v35  ;;  %v5652_v57 = vsub.f32 %v439_v50, %v5618_v41  ;;  %v2655_v35 = vand.u32 4294901760, %v2654_v26  ;;  %v2672_v44 = vsub.f32 %v5613_v11, %v6368_v4  ;;  %v6363_v10 = vand.u32 4294901760, %v5677_v40  ;;  %v419_v26 = vld [vmem:[%s6258_s3 + $0x8] sm:$0xff] }
 0x323   :  { %2494 = vmatpush.msra.mxu1 %v5420_v1  ;;  %2559 = vmatpush.msra.mxu2 %v2390_v51  ;;  %v431_v51 = vld [vmem:[%s6258_s3 + $0x68] sm:$0xff]  ;;  %v6365_v48 = vand.u32 4294901760, %v5661_v23  ;;  %v2679_v39 = vand.u32 4294901760, %v2678_v28  ;;  %v5773_v43 = vand.u32 4294901760, %v419_v26 }
 0x324   :  { %2443 = vmatpush.msra.mxu0 %v5382_v52  ;;  %2598 = vmatpush.msra.mxu3 %v5384_v20  ;;  %v5669_v20 = vand.u32 4294901760, %v433_v18  ;;  %v2661_v52 = vand.u32 4294901760, %v2660_v58  ;;  %v2696_v6 = vsub.f32 %v5677_v40, %v6363_v10  ;;  %v467_v10 = vld [vmem:[%s6258_s3 + $0x188] sm:$0xff] }
 0x325   :  { %2496 = vmatpush.msra.mxu1 %v5433_v38  ;;  %2563 = vmatpush.msra.mxu2 %v2396_v21  ;;  %v2667_v21 = vand.u32 4294901760, %v2666_v0  ;;  %v2690_v16 = vsub.f32 %v5661_v23, %v6365_v48  ;;  %v465_v48 = vld [vmem:[%s6258_s3 + $0x178] sm:$0xff]  ;;  %v5908_v32 = vand.u32 4294901760, %v467_v10  ;;  %v6531_v4 = vld [vmem:[#allocation19_spill] sm:$0xff] }
 0x326   :  { %2446 = vmatpush.msra.mxu0 %v5396_v7  ;;  %2600 = vmatpush.msra.mxu3 %v5398_v55  ;;  %v6366_v7 = vand.u32 4294901760, %v5652_v57  ;;  %v5686_v55 = vand.u32 4294901760, %v431_v51  ;;  %v2697_v0 = vand.u32 4294901760, %v2696_v6  ;;  %v5924_v29 = vand.u32 4294901760, %v465_v48 }
 0x327   :  { %2500 = vmatmul.f32.vlgmr.msra.gmra.mxu1 %v5478_v62  ;;  %2567 = vmatpush.msra.mxu2 %v2402_v5  ;;  %v5699_v5 = vsub.f32 %v433_v18, %v5669_v20  ;;  %v2691_v12 = vand.u32 4294901760, %v2690_v16  ;;  %v6360_v18 = vand.u32 4294901760, %v5729_v14  ;;  %v5793_v16 = vsub.f32 %v419_v26, %v5773_v43 }
 0x328   :  { %2656 = vmatpush.msrb.mxu1 %v2655_v35  ;;  %2449 = vmatpush.msra.mxu0 %v5413_v8  ;;  %v2673_v8 = vand.u32 4294901760, %v2672_v44  ;;  %v5714_v49 = vsub.f32 %v431_v51, %v5686_v55  ;;  %v5759_v35 = vsub.f32 %v425_v42, %v5731_v27 }
 0x329   :  { %2602 = vmatpush.msra.mxu3 %v5420_v1  ;;  %2569 = vmatmul.f32.vlgmr.msra.gmra.mxu2 %v5435_v13  ;;  %v2684_v1 = vsub.f32 %v5652_v57, %v6366_v7  ;;  %v2714_v28 = vsub.f32 %v5729_v14, %v6360_v18 }
 0x32a   :  { %2662 = vmatpush.msrb.mxu1 %v2661_v52  ;;  %2754 = vmatpush.msrb.mxu2 %v5572_v19  ;;  %v6361_v50 = vand.u32 4294901760, %v5714_v49  ;;  %v6359_v52 = vand.u32 4294901760, %v5744_v33  ;;  %v6357_v63 = vand.u32 4294901760, %v5759_v35 }
 0x32b   :  { %2452 = vmatpush.msra.mxu0 %v5429_v25  ;;  %2604 = vmatpush.msra.mxu3 %v5433_v38  ;;  %v423_v25 = vld [vmem:[%s6258_s3 + $0x28] sm:$0xff]  ;;  %v6362_v38 = vand.u32 4294901760, %v5699_v5  ;;  %v2685_v17 = vand.u32 4294901760, %v2684_v1  ;;  %v2715_v6 = vand.u32 4294901760, %v2714_v28 }
 0x32c   :  { %2606 = vmatmul.f32.vlgmr.msra.gmra.mxu3 %v5435_v13  ;;  %2668 = vmatpush.msrb.mxu1 %v2667_v21  ;;  %v2708_v51 = vsub.f32 %v5714_v49, %v6361_v50  ;;  %v2720_v1 = vsub.f32 %v5744_v33, %v6359_v52  ;;  %v471_v52 = vld [vmem:[%s6258_s3 + $0x1a8] sm:$0xff] }
 0x32d   :  { %2757 = vmatpush.msrb.mxu2 %v5585_v45  ;;  %2807 = vmatpush.msrb.mxu3 %v5551_v60  ;;  %v2702_v58 = vsub.f32 %v5699_v5, %v6362_v38 }
 0x32e   :  { %2455 = vmatpush.msra.mxu0 %v5446_v54  ;;  %2674 = vmatpush.msrb.mxu1 %v2673_v8  ;;  %v5746_v54 = vand.u32 4294901760, %v423_v25  ;;  %v2709_v42 = vand.u32 4294901760, %v2708_v51  ;;  %v2721_v26 = vand.u32 4294901760, %v2720_v1  ;;  %v477_v1 = vld [vmem:[%s6258_s3 + $0x1d8] sm:$0xff] }
 0x32f   :  { %2760 = vmatpush.msrb.mxu2 %v5596_v46  ;;  %2809 = vmatpush.msrb.mxu3 %v5561_v56  ;;  %v2703_v21 = vand.u32 4294901760, %v2702_v58 }
 0x330   :  { %2458 = vmatpush.msra.mxu0 %v5460_v22  ;;  %2680 = vmatpush.msrb.mxu1 %v2679_v39  ;;  %v5761_v22 = vand.u32 4294901760, %v421_v15  ;;  %v5771_v44 = vsub.f32 %v423_v25, %v5746_v54  ;;  %v481_v25 = vld [vmem:[%s6258_s3 + $0x1f8] sm:$0xff] }
 0x331   :  { %2461 = vmatmul.f32.vlgmr.msra.gmra.mxu0 %v5457_v36  ;;  %2763 = vmatpush.msrb.mxu2 %v5613_v11  ;;  %v5815_v51 = vand.u32 4294901760, %v481_v25  ;;  %v5940_v36 = vand.u32 4294901760, %v463_v30 }
 0x332   :  { %2611 = vmatpush.msrb.mxu0 %v5551_v60  ;;  %2811 = vmatpush.msrb.mxu3 %v5574_v53  ;;  %v5783_v8 = vsub.f32 %v421_v15, %v5761_v22  ;;  %v6356_v39 = vand.u32 4294901760, %v5771_v44  ;;  %v2726_v15 = vsub.f32 %v5759_v35, %v6357_v63  ;;  %v5842_v63 = vand.u32 4294901760, %v477_v1 }
 0x333   :  { %2686 = vmatpush.msrb.mxu1 %v2685_v17  ;;  %2766 = vmatpush.msrb.mxu2 %v5630_v59 }
 0x334   :  { %2613 = vmatpush.msrb.mxu0 %v5561_v56  ;;  %2813 = vmatpush.msrb.mxu3 %v5587_v3  ;;  %v6355_v17 = vand.u32 4294901760, %v5783_v8  ;;  %v2732_v58 = vsub.f32 %v5771_v44, %v6356_v39  ;;  %v475_v39 = vld [vmem:[%s6258_s3 + $0x1c8] sm:$0xff] }
 0x335   :  { %2692 = vmatpush.msrb.mxu1 %v2691_v12  ;;  %2769 = vmatpush.msrb.mxu2 %v5652_v57  ;;  %v479_v12 = vld [vmem:[%s6258_s3 + $0x1e8] sm:$0xff] }
 0x336   :  { %2615 = vmatpush.msrb.mxu0 %v5574_v53  ;;  %2815 = vmatpush.msrb.mxu3 %v5598_v37  ;;  %v2738_v28 = vsub.f32 %v5783_v8, %v6355_v17  ;;  %v5835_v17 = vsub.f32 %v481_v25, %v5815_v51 }
 0x337   :  { %2698 = vmatpush.msrb.mxu1 %v2697_v0  ;;  %2772 = vmatpush.msrb.mxu2 %v5661_v23  ;;  %v6358_v0 = vand.u32 4294901760, %v5793_v16 }
 0x338   :  { %2617 = vmatpush.msrb.mxu0 %v5587_v3  ;;  %2817 = vmatpush.msrb.mxu3 %v5618_v41  ;;  %v6364_v18 = vand.u32 4294901760, %v5835_v17 }
 0x339   :  { %2704 = vmatpush.msrb.mxu1 %v2703_v21  ;;  %2775 = vmatpush.msrb.mxu2 %v5677_v40  ;;  %v2727_v21 = vand.u32 4294901760, %v2726_v15  ;;  %v2744_v15 = vsub.f32 %v5793_v16, %v6358_v0  ;;  %v5853_v0 = vand.u32 4294901760, %v475_v39 }
 0x33a   :  { %2619 = vmatpush.msrb.mxu0 %v5598_v37  ;;  %2819 = vmatpush.msrb.mxu3 %v5632_v31 }
 0x33b   :  { %2710 = vmatpush.msrb.mxu1 %v2709_v42  ;;  %2778 = vmatpush.msrb.mxu2 %v5699_v5  ;;  %v5823_v42 = vand.u32 4294901760, %v479_v12  ;;  %v5877_v38 = vsub.f32 %v475_v39, %v5853_v0 }
 0x33c   :  { %2621 = vmatpush.msrb.mxu0 %v5618_v41  ;;  %2821 = vmatpush.msrb.mxu3 %v5643_v61 }
 0x33d   :  { %2716 = vmatpush.msrb.mxu1 %v2715_v6  ;;  %2781 = vmatpush.msrb.mxu2 %v5714_v49  ;;  %v2733_v6 = vand.u32 4294901760, %v2732_v58  ;;  %v2739_v58 = vand.u32 4294901760, %v2738_v28  ;;  %v5849_v25 = vsub.f32 %v479_v12, %v5823_v42  ;;  %v5865_v12 = vsub.f32 %v477_v1, %v5842_v63  ;;  %6528 = vst [vmem:[#allocation23_spill] sm:$0xff] %v5877_v38 }
 0x33e   :  { %2623 = vmatpush.msrb.mxu0 %v5632_v31  ;;  %2823 = vmatpush.msrb.mxu3 %v5669_v20  ;;  %v2995_v1 = vsub.f32 %v5835_v17, %v6364_v18  ;;  %v6375_v7 = vand.u32 4294901760, %v5877_v38 }
 0x33f   :  { %2722 = vmatpush.msrb.mxu1 %v2721_v26  ;;  %2784 = vmatpush.msrb.mxu2 %v5729_v14  ;;  %v473_v26 = vld [vmem:[%s6258_s3 + $0x1b8] sm:$0xff]  ;;  %v6369_v50 = vand.u32 4294901760, %v5849_v25  ;;  %v6373_v39 = vand.u32 4294901760, %v5865_v12 }
 0x340   :  { %2625 = vmatpush.msrb.mxu0 %v5643_v61  ;;  %2825 = vmatpush.msrb.mxu3 %v5686_v55  ;;  %v5860_v28 = vand.u32 4294901760, %v473_v26 }
 0x341   :  { %2728 = vmatpush.msrb.mxu1 %v2727_v21  ;;  %2787 = vmatpush.msrb.mxu2 %v5744_v33  ;;  %v2745_v21 = vand.u32 4294901760, %v2744_v15  ;;  %v469_v15 = vld [vmem:[%s6258_s3 + $0x198] sm:$0xff] }
 0x342   :  { %2627 = vmatpush.msrb.mxu0 %v5669_v20  ;;  %2827 = vmatpush.msrb.mxu3 %v5701_v47 }
 0x343   :  { %2734 = vmatpush.msrb.mxu1 %v2733_v6  ;;  %2790 = vmatpush.msrb.mxu2 %v5759_v35  ;;  %v5869_v6 = vand.u32 4294901760, %v471_v52 }
 0x344   :  { %2629 = vmatpush.msrb.mxu0 %v5686_v55  ;;  %2829 = vmatpush.msrb.mxu3 %v5716_v2 }
 0x345   :  { %2740 = vmatpush.msrb.mxu1 %v2739_v58  ;;  %2793 = vmatpush.msrb.mxu2 %v5771_v44  ;;  %v5884_v58 = vsub.f32 %v473_v26, %v5860_v28  ;;  %v3001_v26 = vsub.f32 %v5849_v25, %v6369_v50  ;;  %v5900_v18 = vsub.f32 %v471_v52, %v5869_v6  ;;  %v2996_v50 = vand.u32 4294901760, %v2995_v1  ;;  %v6532_v52 = vld [vmem:[#allocation25_spill] sm:$0xff] }
 0x346   :  { %2631 = vmatpush.msrb.mxu0 %v5701_v47  ;;  %2831 = vmatpush.msrb.mxu3 %v5731_v27 }
 0x347   :  { %2746 = vmatpush.msrb.mxu1 %v2745_v21  ;;  %2796 = vmatpush.msrb.mxu2 %v5783_v8  ;;  %6529 = vst [vmem:[#allocation21_spill] sm:$0xff] %v5884_v58  ;;  %v5892_v21 = vand.u32 4294901760, %v469_v15 }
 0x348   :  { %2633 = vmatpush.msrb.mxu0 %v5716_v2  ;;  %2833 = vmatpush.msrb.mxu3 %v5746_v54  ;;  %6530 = vst [vmem:[#allocation20_spill] sm:$0xff] %v5900_v18 }
 0x349   :  { %2748 = vmatmul.f32.vlgmr.msrb.gmra.mxu1 %v5232_v9  ;;  %2799 = vmatpush.msrb.mxu2 %v5793_v16  ;;  %v5922_v24 = vsub.f32 %v469_v15, %v5892_v21  ;;  %v3013_v15 = vsub.f32 %v5877_v38, %v6375_v7  ;;  %v5953_v7 = vsub.f32 %v465_v48, %v5924_v29  ;;  %v6536_v38 = vand.u32 4294901760, %v5572_v19 }
 0x34a   :  { %2915 = vmatpush.msra.mxu1 %v5551_v60  ;;  %2635 = vmatpush.msrb.mxu0 %v5731_v27  ;;  %v3007_v60 = vsub.f32 %v5865_v12, %v6373_v39  ;;  %v5938_v39 = vsub.f32 %v467_v10, %v5908_v32  ;;  %v6538_v19 = vand.u32 4294901760, %v5585_v45  ;;  %v6540_v45 = vand.u32 4294901760, %v5596_v46 }
 0x34b   :  { %2835 = vmatpush.msrb.mxu3 %v5761_v22  ;;  %2802 = vmatmul.f32.vlgmr.msrb.gmra.mxu2 %v6531_v4  ;;  %v3002_v4 = vand.u32 4294901760, %v3001_v26  ;;  %v6533_v26 = vand.u32 4294901760, %v5884_v58 }
 0x34c   :  { %2917 = vmatpush.msra.mxu1 %v5561_v56  ;;  %2952 = vmatpush.msra.mxu2 %v5815_v51  ;;  %v461_v56 = vld [vmem:[%s6258_s3 + $0x158] sm:$0xff] }
 0x34d   :  { %2637 = vmatpush.msrb.mxu0 %v5746_v54  ;;  %2837 = vmatpush.msrb.mxu3 %v5773_v43  ;;  %v3019_v1 = vsub.f32 %v5884_v58, %v6533_v26  ;;  %v5955_v62 = vand.u32 4294901760, %v461_v56  ;;  %v457_v58 = vld [vmem:[%s6258_s3 + $0x138] sm:$0xff] }
 0x34e   :  { %2841 = vmatmul.f32.vlgmr.msrb.gmra.mxu3 %v6532_v52  ;;  %2919 = vmatpush.msra.mxu1 %v5574_v53  ;;  %v459_v53 = vld [vmem:[%s6258_s3 + $0x148] sm:$0xff]  ;;  %v3008_v52 = vand.u32 4294901760, %v3007_v60  ;;  %v5968_v60 = vsub.f32 %v463_v30, %v5940_v36 }
 0x34f   :  { %2954 = vmatpush.msra.mxu2 %v5823_v42  ;;  %2997 = vmatpush.msra.mxu3 %v2996_v50  ;;  %v6534_v50 = vand.u32 4294901760, %v5900_v18  ;;  %v5970_v10 = vand.u32 4294901760, %v459_v53  ;;  %v5984_v48 = vsub.f32 %v461_v56, %v5955_v62 }
 0x350   :  { %2639 = vmatpush.msrb.mxu0 %v5761_v22  ;;  %2921 = vmatpush.msra.mxu1 %v5587_v3  ;;  %v3014_v3 = vand.u32 4294901760, %v3013_v15 }
 0x351   :  { %2956 = vmatpush.msra.mxu2 %v5842_v63  ;;  %3003 = vmatpush.msra.mxu3 %v3002_v4  ;;  %v3025_v26 = vsub.f32 %v5900_v18, %v6534_v50  ;;  %v6535_v4 = vld [vmem:[#allocation26_spill] sm:$0xff]  ;;  %v3020_v50 = vand.u32 4294901760, %v3019_v1  ;;  %v455_v18 = vld [vmem:[%s6258_s3 + $0x128] sm:$0xff]  ;;  %v5997_v56 = vsub.f32 %v459_v53, %v5970_v10 }
 0x352   :  { %2641 = vmatpush.msrb.mxu0 %v5773_v43  ;;  %2923 = vmatpush.msra.mxu1 %v5598_v37  ;;  %v6537_v37 = vand.u32 4294901760, %v5922_v24  ;;  %v5999_v15 = vand.u32 4294901760, %v455_v18 }
 0x353   :  { %2647 = vmatmul.f32.vlgmr.msrb.gmra.mxu0 %v6535_v4  ;;  %2958 = vmatpush.msra.mxu2 %v5853_v0  ;;  %v5986_v4 = vand.u32 4294901760, %v457_v58  ;;  %v3026_v1 = vand.u32 4294901760, %v3025_v26 }
 0x354   :  { %2848 = vmatpush.msra.mxu0 %v6536_v38  ;;  %3009 = vmatpush.msra.mxu3 %v3008_v52  ;;  %v3031_v30 = vsub.f32 %v5922_v24, %v6537_v37  ;;  %v6539_v38 = vand.u32 4294901760, %v5938_v39  ;;  %v3048_v37 = vand.u32 4294901760, %v5968_v60 }
 0x355   :  { %2925 = vmatpush.msra.mxu1 %v5618_v41  ;;  %2960 = vmatpush.msra.mxu2 %v5860_v28  ;;  %v453_v41 = vld [vmem:[%s6258_s3 + $0x118] sm:$0xff] }
 0x356   :  { %2852 = vmatpush.msra.mxu0 %v6538_v19  ;;  %3015 = vmatpush.msra.mxu3 %v3014_v3  ;;  %v3037_v52 = vsub.f32 %v5938_v39, %v6539_v38  ;;  %v3032_v26 = vand.u32 4294901760, %v3031_v30  ;;  %v6541_v3 = vand.u32 4294901760, %v5953_v7  ;;  %v3054_v19 = vand.u32 4294901760, %v5984_v48 }
 0x357   :  { %2927 = vmatpush.msra.mxu1 %v5632_v31  ;;  %2962 = vmatpush.msra.mxu2 %v5869_v6  ;;  %v6013_v38 = vsub.f32 %v457_v58, %v5986_v4  ;;  %v451_v31 = vld [vmem:[%s6258_s3 + $0x108] sm:$0xff]  ;;  %v6020_v46 = vand.u32 4294901760, %v453_v41  ;;  %v3049_v58 = vsub.f32 %v5968_v60, %v3048_v37 }
 0x358   :  { %2856 = vmatpush.msra.mxu0 %v6540_v45  ;;  %3021 = vmatpush.msra.mxu3 %v3020_v50  ;;  %v3043_v53 = vsub.f32 %v5953_v7, %v6541_v3  ;;  %v6542_v50 = vand.u32 4294901760, %v5613_v11  ;;  %v3038_v30 = vand.u32 4294901760, %v3037_v52  ;;  %v3060_v45 = vand.u32 4294901760, %v5997_v56 }
 0x359   :  { %2929 = vmatpush.msra.mxu1 %v5643_v61  ;;  %2964 = vmatpush.msra.mxu2 %v5892_v21  ;;  %v6029_v3 = vsub.f32 %v455_v18, %v5999_v15  ;;  %v6033_v61 = vand.u32 4294901760, %v451_v31  ;;  %v6543_v11 = vand.u32 4294901760, %v5630_v59  ;;  %v3055_v52 = vsub.f32 %v5984_v48, %v3054_v19 }
 0x35a   :  { %2860 = vmatpush.msra.mxu0 %v6542_v50  ;;  %3027 = vmatpush.msra.mxu3 %v3026_v1  ;;  %v3044_v1 = vand.u32 4294901760, %v3043_v53  ;;  %v3066_v50 = vand.u32 4294901760, %v6013_v38  ;;  %v6544_v18 = vand.u32 4294901760, %v5652_v57  ;;  %v3050_v59 = vand.u32 4294901760, %v3049_v58 }
 0x35b   :  { %2931 = vmatpush.msra.mxu1 %v5669_v20  ;;  %2966 = vmatpush.msra.mxu2 %v5908_v32  ;;  %v6044_v20 = vsub.f32 %v453_v41, %v6020_v46  ;;  %v3072_v53 = vand.u32 4294901760, %v6029_v3  ;;  %v6545_v41 = vand.u32 4294901760, %v5661_v23  ;;  %v3056_v57 = vand.u32 4294901760, %v3055_v52 }
 0x35c   :  { %2864 = vmatpush.msra.mxu0 %v6543_v11  ;;  %3033 = vmatpush.msra.mxu3 %v3032_v26  ;;  %v3061_v26 = vsub.f32 %v5997_v56, %v3060_v45  ;;  %v6546_v58 = vand.u32 4294901760, %v5677_v40  ;;  %v6548_v52 = vand.u32 4294901760, %v5714_v49 }
 0x35d   :  { %2933 = vmatpush.msra.mxu1 %v5686_v55  ;;  %2968 = vmatpush.msra.mxu2 %v5924_v29  ;;  %v6055_v55 = vsub.f32 %v451_v31, %v6033_v61  ;;  %v3073_v23 = vsub.f32 %v6029_v3, %v3072_v53 }
 0x35e   :  { %2868 = vmatpush.msra.mxu0 %v6544_v18  ;;  %3039 = vmatpush.msra.mxu3 %v3038_v30  ;;  %v3067_v30 = vsub.f32 %v6013_v38, %v3066_v50  ;;  %v3062_v31 = vand.u32 4294901760, %v3061_v26  ;;  %v6550_v18 = vand.u32 4294901760, %v5744_v33  ;;  %v6553_v33 = vand.u32 4294901760, %v5771_v44  ;;  %v6558_v26 = vld [vmem:[#allocation23_spill] sm:$0xff] }
 0x35f   :  { %2935 = vmatpush.msra.mxu1 %v5701_v47  ;;  %2970 = vmatpush.msra.mxu2 %v5940_v36  ;;  %v3078_v47 = vand.u32 4294901760, %v6044_v20  ;;  %v3084_v11 = vand.u32 4294901760, %v6055_v55  ;;  %v6557_v44 = vand.u32 4294901760, %v5793_v16  ;;  %v6562_v16 = vld [vmem:[#allocation20_spill] sm:$0xff] }
 0x360   :  { %2872 = vmatpush.msra.mxu0 %v6545_v41  ;;  %3045 = vmatpush.msra.mxu3 %v3044_v1  ;;  %v3068_v1 = vand.u32 4294901760, %v3067_v30  ;;  %v6559_v41 = vand.u32 4294901760, %v6558_v26 }
 0x361   :  { %2937 = vmatpush.msra.mxu1 %v5716_v2  ;;  %2972 = vmatpush.msra.mxu2 %v5955_v62  ;;  %v6547_v2 = vand.u32 4294901760, %v5699_v5  ;;  %v3079_v40 = vsub.f32 %v6044_v20, %v3078_v47  ;;  %v3085_v5 = vsub.f32 %v6055_v55, %v3084_v11 }
 0x362   :  { %2876 = vmatpush.msra.mxu0 %v6546_v58  ;;  %3051 = vmatpush.msra.mxu3 %v3050_v59  ;;  %v6554_v59 = vand.u32 4294901760, %v5849_v25 }
 0x363   :  { %2939 = vmatpush.msra.mxu1 %v5731_v27  ;;  %2974 = vmatpush.msra.mxu2 %v5970_v10  ;;  %v3074_v27 = vand.u32 4294901760, %v3073_v23  ;;  %v3080_v49 = vand.u32 4294901760, %v3079_v40 }
 0x364   :  { %2880 = vmatpush.msra.mxu0 %v6547_v2  ;;  %3057 = vmatpush.msra.mxu3 %v3056_v57 }
 0x365   :  { %2941 = vmatpush.msra.mxu1 %v5746_v54  ;;  %2976 = vmatpush.msra.mxu2 %v5986_v4  ;;  %v6549_v54 = vand.u32 4294901760, %v5729_v14  ;;  %v6551_v14 = vand.u32 4294901760, %v5759_v35  ;;  %v6556_v35 = vand.u32 4294901760, %v5865_v12 }
 0x366   :  { %2884 = vmatpush.msra.mxu0 %v6548_v52  ;;  %3063 = vmatpush.msra.mxu3 %v3062_v31 }
 0x367   :  { %2943 = vmatpush.msra.mxu1 %v5761_v22  ;;  %2978 = vmatpush.msra.mxu2 %v5999_v15  ;;  %v3086_v22 = vand.u32 4294901760, %v3085_v5 }
 0x368   :  { %2888 = vmatpush.msra.mxu0 %v6549_v54  ;;  %3069 = vmatpush.msra.mxu3 %v3068_v1 }
 0x369   :  { %2945 = vmatpush.msra.mxu1 %v5773_v43  ;;  %2980 = vmatpush.msra.mxu2 %v6020_v46  ;;  %v6552_v43 = vand.u32 4294901760, %v5835_v17 }
 0x36a   :  { %2892 = vmatpush.msra.mxu0 %v6550_v18  ;;  %3075 = vmatpush.msra.mxu3 %v3074_v27 }
 0x36b   :  { %2947 = vmatmul.f32.vlgmr.msra.gmra.mxu1 %v5232_v9  ;;  %2982 = vmatpush.msra.mxu2 %v6033_v61 }
 0x36c   :  { %3148 = vmatpush.msrb.mxu1 %v5815_v51  ;;  %2896 = vmatpush.msra.mxu0 %v6551_v14 }
 0x36d   :  { %3081 = vmatpush.msra.mxu3 %v3080_v49  ;;  %2988 = vmatmul.f32.vlgmr.msra.gmra.mxu2 %v5505_v34  ;;  %v6555_v34 = vand.u32 4294901760, %v5783_v8  ;;  %v6560_v8 = vld [vmem:[#allocation21_spill] sm:$0xff] }
 0x36e   :  { %3150 = vmatpush.msrb.mxu1 %v5823_v42  ;;  %3189 = vmatpush.msrb.mxu2 %v6552_v43 }
 0x36f   :  { %2900 = vmatpush.msra.mxu0 %v6553_v33  ;;  %3087 = vmatpush.msra.mxu3 %v3086_v22 }
 0x370   :  { %3089 = vmatmul.f32.vlgmr.msra.gmra.mxu3 %v5435_v13  ;;  %3152 = vmatpush.msrb.mxu1 %v5842_v63 }
 0x371   :  { %3193 = vmatpush.msrb.mxu2 %v6554_v59  ;;  %3256 = vmatpush.msrb.mxu3 %v5815_v51  ;;  %v6561_v51 = vand.u32 4294901760, %v6560_v8 }
 0x372   :  { %2904 = vmatpush.msra.mxu0 %v6555_v34  ;;  %3154 = vmatpush.msrb.mxu1 %v5853_v0 }
 0x373   :  { %3197 = vmatpush.msrb.mxu2 %v6556_v35  ;;  %3258 = vmatpush.msrb.mxu3 %v5823_v42  ;;  %v788_v42 = vpop.f32.mrf.mxu3 }
 0x374   :  { %2908 = vmatpush.msra.mxu0 %v6557_v44  ;;  %3156 = vmatpush.msrb.mxu1 %v5860_v28 }
 0x375   :  { %2910 = vmatmul.f32.vlgmr.msra.gmra.mxu0 %v5232_v9  ;;  %3201 = vmatpush.msrb.mxu2 %v6559_v41  ;;  %v6563_v9 = vand.u32 4294901760, %v6562_v16 }
 0x376   :  { %3095 = vmatpush.msrb.mxu0 %v5835_v17  ;;  %3260 = vmatpush.msrb.mxu3 %v5842_v63  ;;  %v6564_v63 = vand.u32 4294901760, %v5922_v24  ;;  %v6565_v17 = vand.u32 4294901760, %v5938_v39 }
 0x377   :  { %3158 = vmatpush.msrb.mxu1 %v5869_v6  ;;  %3205 = vmatpush.msrb.mxu2 %v6561_v51 }
 0x378   :  { %3098 = vmatpush.msrb.mxu0 %v5849_v25  ;;  %3262 = vmatpush.msrb.mxu3 %v5853_v0  ;;  %v6566_v0 = vand.u32 4294901760, %v5953_v7 }
 0x379   :  { %3160 = vmatpush.msrb.mxu1 %v5892_v21  ;;  %3209 = vmatpush.msrb.mxu2 %v6563_v9 }
 0x37a   :  { %3101 = vmatpush.msrb.mxu0 %v5865_v12  ;;  %3264 = vmatpush.msrb.mxu3 %v5860_v28 }
 0x37b   :  { %3162 = vmatpush.msrb.mxu1 %v5908_v32  ;;  %3213 = vmatpush.msrb.mxu2 %v6564_v63 }
 0x37c   :  { %3104 = vmatpush.msrb.mxu0 %v6558_v26  ;;  %3266 = vmatpush.msrb.mxu3 %v5869_v6 }
 0x37d   :  { %3164 = vmatpush.msrb.mxu1 %v5924_v29  ;;  %3217 = vmatpush.msrb.mxu2 %v6565_v17 }
 0x37e   :  { %3107 = vmatpush.msrb.mxu0 %v6560_v8  ;;  %3268 = vmatpush.msrb.mxu3 %v5892_v21  ;;  %v1036_v21 = vpop.f32.mrf.mxu3 }
 0x37f   :  { %3166 = vmatpush.msrb.mxu1 %v5940_v36  ;;  %3221 = vmatpush.msrb.mxu2 %v6566_v0 }
 0x380   :  { %3110 = vmatpush.msrb.mxu0 %v6562_v16  ;;  %3270 = vmatpush.msrb.mxu3 %v5908_v32  ;;  %v749_v32 = vpop.f32.mrf.mxu2 }
 0x381   :  { %3168 = vmatpush.msrb.mxu1 %v5955_v62  ;;  %3225 = vmatpush.msrb.mxu2 %v3048_v37 }
 0x382   :  { %3113 = vmatpush.msrb.mxu0 %v5922_v24  ;;  %3272 = vmatpush.msrb.mxu3 %v5924_v29  ;;  %v594_v29 = vpop.f32.mrf.mxu0  ;;  %v695_v24 = vpop.f32.mrf.mxu1 }
 0x383   :  { %3170 = vmatpush.msrb.mxu1 %v5970_v10  ;;  %3229 = vmatpush.msrb.mxu2 %v3054_v19  ;;  %v696_v12 = vadd.f32 %v695_v24, %v594_v29 }
 0x384   :  { %3116 = vmatpush.msrb.mxu0 %v5938_v39  ;;  %3274 = vmatpush.msrb.mxu3 %v5940_v36  ;;  %v6567_v36 = vld [vmem:[#allocation28_spill] sm:$0xff] }
 0x385   :  { %3172 = vmatpush.msrb.mxu1 %v5986_v4  ;;  %3233 = vmatpush.msrb.mxu2 %v3060_v45  ;;  %v750_v39 = vadd.f32 %v749_v32, %v696_v12 }
 0x386   :  { %3119 = vmatpush.msrb.mxu0 %v5953_v7  ;;  %3276 = vmatpush.msrb.mxu3 %v5955_v62  ;;  %v6568_v62 = vld [vmem:[#allocation27_spill] sm:$0xff] }
 0x387   :  { %3174 = vmatpush.msrb.mxu1 %v5999_v15  ;;  %3237 = vmatpush.msrb.mxu2 %v3066_v50 }
 0x388   :  { %3122 = vmatpush.msrb.mxu0 %v5968_v60  ;;  %3278 = vmatpush.msrb.mxu3 %v5970_v10  ;;  %v935_v6 = vpop.f32.mrf.mxu2 }
 0x389   :  { %3176 = vmatpush.msrb.mxu1 %v6020_v46  ;;  %3241 = vmatpush.msrb.mxu2 %v3072_v53 }
 0x38a   :  { %3125 = vmatpush.msrb.mxu0 %v5984_v48  ;;  %3280 = vmatpush.msrb.mxu3 %v5986_v4  ;;  %v857_v7 = vpop.f32.mrf.mxu0  ;;  %v894_v25 = vpop.f32.mrf.mxu1 }
 0x38b   :  { %3178 = vmatpush.msrb.mxu1 %v6033_v61  ;;  %3245 = vmatpush.msrb.mxu2 %v3078_v47  ;;  %v1235_v4 = vpop.f32.mrf.mxu3 }
 0x38c   :  { %3128 = vmatpush.msrb.mxu0 %v5997_v56  ;;  %3282 = vmatpush.msrb.mxu3 %v5999_v15 }
 0x38d   :  { %3182 = vmatmul.f32.vlgmr.msrb.gmra.mxu1 %v6567_v36  ;;  %3249 = vmatpush.msrb.mxu2 %v3084_v11 }
 0x38e   :  { %3131 = vmatpush.msrb.mxu0 %v6013_v38  ;;  %3284 = vmatpush.msrb.mxu3 %v6020_v46 }
 0x38f   :  { %3251 = vmatmul.f32.vlgmr.msrb.gmra.mxu2 %v5435_v13 }
 0x390   :  { %3134 = vmatpush.msrb.mxu0 %v6029_v3  ;;  %3286 = vmatpush.msrb.mxu3 %v6033_v61  ;;  %v1198_v60 = vpop.f32.mrf.mxu2 }
 0x391   :  { %3288 = vmatmul.f32.vlgmr.msrb.gmra.mxu3 %v5435_v13  ;;  %v789_v13 = vadd.f32 %v788_v42, %v750_v39 }
 0x392   :  { %3137 = vmatpush.msrb.mxu0 %v6044_v20  ;;  %v1090_v28 = vpop.f32.mrf.mxu0  ;;  %v1129_v10 = vpop.f32.mrf.mxu1 }
 0x393   :  { %v858_v15 = vadd.f32 %v857_v7, %v789_v13  ;;  %v1470_v3 = vpop.f32.mrf.mxu3 }
 0x394   :  { %3140 = vmatpush.msrb.mxu0 %v6055_v55 }
 0x395   :  { %3143 = vmatmul.f32.vlgmr.msrb.gmra.mxu0 %v6568_v62  ;;  %v895_v56 = vadd.f32 %v894_v25, %v858_v15 }
 0x397   :  { %v936_v46 = vadd.f32 %v935_v6, %v895_v56 }
 0x398   :  { %v1431_v38 = vpop.f32.mrf.mxu2 }
 0x399   :  { %v1037_v50 = vadd.f32 %v1036_v21, %v936_v46 }
 0x39a   :  { %v1276_v48 = vpop.f32.mrf.mxu0  ;;  %v1377_v37 = vpop.f32.mrf.mxu1 }
 0x39b   :  { %v1378_v45 = vadd.f32 %v1377_v37, %v1276_v48  ;;  %v1091_v53 = vadd.f32 %v1090_v28, %v1037_v50  ;;  %v1718_v58 = vpop.f32.mrf.mxu3 }
 0x39d   :  { %v1432_v55 = vadd.f32 %v1431_v38, %v1378_v45  ;;  %v1130_v30 = vadd.f32 %v1129_v10, %v1091_v53 }
 0x39f   :  { %v1471_v47 = vadd.f32 %v1470_v3, %v1432_v55  ;;  %v1199_v2 = vadd.f32 %v1198_v60, %v1130_v30 }
 0x3a0   :  { %v1617_v57 = vpop.f32.mrf.mxu2 }
 0x3a1   :  { %v1236_v52 = vadd.f32 %v1235_v4, %v1199_v2 }
 0x3a2   :  { %v1539_v19 = vpop.f32.mrf.mxu0  ;;  %v1576_v61 = vpop.f32.mrf.mxu1 }
 0x3a3   :  { %v1540_v23 = vadd.f32 %v1539_v19, %v1471_v47  ;;  %v1917_v27 = vpop.f32.mrf.mxu3 }
 0x3a5   :  { %v1577_v40 = vadd.f32 %v1576_v61, %v1540_v23 }
 0x3a7   :  { %v1618_v54 = vadd.f32 %v1617_v57, %v1577_v40 }
 0x3a8   :  { %v1880_v1 = vpop.f32.mrf.mxu2 }
 0x3a9   :  { %v1719_v14 = vadd.f32 %v1718_v58, %v1618_v54 }
 0x3aa   :  { %v1772_v20 = vpop.f32.mrf.mxu0  ;;  %v1811_v31 = vpop.f32.mrf.mxu1 }
 0x3ab   :  { %v1773_v33 = vadd.f32 %v1772_v20, %v1719_v14  ;;  %v2160_v59 = vpop.f32.mrf.mxu3 }
 0x3ad   :  { %v1812_v26 = vadd.f32 %v1811_v31, %v1773_v33 }
 0x3af   :  { %v1881_v51 = vadd.f32 %v1880_v1, %v1812_v26 }
 0x3b0   :  { %v2121_v22 = vpop.f32.mrf.mxu2 }
 0x3b1   :  { %v1918_v0 = vadd.f32 %v1917_v27, %v1881_v51 }
 0x3b2   :  { %v1966_v11 = vpop.f32.mrf.mxu0  ;;  %v2067_v5 = vpop.f32.mrf.mxu1 }
 0x3b3   :  { %v1967_v49 = vadd.f32 %v1966_v11, %v1236_v52  ;;  %v2408_v9 = vpop.f32.mrf.mxu3 }
 0x3b5   :  { %v2068_v43 = vadd.f32 %v2067_v5, %v1967_v49 }
 0x3b7   :  { %v2122_v35 = vadd.f32 %v2121_v22, %v2068_v43 }
 0x3b8   :  { %v2307_v41 = vpop.f32.mrf.mxu2 }
 0x3b9   :  { %v2161_v8 = vadd.f32 %v2160_v59, %v2122_v35 }
 0x3ba   :  { %v2229_v18 = vpop.f32.mrf.mxu0  ;;  %v2266_v34 = vpop.f32.mrf.mxu1 }
 0x3bb   :  { %v2230_v16 = vadd.f32 %v2229_v18, %v2161_v8  ;;  %v2607_v32 = vpop.f32.mrf.mxu3  ;;  %v3317_v18 = vlaneseq  ;;  %v6569_v8 = vld [vmem:[#allocation3_spill] sm:$0xff] }
 0x3bd   :  { %v2267_v36 = vadd.f32 %v2266_v34, %v2230_v16  ;;  %vm3319_vm4 = vcmp.lt.s32.totalorder %v3317_v18, 256  ;;  %v6570_v16 = vld [vmem:[#allocation4_spill] sm:$0xff] }
 0x3bf   :  { %v2308_v24 = vadd.f32 %v2307_v41, %v2267_v36 }
 0x3c0   :  { %v2570_v62 = vpop.f32.mrf.mxu2 }
 0x3c1   :  { %v2409_v25 = vadd.f32 %v2408_v9, %v2308_v24 }
 0x3c2   :  { %v2462_v44 = vpop.f32.mrf.mxu0  ;;  %v2501_v63 = vpop.f32.mrf.mxu1 }
 0x3c3   :  { %v2463_v12 = vadd.f32 %v2462_v44, %v2409_v25  ;;  %v6575_v25 = vld [vmem:[#allocation9_spill] sm:$0xff] }
 0x3c5   :  { %v2502_v10 = vadd.f32 %v2501_v63, %v2463_v12  ;;  %v6571_v63 = vld [vmem:[#allocation5_spill] sm:$0xff]  ;;  %v6576_v12 = vld [vmem:[#allocation10_spill] sm:$0xff] }
 0x3c7   :  { %v2571_v60 = vadd.f32 %v2570_v62, %v2502_v10  ;;  %v6578_v10 = vld [vmem:[#allocation12_spill] sm:$0xff] }
 0x3c9   :  { %v2608_v37 = vadd.f32 %v2607_v32, %v2571_v60 }
 0x3ca   :  { %v2749_v7 = vpop.f32.mrf.mxu1 }
 0x3cb   :  { %v3292_v38 = vsub.f32 0.0, %v2608_v37  ;;  %v6581_v37 = vld [vmem:[#allocation15_spill] sm:$0xff] }
 0x3cd   :  { %v3294_v61 = vmul.f32 1.442695, %v3292_v38 }
 0x3ce   :  { %v2803_v28 = vpop.f32.mrf.mxu2 }
 0x3cf   :  { %3480 = vpow2.f32 %v3294_v61 }
 0x3d0   :  { %v2648_v17 = vpop.f32.mrf.mxu0 }
 0x3d1   :  { %v2649_v29 = vadd.f32 %v2648_v17, %v1918_v0  ;;  %v2842_v39 = vpop.f32.mrf.mxu3  ;;  %v6572_v0 = vld [vmem:[#allocation6_spill] sm:$0xff] }
 0x3d3   :  { %v2750_v42 = vadd.f32 %v2749_v7, %v2649_v29  ;;  %v6573_v29 = vld [vmem:[#allocation7_spill] sm:$0xff]  ;;  %v6574_v7 = vld [vmem:[#allocation8_spill] sm:$0xff] }
 0x3d5   :  { %v2804_v6 = vadd.f32 %v2803_v28, %v2750_v42  ;;  %v3481_v31 = vpop.eup %3480 }
 0x3d6   :  { %v3298_v11 = vadd.f32 1.0, %v3481_v31 }
 0x3d7   :  { %v2843_v48 = vadd.f32 %v2842_v39, %v2804_v6  ;;  %v6577_v39 = vld [vmem:[#allocation11_spill] sm:$0xff] }
 0x3e8   :  { %v2948_v15 = vpop.f32.mrf.mxu1 }
 0x3f0   :  { %v2989_v56 = vpop.f32.mrf.mxu2 }
 0x3f2   :  { %v2911_v21 = vpop.f32.mrf.mxu0 }
 0x3f3   :  { %v2912_v13 = vadd.f32 %v2911_v21, %v2843_v48  ;;  %v3090_v46 = vpop.f32.mrf.mxu3 }
 0x3f5   :  { %v2949_v4 = vadd.f32 %v2948_v15, %v2912_v13  ;;  %v6579_v13 = vld [vmem:[#allocation13_spill] sm:$0xff]  ;;  %v6580_v15 = vld [vmem:[#allocation14_spill] sm:$0xff] }
 0x3f7   :  { %v2990_v19 = vadd.f32 %v2989_v56, %v2949_v4 }
 0x3f9   :  { %v3091_v45 = vadd.f32 %v3090_v46, %v2990_v19  ;;  %v6582_v19 = vld [vmem:[#allocation16_spill] sm:$0xff]  ;;  %v6583_v46 = vld [vmem:[#allocation17_spill] sm:$0xff] }
 0x40a   :  { %v3183_v20 = vpop.f32.mrf.mxu1 }
 0x412   :  { %v3144_v3 = vpop.f32.mrf.mxu0  ;;  %v3252_v55 = vpop.f32.mrf.mxu2 }
 0x413   :  { %v3145_v50 = vadd.f32 %v3144_v3, %v3091_v45  ;;  %v6584_v3 = vld [vmem:[#allocation18_spill] sm:$0xff] }
 0x414   :  { %v3289_v30 = vpop.f32.mrf.mxu3 }
 0x415   :  { %v3184_v53 = vadd.f32 %v3183_v20, %v3145_v50 }
 0x417   :  { %v3253_v57 = vadd.f32 %v3252_v55, %v3184_v53 }
 0x419   :  { %v3290_v47 = vadd.f32 %v3289_v30, %v3253_v57 }
 0x41b   :  { %v3293_v58 = vsub.f32 0.0, %v3290_v47 }
 0x41d   :  { %v3296_v23 = vmul.f32 1.442695, %v3293_v58 }
 0x41f   :  { %3482 = vpow2.f32 %v3296_v23 }
 0x420   :  { %3484 = vrcp.f32 %v3298_v11 }
 0x425   :  { %v3483_v2 = vpop.eup %3482 }
 0x426   :  { %v3299_v1 = vadd.f32 1.0, %v3483_v2  ;;  %v3485_v40 = vpop.eup %3484 }
 0x427   :  { %v3302_v52 = vmul.f32 %v3485_v40, %v3298_v11 }
 0x428   :  { %3486 = vrcp.f32 %v3299_v1 }
 0x429   :  { %v3304_v54 = vsub.f32 2.0, %v3302_v52 }
 0x42b   :  { %v3306_v14 = vmul.f32 %v3485_v40, %v3304_v54 }
 0x42e   :  { %v3487_v27 = vpop.eup %3486 }
 0x42f   :  { %v3303_v5 = vmul.f32 %v3487_v27, %v3299_v1 }
 0x431   :  { %v3305_v49 = vsub.f32 2.0, %v3303_v5 }
 0x433   :  { %v3307_v22 = vmul.f32 %v3487_v27, %v3305_v49 }
 0x435   :  { %v3310_v43 = vrot.slane %v3307_v22, 7 }
 0x437   :  { %v3312_v33 = vsel %vm3311_vm3, %v3306_v14, %v3310_v43  ;;  %v3313_v59 = vsel %vm551_vm1, %v3306_v14, %v3310_v43 }
 0x438   :  { %v3314_v34 = vrot.slane %v3313_v59, 1  ;;  %3321 = vst.msk [vmem:[#allocation2] sm:$0x3] %vm3319_vm4, %v3312_v33 }
 0x43a   :  { %3322 = vst.msk [vmem:[#allocation2 + $0x2] sm:$0x3] %vm3319_vm4, %v3314_v34 }
 0x43f   :  { %v3323_v35 = vld [vmem:[#allocation2] sm:$0x3] }
 0x440   :  { %v3327_v44 = vperm.slane %v3323_v35, 0  ;;  %v3328_v26 = vperm.slane %v3323_v35, 1 }
 0x441   :  { %v3324_v41 = vld [vmem:[#allocation2 + $0x2] sm:$0x3] }
 0x442   :  { %v3335_v51 = vmul.f32 %v3327_v44, %v6569_v8  ;;  %v3336_v9 = vmul.f32 %v3328_v26, %v6570_v16  ;;  %v3337_v17 = vmul.f32 %v3327_v44, %v6571_v63  ;;  %v3338_v36 = vmul.f32 %v3328_v26, %v6572_v0 }
 0x443   :  { %v3329_v62 = vperm.slane %v3324_v41, 0  ;;  %v3339_v24 = vmul.f32 %v3327_v44, %v6573_v29  ;;  %v3330_v32 = vperm.slane %v3324_v41, 1  ;;  %v3340_v42 = vmul.f32 %v3328_v26, %v6574_v7 }
 0x444   :  { %3351 = vst [vmem:[%s6259_s4] sm:$0xff] %v3335_v51  ;;  %v3341_v28 = vmul.f32 %v3327_v44, %v6575_v25  ;;  %v3342_v6 = vmul.f32 %v3328_v26, %v6576_v12 }
 0x445   :  { %3352 = vst [vmem:[%s6259_s4 + $0x8] sm:$0xff] %v3336_v9  ;;  %v3343_v21 = vmul.f32 %v3329_v62, %v6577_v39  ;;  %v3344_v48 = vmul.f32 %v3330_v32, %v6578_v10  ;;  %v3345_v60 = vmul.f32 %v3329_v62, %v6579_v13  ;;  %v3346_v4 = vmul.f32 %v3330_v32, %v6580_v15 }
 0x446   :  { %3353 = vst [vmem:[%s6259_s4 + $0x10] sm:$0xff] %v3337_v17  ;;  %v3347_v56 = vmul.f32 %v3329_v62, %v6581_v37  ;;  %v3348_v38 = vmul.f32 %v3330_v32, %v6582_v19  ;;  %v3349_v45 = vmul.f32 %v3329_v62, %v6583_v46  ;;  %v3350_v61 = vmul.f32 %v3330_v32, %v6584_v3 }
 0x447   :  { %3354 = vst [vmem:[%s6259_s4 + $0x18] sm:$0xff] %v3338_v36 }
 0x448   :  { %3355 = vst [vmem:[%s6259_s4 + $0x20] sm:$0xff] %v3339_v24 }
 0x449   :  { %3356 = vst [vmem:[%s6259_s4 + $0x28] sm:$0xff] %v3340_v42 }
 0x44a   :  { %3357 = vst [vmem:[%s6259_s4 + $0x30] sm:$0xff] %v3341_v28 }
 0x44b   :  { %3358 = vst [vmem:[%s6259_s4 + $0x38] sm:$0xff] %v3342_v6 }
 0x44c   :  { %3359 = vst [vmem:[%s6259_s4 + $0x40] sm:$0xff] %v3343_v21 }
 0x44d   :  { %3360 = vst [vmem:[%s6259_s4 + $0x48] sm:$0xff] %v3344_v48 }
 0x44e   :  { %3361 = vst [vmem:[%s6259_s4 + $0x50] sm:$0xff] %v3345_v60 }
 0x44f   :  { %3362 = vst [vmem:[%s6259_s4 + $0x58] sm:$0xff] %v3346_v4 }
 0x450   :  { %3363 = vst [vmem:[%s6259_s4 + $0x60] sm:$0xff] %v3347_v56 }
 0x451   :  { %3364 = vst [vmem:[%s6259_s4 + $0x68] sm:$0xff] %v3348_v38 }
 0x452   :  { %3365 = vst [vmem:[%s6259_s4 + $0x70] sm:$0xff] %v3349_v45 }
 0x453   :  { %3366 = vst [vmem:[%s6259_s4 + $0x78] sm:$0xff] %v3350_v61 }

</bundles_post_ra>
